<compile_context>
chip_gen: v7x
topology: tpu7x:2x2x1
jax: 0.10.0
libtpu: 0.0.40
codegen_flags: <defaults>
</compile_context>

<pallas_src>
import functools

import numpy as np

import jax
import jax.numpy as jnp
from jax.experimental import pallas as pl
from jax.experimental.pallas import tpu as pltpu


# (stride, pad) per layer, mirroring the nn.Sequential in the PyTorch module.
_LAYER_CFG = [(1, 0), (2, 1), (2, 1), (2, 1), (2, 1), (1, 0)]
_NEG_SLOPE = 0.2


# ---------------------------------------------------------------------------
# Weight preprocessing: fold conv geometry (stride / padding / kernel taps)
# into small dense matrices so the kernel only does 2-D matmuls.
# ---------------------------------------------------------------------------
def _row_select(kh, H, Ho, stride, pad):
    """R[ki, oh, h] = 1  iff  h == stride*oh + ki - pad  (else 0, incl. OOB)."""
    R = np.zeros((kh, Ho, H), np.float32)
    for ki in range(kh):
        for oh in range(Ho):
            h = stride * oh + ki - pad
            if 0 <= h < H:
                R[ki, oh, h] = 1.0
    return jnp.asarray(R)


def _col_weight(w_oihw, W, Wo, stride, pad):
    """T[ki, w*Cin+ci, ow*Cout+co] = w[co, ci, ki, kj]  with  w = stride*ow+kj-pad."""
    Cout, Cin, kh, kw = w_oihw.shape
    P = np.zeros((kw, W, Wo), np.float32)
    for kj in range(kw):
        for ow in range(Wo):
            w = stride * ow + kj - pad
            if 0 <= w < W:
                P[kj, w, ow] = 1.0
    w_t = jnp.transpose(w_oihw, (2, 3, 1, 0))            # (kh, kw, Cin, Cout)
    T = jnp.einsum('jwv,kjio->kwivo', jnp.asarray(P), w_t)  # (kh, W, Cin, Wo, Cout)
    return T.reshape(kh, W * Cin, Wo * Cout)


def prepare(params, input_hw, input_channel):
    """Convert PyTorch-layout (w, b) per layer into kernel inputs."""
    H, W = input_hw
    Cin = input_channel
    flat = []
    has_r = []
    for (w, b), (stride, pad) in zip(params, _LAYER_CFG):
        Cout, Cin_w, kh, kw = w.shape
        assert Cin_w == Cin, (Cin_w, Cin)
        Ho = (H + 2 * pad - kh) // stride + 1
        Wo = (W + 2 * pad - kw) // stride + 1
        need_r = not (kh == 1 and stride == 1 and pad == 0)   # R would be identity
        if need_r:
            flat.append(_row_select(kh, H, Ho, stride, pad))
        flat.append(_col_weight(w.astype(jnp.float32), W, Wo, stride, pad))
        flat.append(jnp.tile(b.astype(jnp.float32), Wo).reshape(1, Wo * Cout))
        has_r.append(need_r)
        H, W, Cin = Ho, Wo, Cout
    return flat, tuple(has_r), (H, W, Cin)   # final (Ho, Wo, Cout)


# ---------------------------------------------------------------------------
# Fused Pallas kernel: whole network for one batch element per grid step.
# ---------------------------------------------------------------------------
def _fused_kernel(*refs, has_r):
    x_ref = refs[0]
    o_ref = refs[-1]
    a = x_ref[0]                                   # (H, W*Cin) for this batch elem
    idx = 1
    n_layers = len(has_r)
    for layer in range(n_layers):
        r_ref = None
        if has_r[layer]:
            r_ref = refs[idx]; idx += 1
        t_ref = refs[idx]; idx += 1
        b_ref = refs[idx]; idx += 1
        kh = t_ref.shape[0]
        acc = None
        for ki in range(kh):
            z = a if r_ref is None else jnp.dot(
                r_ref[ki], a, preferred_element_type=jnp.float32)
            y = jnp.dot(z, t_ref[ki], preferred_element_type=jnp.float32)
            acc = y if acc is None else acc + y
        acc = acc + b_ref[...]
        if layer < n_layers - 1:                    # last conv has no LeakyReLU
            acc = jnp.where(acc > 0, acc, _NEG_SLOPE * acc)
        a = acc
    o_ref[0] = a.astype(o_ref.dtype)


def face_embed_net(x_nchw, prep):
    flat, has_r, (Ho_f, Wo_f, Cout_f) = prep
    N, C, H, W = x_nchw.shape
    x2d = jnp.transpose(x_nchw, (0, 2, 3, 1)).reshape(N, H, W * C)
    out_cols = Wo_f * Cout_f

    in_specs = [pl.BlockSpec((1, H, W * C), lambda i: (i, 0, 0))]
    for arr in flat:
        if arr.ndim == 3:
            in_specs.append(pl.BlockSpec(arr.shape, lambda i: (0, 0, 0)))
        else:
            in_specs.append(pl.BlockSpec(arr.shape, lambda i: (0, 0)))
    out_specs = pl.BlockSpec((1, Ho_f, out_cols), lambda i: (i, 0, 0))

    kernel = functools.partial(_fused_kernel, has_r=has_r)
    out = pl.pallas_call(
        kernel,
        out_shape=jax.ShapeDtypeStruct((N, Ho_f, out_cols), x_nchw.dtype),
        grid_spec=pltpu.PrefetchScalarGridSpec(
            num_scalar_prefetch=0,
            grid=(N,),
            in_specs=in_specs,
            out_specs=out_specs,
        ),
        compiler_params=pltpu.CompilerParams(
            dimension_semantics=("parallel",),
        ),
    )(x2d, *flat)

    out = out.reshape(N, Ho_f, Wo_f, Cout_f)
    return jnp.transpose(out, (0, 3, 1, 2))        # NHWC -> NCHW


# ---------------------------------------------------------------------------
# Params / pure-JAX reference (for correctness check)
# ---------------------------------------------------------------------------
def init_params(key, input_channel, channels, output_channel):
    shapes = [
        (channels[0], input_channel, 1, 1),
        (channels[1], channels[0], 4, 4),
        (channels[2], channels[1], 4, 4),
        (channels[3], channels[2], 4, 4),
        (channels[4], channels[3], 4, 4),
        (output_channel, channels[4], 4, 4),
    ]
    params = []
    for shape in shapes:
        key, kw_key, kb_key = jax.random.split(key, 3)
        fan_in = shape[1] * shape[2] * shape[3]
        w = jax.random.normal(kw_key, shape, jnp.float32) / jnp.sqrt(float(fan_in))
        b = jax.random.normal(kb_key, (shape[0],), jnp.float32) * 0.01
        params.append((w, b))
    return params


def reference_forward(x_nchw, params):
    x = x_nchw
    n_layers = len(params)
    for idx, ((w, b), (stride, pad)) in enumerate(zip(params, _LAYER_CFG)):
        x = jax.lax.conv_general_dilated(
            x, w, (stride, stride), [(pad, pad), (pad, pad)],
            dimension_numbers=("NCHW", "OIHW", "NCHW"))
        x = x + b.reshape(1, -1, 1, 1)
        if idx < n_layers - 1:
            x = jnp.where(x > 0, x, _NEG_SLOPE * x)
    return x


if __name__ == "__main__":
    key = jax.random.PRNGKey(0)
    k_x, k_p = jax.random.split(key)

    input_channel = 3
    channels = [4, 8, 8, 16, 16]
    output_channel = 32

    # Spatial 64 is the smallest size consistent with the module:
    # 64 -> 64 -> 32 -> 16 -> 8 -> 4 -> 1 (final 4x4 valid conv).
    x = jax.random.normal(k_x, (2, input_channel, 64, 64), jnp.float32)
    params = init_params(k_p, input_channel, channels, output_channel)

    prep = prepare(params, (64, 64), input_channel)
    fwd = jax.jit(lambda xx: face_embed_net(xx, prep))

    out = jax.block_until_ready(fwd(x))
    ref = jax.block_until_ready(reference_forward(x, params))

    assert out.shape == (2, output_channel, 1, 1), out.shape
    assert jnp.allclose(out, ref, rtol=1e-4, atol=1e-4), (
        float(jnp.max(jnp.abs(out - ref))))
    print("KERNEL_OK")
</pallas_src>

<mosaic_0001>
module attributes {stable_mosaic.version = 11 : i64} {
  func.func @_fused_kernel(%arg0: i32, %arg1: memref<1x64x192xf32, #tpu.memory_space<vmem>>, %arg2: memref<1x192x256xf32, #tpu.memory_space<vmem>>, %arg3: memref<1x256xf32, #tpu.memory_space<vmem>>, %arg4: memref<4x32x64xf32, #tpu.memory_space<vmem>>, %arg5: memref<4x256x256xf32, #tpu.memory_space<vmem>>, %arg6: memref<1x256xf32, #tpu.memory_space<vmem>>, %arg7: memref<4x16x32xf32, #tpu.memory_space<vmem>>, %arg8: memref<4x256x128xf32, #tpu.memory_space<vmem>>, %arg9: memref<1x128xf32, #tpu.memory_space<vmem>>, %arg10: memref<4x8x16xf32, #tpu.memory_space<vmem>>, %arg11: memref<4x128x128xf32, #tpu.memory_space<vmem>>, %arg12: memref<1x128xf32, #tpu.memory_space<vmem>>, %arg13: memref<4x4x8xf32, #tpu.memory_space<vmem>>, %arg14: memref<4x128x64xf32, #tpu.memory_space<vmem>>, %arg15: memref<1x64xf32, #tpu.memory_space<vmem>>, %arg16: memref<4x1x4xf32, #tpu.memory_space<vmem>>, %arg17: memref<4x64x32xf32, #tpu.memory_space<vmem>>, %arg18: memref<1x32xf32, #tpu.memory_space<vmem>>, %arg19: memref<1x1x32xf32, #tpu.memory_space<vmem>>) attributes {dimension_semantics = [#tpu.dimension_semantics<parallel>], iteration_bounds = array<i64: 2>, scalar_prefetch = 0 : i64, scratch_operands = 0 : i64, tpu.core_type = #tpu.core_type<tc>, window_params = [{transform_indices = @transform_0, window_bounds = array<i64: 1, 64, 192>}, {pipeline_mode = #tpu.pipeline_mode<synchronous>, transform_indices = @transform_1, window_bounds = array<i64: 1, 192, 256>}, {pipeline_mode = #tpu.pipeline_mode<synchronous>, transform_indices = @transform_2, window_bounds = array<i64: 1, 256>}, {pipeline_mode = #tpu.pipeline_mode<synchronous>, transform_indices = @transform_3, window_bounds = array<i64: 4, 32, 64>}, {pipeline_mode = #tpu.pipeline_mode<synchronous>, transform_indices = @transform_4, window_bounds = array<i64: 4, 256, 256>}, {pipeline_mode = #tpu.pipeline_mode<synchronous>, transform_indices = @transform_5, window_bounds = array<i64: 1, 256>}, {pipeline_mode = #tpu.pipeline_mode<synchronous>, transform_indices = @transform_6, window_bounds = array<i64: 4, 16, 32>}, {pipeline_mode = #tpu.pipeline_mode<synchronous>, transform_indices = @transform_7, window_bounds = array<i64: 4, 256, 128>}, {pipeline_mode = #tpu.pipeline_mode<synchronous>, transform_indices = @transform_8, window_bounds = array<i64: 1, 128>}, {pipeline_mode = #tpu.pipeline_mode<synchronous>, transform_indices = @transform_9, window_bounds = array<i64: 4, 8, 16>}, {pipeline_mode = #tpu.pipeline_mode<synchronous>, transform_indices = @transform_10, window_bounds = array<i64: 4, 128, 128>}, {pipeline_mode = #tpu.pipeline_mode<synchronous>, transform_indices = @transform_11, window_bounds = array<i64: 1, 128>}, {pipeline_mode = #tpu.pipeline_mode<synchronous>, transform_indices = @transform_12, window_bounds = array<i64: 4, 4, 8>}, {pipeline_mode = #tpu.pipeline_mode<synchronous>, transform_indices = @transform_13, window_bounds = array<i64: 4, 128, 64>}, {pipeline_mode = #tpu.pipeline_mode<synchronous>, transform_indices = @transform_14, window_bounds = array<i64: 1, 64>}, {pipeline_mode = #tpu.pipeline_mode<synchronous>, transform_indices = @transform_15, window_bounds = array<i64: 4, 1, 4>}, {pipeline_mode = #tpu.pipeline_mode<synchronous>, transform_indices = @transform_16, window_bounds = array<i64: 4, 64, 32>}, {pipeline_mode = #tpu.pipeline_mode<synchronous>, transform_indices = @transform_17, window_bounds = array<i64: 1, 32>}, {transform_indices = @transform_18, window_bounds = array<i64: 1, 1, 32>}]} {
    %c0 = arith.constant 0 : index
    %c0_0 = arith.constant 0 : index
    %c0_1 = arith.constant 0 : index
    %0 = vector.load %arg1[%c0, %c0_0, %c0_1] : memref<1x64x192xf32, #tpu.memory_space<vmem>>, vector<1x64x192xf32>
    %1 = vector.shape_cast %0 : vector<1x64x192xf32> to vector<64x192xf32>
    %c0_2 = arith.constant 0 : index
    %c0_3 = arith.constant 0 : index
    %c0_4 = arith.constant 0 : index
    %2 = vector.load %arg2[%c0_2, %c0_3, %c0_4] : memref<1x192x256xf32, #tpu.memory_space<vmem>>, vector<1x192x256xf32>
    %3 = vector.shape_cast %2 : vector<1x192x256xf32> to vector<192x256xf32>
    %cst = arith.constant dense<0.000000e+00> : vector<64x256xf32>
    %4 = tpu.matmul %1, %3, %cst {dimension_numbers = #tpu.dot_dimension_numbers<[1], [0], [0], [1], [0, 0, 1, 1], [], []>} : vector<64x192xf32>, vector<192x256xf32>, vector<64x256xf32> -> vector<64x256xf32>
    %c0_5 = arith.constant 0 : index
    %c0_6 = arith.constant 0 : index
    %5 = vector.load %arg3[%c0_5, %c0_6] : memref<1x256xf32, #tpu.memory_space<vmem>>, vector<1x256xf32>
    %6 = vector.broadcast %5 : vector<1x256xf32> to vector<64x256xf32>
    %7 = arith.addf %4, %6 : vector<64x256xf32>
    %cst_7 = arith.constant 0.000000e+00 : f32
    %8 = vector.broadcast %cst_7 : f32 to vector<64x256xf32>
    %9 = arith.cmpf ogt, %7, %8 : vector<64x256xf32>
    %cst_8 = arith.constant 2.000000e-01 : f32
    %10 = vector.broadcast %cst_8 : f32 to vector<64x256xf32>
    %11 = arith.mulf %10, %7 : vector<64x256xf32>
    %12 = arith.select %9, %7, %11 : vector<64x256xi1>, vector<64x256xf32>
    %c0_9 = arith.constant 0 : index
    %c0_10 = arith.constant 0 : index
    %c0_11 = arith.constant 0 : index
    %13 = vector.load %arg4[%c0_9, %c0_10, %c0_11] : memref<4x32x64xf32, #tpu.memory_space<vmem>>, vector<1x32x64xf32>
    %14 = vector.shape_cast %13 : vector<1x32x64xf32> to vector<32x64xf32>
    %cst_12 = arith.constant dense<0.000000e+00> : vector<32x256xf32>
    %15 = tpu.matmul %14, %12, %cst_12 {dimension_numbers = #tpu.dot_dimension_numbers<[1], [0], [0], [1], [0, 0, 1, 1], [], []>} : vector<32x64xf32>, vector<64x256xf32>, vector<32x256xf32> -> vector<32x256xf32>
    %c0_13 = arith.constant 0 : index
    %c0_14 = arith.constant 0 : index
    %c0_15 = arith.constant 0 : index
    %16 = vector.load %arg5[%c0_13, %c0_14, %c0_15] : memref<4x256x256xf32, #tpu.memory_space<vmem>>, vector<1x256x256xf32>
    %17 = vector.shape_cast %16 : vector<1x256x256xf32> to vector<256x256xf32>
    %cst_16 = arith.constant dense<0.000000e+00> : vector<32x256xf32>
    %18 = tpu.matmul %15, %17, %cst_16 {dimension_numbers = #tpu.dot_dimension_numbers<[1], [0], [0], [1], [0, 0, 1, 1], [], []>} : vector<32x256xf32>, vector<256x256xf32>, vector<32x256xf32> -> vector<32x256xf32>
    %c1 = arith.constant 1 : index
    %c0_17 = arith.constant 0 : index
    %c0_18 = arith.constant 0 : index
    %19 = vector.load %arg4[%c1, %c0_17, %c0_18] : memref<4x32x64xf32, #tpu.memory_space<vmem>>, vector<1x32x64xf32>
    %20 = vector.shape_cast %19 : vector<1x32x64xf32> to vector<32x64xf32>
    %cst_19 = arith.constant dense<0.000000e+00> : vector<32x256xf32>
    %21 = tpu.matmul %20, %12, %cst_19 {dimension_numbers = #tpu.dot_dimension_numbers<[1], [0], [0], [1], [0, 0, 1, 1], [], []>} : vector<32x64xf32>, vector<64x256xf32>, vector<32x256xf32> -> vector<32x256xf32>
    %c1_20 = arith.constant 1 : index
    %c0_21 = arith.constant 0 : index
    %c0_22 = arith.constant 0 : index
    %22 = vector.load %arg5[%c1_20, %c0_21, %c0_22] : memref<4x256x256xf32, #tpu.memory_space<vmem>>, vector<1x256x256xf32>
    %23 = vector.shape_cast %22 : vector<1x256x256xf32> to vector<256x256xf32>
    %cst_23 = arith.constant dense<0.000000e+00> : vector<32x256xf32>
    %24 = tpu.matmul %21, %23, %cst_23 {dimension_numbers = #tpu.dot_dimension_numbers<[1], [0], [0], [1], [0, 0, 1, 1], [], []>} : vector<32x256xf32>, vector<256x256xf32>, vector<32x256xf32> -> vector<32x256xf32>
    %25 = arith.addf %18, %24 : vector<32x256xf32>
    %c2 = arith.constant 2 : index
    %c0_24 = arith.constant 0 : index
    %c0_25 = arith.constant 0 : index
    %26 = vector.load %arg4[%c2, %c0_24, %c0_25] : memref<4x32x64xf32, #tpu.memory_space<vmem>>, vector<1x32x64xf32>
    %27 = vector.shape_cast %26 : vector<1x32x64xf32> to vector<32x64xf32>
    %cst_26 = arith.constant dense<0.000000e+00> : vector<32x256xf32>
    %28 = tpu.matmul %27, %12, %cst_26 {dimension_numbers = #tpu.dot_dimension_numbers<[1], [0], [0], [1], [0, 0, 1, 1], [], []>} : vector<32x64xf32>, vector<64x256xf32>, vector<32x256xf32> -> vector<32x256xf32>
    %c2_27 = arith.constant 2 : index
    %c0_28 = arith.constant 0 : index
    %c0_29 = arith.constant 0 : index
    %29 = vector.load %arg5[%c2_27, %c0_28, %c0_29] : memref<4x256x256xf32, #tpu.memory_space<vmem>>, vector<1x256x256xf32>
    %30 = vector.shape_cast %29 : vector<1x256x256xf32> to vector<256x256xf32>
    %cst_30 = arith.constant dense<0.000000e+00> : vector<32x256xf32>
    %31 = tpu.matmul %28, %30, %cst_30 {dimension_numbers = #tpu.dot_dimension_numbers<[1], [0], [0], [1], [0, 0, 1, 1], [], []>} : vector<32x256xf32>, vector<256x256xf32>, vector<32x256xf32> -> vector<32x256xf32>
    %32 = arith.addf %25, %31 : vector<32x256xf32>
    %c3 = arith.constant 3 : index
    %c0_31 = arith.constant 0 : index
    %c0_32 = arith.constant 0 : index
    %33 = vector.load %arg4[%c3, %c0_31, %c0_32] : memref<4x32x64xf32, #tpu.memory_space<vmem>>, vector<1x32x64xf32>
    %34 = vector.shape_cast %33 : vector<1x32x64xf32> to vector<32x64xf32>
    %cst_33 = arith.constant dense<0.000000e+00> : vector<32x256xf32>
    %35 = tpu.matmul %34, %12, %cst_33 {dimension_numbers = #tpu.dot_dimension_numbers<[1], [0], [0], [1], [0, 0, 1, 1], [], []>} : vector<32x64xf32>, vector<64x256xf32>, vector<32x256xf32> -> vector<32x256xf32>
    %c3_34 = arith.constant 3 : index
    %c0_35 = arith.constant 0 : index
    %c0_36 = arith.constant 0 : index
    %36 = vector.load %arg5[%c3_34, %c0_35, %c0_36] : memref<4x256x256xf32, #tpu.memory_space<vmem>>, vector<1x256x256xf32>
    %37 = vector.shape_cast %36 : vector<1x256x256xf32> to vector<256x256xf32>
    %cst_37 = arith.constant dense<0.000000e+00> : vector<32x256xf32>
    %38 = tpu.matmul %35, %37, %cst_37 {dimension_numbers = #tpu.dot_dimension_numbers<[1], [0], [0], [1], [0, 0, 1, 1], [], []>} : vector<32x256xf32>, vector<256x256xf32>, vector<32x256xf32> -> vector<32x256xf32>
    %39 = arith.addf %32, %38 : vector<32x256xf32>
    %c0_38 = arith.constant 0 : index
    %c0_39 = arith.constant 0 : index
    %40 = vector.load %arg6[%c0_38, %c0_39] : memref<1x256xf32, #tpu.memory_space<vmem>>, vector<1x256xf32>
    %41 = vector.broadcast %40 : vector<1x256xf32> to vector<32x256xf32>
    %42 = arith.addf %39, %41 : vector<32x256xf32>
    %cst_40 = arith.constant 0.000000e+00 : f32
    %43 = vector.broadcast %cst_40 : f32 to vector<32x256xf32>
    %44 = arith.cmpf ogt, %42, %43 : vector<32x256xf32>
    %cst_41 = arith.constant 2.000000e-01 : f32
    %45 = vector.broadcast %cst_41 : f32 to vector<32x256xf32>
    %46 = arith.mulf %45, %42 : vector<32x256xf32>
    %47 = arith.select %44, %42, %46 : vector<32x256xi1>, vector<32x256xf32>
    %c0_42 = arith.constant 0 : index
    %c0_43 = arith.constant 0 : index
    %c0_44 = arith.constant 0 : index
    %48 = vector.load %arg7[%c0_42, %c0_43, %c0_44] : memref<4x16x32xf32, #tpu.memory_space<vmem>>, vector<1x16x32xf32>
    %49 = vector.shape_cast %48 : vector<1x16x32xf32> to vector<16x32xf32>
    %cst_45 = arith.constant dense<0.000000e+00> : vector<16x256xf32>
    %50 = tpu.matmul %49, %47, %cst_45 {dimension_numbers = #tpu.dot_dimension_numbers<[1], [0], [0], [1], [0, 0, 1, 1], [], []>} : vector<16x32xf32>, vector<32x256xf32>, vector<16x256xf32> -> vector<16x256xf32>
    %c0_46 = arith.constant 0 : index
    %c0_47 = arith.constant 0 : index
    %c0_48 = arith.constant 0 : index
    %51 = vector.load %arg8[%c0_46, %c0_47, %c0_48] : memref<4x256x128xf32, #tpu.memory_space<vmem>>, vector<1x256x128xf32>
    %52 = vector.shape_cast %51 : vector<1x256x128xf32> to vector<256x128xf32>
    %cst_49 = arith.constant dense<0.000000e+00> : vector<16x128xf32>
    %53 = tpu.matmul %50, %52, %cst_49 {dimension_numbers = #tpu.dot_dimension_numbers<[1], [0], [0], [1], [0, 0, 1, 1], [], []>} : vector<16x256xf32>, vector<256x128xf32>, vector<16x128xf32> -> vector<16x128xf32>
    %c1_50 = arith.constant 1 : index
    %c0_51 = arith.constant 0 : index
    %c0_52 = arith.constant 0 : index
    %54 = vector.load %arg7[%c1_50, %c0_51, %c0_52] : memref<4x16x32xf32, #tpu.memory_space<vmem>>, vector<1x16x32xf32>
    %55 = vector.shape_cast %54 : vector<1x16x32xf32> to vector<16x32xf32>
    %cst_53 = arith.constant dense<0.000000e+00> : vector<16x256xf32>
    %56 = tpu.matmul %55, %47, %cst_53 {dimension_numbers = #tpu.dot_dimension_numbers<[1], [0], [0], [1], [0, 0, 1, 1], [], []>} : vector<16x32xf32>, vector<32x256xf32>, vector<16x256xf32> -> vector<16x256xf32>
    %c1_54 = arith.constant 1 : index
    %c0_55 = arith.constant 0 : index
    %c0_56 = arith.constant 0 : index
    %57 = vector.load %arg8[%c1_54, %c0_55, %c0_56] : memref<4x256x128xf32, #tpu.memory_space<vmem>>, vector<1x256x128xf32>
    %58 = vector.shape_cast %57 : vector<1x256x128xf32> to vector<256x128xf32>
    %cst_57 = arith.constant dense<0.000000e+00> : vector<16x128xf32>
    %59 = tpu.matmul %56, %58, %cst_57 {dimension_numbers = #tpu.dot_dimension_numbers<[1], [0], [0], [1], [0, 0, 1, 1], [], []>} : vector<16x256xf32>, vector<256x128xf32>, vector<16x128xf32> -> vector<16x128xf32>
    %60 = arith.addf %53, %59 : vector<16x128xf32>
    %c2_58 = arith.constant 2 : index
    %c0_59 = arith.constant 0 : index
    %c0_60 = arith.constant 0 : index
    %61 = vector.load %arg7[%c2_58, %c0_59, %c0_60] : memref<4x16x32xf32, #tpu.memory_space<vmem>>, vector<1x16x32xf32>
    %62 = vector.shape_cast %61 : vector<1x16x32xf32> to vector<16x32xf32>
    %cst_61 = arith.constant dense<0.000000e+00> : vector<16x256xf32>
    %63 = tpu.matmul %62, %47, %cst_61 {dimension_numbers = #tpu.dot_dimension_numbers<[1], [0], [0], [1], [0, 0, 1, 1], [], []>} : vector<16x32xf32>, vector<32x256xf32>, vector<16x256xf32> -> vector<16x256xf32>
    %c2_62 = arith.constant 2 : index
    %c0_63 = arith.constant 0 : index
    %c0_64 = arith.constant 0 : index
    %64 = vector.load %arg8[%c2_62, %c0_63, %c0_64] : memref<4x256x128xf32, #tpu.memory_space<vmem>>, vector<1x256x128xf32>
    %65 = vector.shape_cast %64 : vector<1x256x128xf32> to vector<256x128xf32>
    %cst_65 = arith.constant dense<0.000000e+00> : vector<16x128xf32>
    %66 = tpu.matmul %63, %65, %cst_65 {dimension_numbers = #tpu.dot_dimension_numbers<[1], [0], [0], [1], [0, 0, 1, 1], [], []>} : vector<16x256xf32>, vector<256x128xf32>, vector<16x128xf32> -> vector<16x128xf32>
    %67 = arith.addf %60, %66 : vector<16x128xf32>
    %c3_66 = arith.constant 3 : index
    %c0_67 = arith.constant 0 : index
    %c0_68 = arith.constant 0 : index
    %68 = vector.load %arg7[%c3_66, %c0_67, %c0_68] : memref<4x16x32xf32, #tpu.memory_space<vmem>>, vector<1x16x32xf32>
    %69 = vector.shape_cast %68 : vector<1x16x32xf32> to vector<16x32xf32>
    %cst_69 = arith.constant dense<0.000000e+00> : vector<16x256xf32>
    %70 = tpu.matmul %69, %47, %cst_69 {dimension_numbers = #tpu.dot_dimension_numbers<[1], [0], [0], [1], [0, 0, 1, 1], [], []>} : vector<16x32xf32>, vector<32x256xf32>, vector<16x256xf32> -> vector<16x256xf32>
    %c3_70 = arith.constant 3 : index
    %c0_71 = arith.constant 0 : index
    %c0_72 = arith.constant 0 : index
    %71 = vector.load %arg8[%c3_70, %c0_71, %c0_72] : memref<4x256x128xf32, #tpu.memory_space<vmem>>, vector<1x256x128xf32>
    %72 = vector.shape_cast %71 : vector<1x256x128xf32> to vector<256x128xf32>
    %cst_73 = arith.constant dense<0.000000e+00> : vector<16x128xf32>
    %73 = tpu.matmul %70, %72, %cst_73 {dimension_numbers = #tpu.dot_dimension_numbers<[1], [0], [0], [1], [0, 0, 1, 1], [], []>} : vector<16x256xf32>, vector<256x128xf32>, vector<16x128xf32> -> vector<16x128xf32>
    %74 = arith.addf %67, %73 : vector<16x128xf32>
    %c0_74 = arith.constant 0 : index
    %c0_75 = arith.constant 0 : index
    %75 = vector.load %arg9[%c0_74, %c0_75] : memref<1x128xf32, #tpu.memory_space<vmem>>, vector<1x128xf32>
    %76 = vector.broadcast %75 : vector<1x128xf32> to vector<16x128xf32>
    %77 = arith.addf %74, %76 : vector<16x128xf32>
    %cst_76 = arith.constant 0.000000e+00 : f32
    %78 = vector.broadcast %cst_76 : f32 to vector<16x128xf32>
    %79 = arith.cmpf ogt, %77, %78 : vector<16x128xf32>
    %cst_77 = arith.constant 2.000000e-01 : f32
    %80 = vector.broadcast %cst_77 : f32 to vector<16x128xf32>
    %81 = arith.mulf %80, %77 : vector<16x128xf32>
    %82 = arith.select %79, %77, %81 : vector<16x128xi1>, vector<16x128xf32>
    %c0_78 = arith.constant 0 : index
    %c0_79 = arith.constant 0 : index
    %c0_80 = arith.constant 0 : index
    %83 = vector.load %arg10[%c0_78, %c0_79, %c0_80] : memref<4x8x16xf32, #tpu.memory_space<vmem>>, vector<1x8x16xf32>
    %84 = vector.shape_cast %83 : vector<1x8x16xf32> to vector<8x16xf32>
    %cst_81 = arith.constant dense<0.000000e+00> : vector<8x128xf32>
    %85 = tpu.matmul %84, %82, %cst_81 {dimension_numbers = #tpu.dot_dimension_numbers<[1], [0], [0], [1], [0, 0, 1, 1], [], []>} : vector<8x16xf32>, vector<16x128xf32>, vector<8x128xf32> -> vector<8x128xf32>
    %c0_82 = arith.constant 0 : index
    %c0_83 = arith.constant 0 : index
    %c0_84 = arith.constant 0 : index
    %86 = vector.load %arg11[%c0_82, %c0_83, %c0_84] : memref<4x128x128xf32, #tpu.memory_space<vmem>>, vector<1x128x128xf32>
    %87 = vector.shape_cast %86 : vector<1x128x128xf32> to vector<128x128xf32>
    %cst_85 = arith.constant dense<0.000000e+00> : vector<8x128xf32>
    %88 = tpu.matmul %85, %87, %cst_85 {dimension_numbers = #tpu.dot_dimension_numbers<[1], [0], [0], [1], [0, 0, 1, 1], [], []>} : vector<8x128xf32>, vector<128x128xf32>, vector<8x128xf32> -> vector<8x128xf32>
    %c1_86 = arith.constant 1 : index
    %c0_87 = arith.constant 0 : index
    %c0_88 = arith.constant 0 : index
    %89 = vector.load %arg10[%c1_86, %c0_87, %c0_88] : memref<4x8x16xf32, #tpu.memory_space<vmem>>, vector<1x8x16xf32>
    %90 = vector.shape_cast %89 : vector<1x8x16xf32> to vector<8x16xf32>
    %cst_89 = arith.constant dense<0.000000e+00> : vector<8x128xf32>
    %91 = tpu.matmul %90, %82, %cst_89 {dimension_numbers = #tpu.dot_dimension_numbers<[1], [0], [0], [1], [0, 0, 1, 1], [], []>} : vector<8x16xf32>, vector<16x128xf32>, vector<8x128xf32> -> vector<8x128xf32>
    %c1_90 = arith.constant 1 : index
    %c0_91 = arith.constant 0 : index
    %c0_92 = arith.constant 0 : index
    %92 = vector.load %arg11[%c1_90, %c0_91, %c0_92] : memref<4x128x128xf32, #tpu.memory_space<vmem>>, vector<1x128x128xf32>
    %93 = vector.shape_cast %92 : vector<1x128x128xf32> to vector<128x128xf32>
    %cst_93 = arith.constant dense<0.000000e+00> : vector<8x128xf32>
    %94 = tpu.matmul %91, %93, %cst_93 {dimension_numbers = #tpu.dot_dimension_numbers<[1], [0], [0], [1], [0, 0, 1, 1], [], []>} : vector<8x128xf32>, vector<128x128xf32>, vector<8x128xf32> -> vector<8x128xf32>
    %95 = arith.addf %88, %94 : vector<8x128xf32>
    %c2_94 = arith.constant 2 : index
    %c0_95 = arith.constant 0 : index
    %c0_96 = arith.constant 0 : index
    %96 = vector.load %arg10[%c2_94, %c0_95, %c0_96] : memref<4x8x16xf32, #tpu.memory_space<vmem>>, vector<1x8x16xf32>
    %97 = vector.shape_cast %96 : vector<1x8x16xf32> to vector<8x16xf32>
    %cst_97 = arith.constant dense<0.000000e+00> : vector<8x128xf32>
    %98 = tpu.matmul %97, %82, %cst_97 {dimension_numbers = #tpu.dot_dimension_numbers<[1], [0], [0], [1], [0, 0, 1, 1], [], []>} : vector<8x16xf32>, vector<16x128xf32>, vector<8x128xf32> -> vector<8x128xf32>
    %c2_98 = arith.constant 2 : index
    %c0_99 = arith.constant 0 : index
    %c0_100 = arith.constant 0 : index
    %99 = vector.load %arg11[%c2_98, %c0_99, %c0_100] : memref<4x128x128xf32, #tpu.memory_space<vmem>>, vector<1x128x128xf32>
    %100 = vector.shape_cast %99 : vector<1x128x128xf32> to vector<128x128xf32>
    %cst_101 = arith.constant dense<0.000000e+00> : vector<8x128xf32>
    %101 = tpu.matmul %98, %100, %cst_101 {dimension_numbers = #tpu.dot_dimension_numbers<[1], [0], [0], [1], [0, 0, 1, 1], [], []>} : vector<8x128xf32>, vector<128x128xf32>, vector<8x128xf32> -> vector<8x128xf32>
    %102 = arith.addf %95, %101 : vector<8x128xf32>
    %c3_102 = arith.constant 3 : index
    %c0_103 = arith.constant 0 : index
    %c0_104 = arith.constant 0 : index
    %103 = vector.load %arg10[%c3_102, %c0_103, %c0_104] : memref<4x8x16xf32, #tpu.memory_space<vmem>>, vector<1x8x16xf32>
    %104 = vector.shape_cast %103 : vector<1x8x16xf32> to vector<8x16xf32>
    %cst_105 = arith.constant dense<0.000000e+00> : vector<8x128xf32>
    %105 = tpu.matmul %104, %82, %cst_105 {dimension_numbers = #tpu.dot_dimension_numbers<[1], [0], [0], [1], [0, 0, 1, 1], [], []>} : vector<8x16xf32>, vector<16x128xf32>, vector<8x128xf32> -> vector<8x128xf32>
    %c3_106 = arith.constant 3 : index
    %c0_107 = arith.constant 0 : index
    %c0_108 = arith.constant 0 : index
    %106 = vector.load %arg11[%c3_106, %c0_107, %c0_108] : memref<4x128x128xf32, #tpu.memory_space<vmem>>, vector<1x128x128xf32>
    %107 = vector.shape_cast %106 : vector<1x128x128xf32> to vector<128x128xf32>
    %cst_109 = arith.constant dense<0.000000e+00> : vector<8x128xf32>
    %108 = tpu.matmul %105, %107, %cst_109 {dimension_numbers = #tpu.dot_dimension_numbers<[1], [0], [0], [1], [0, 0, 1, 1], [], []>} : vector<8x128xf32>, vector<128x128xf32>, vector<8x128xf32> -> vector<8x128xf32>
    %109 = arith.addf %102, %108 : vector<8x128xf32>
    %c0_110 = arith.constant 0 : index
    %c0_111 = arith.constant 0 : index
    %110 = vector.load %arg12[%c0_110, %c0_111] : memref<1x128xf32, #tpu.memory_space<vmem>>, vector<1x128xf32>
    %111 = vector.broadcast %110 : vector<1x128xf32> to vector<8x128xf32>
    %112 = arith.addf %109, %111 : vector<8x128xf32>
    %cst_112 = arith.constant 0.000000e+00 : f32
    %113 = vector.broadcast %cst_112 : f32 to vector<8x128xf32>
    %114 = arith.cmpf ogt, %112, %113 : vector<8x128xf32>
    %cst_113 = arith.constant 2.000000e-01 : f32
    %115 = vector.broadcast %cst_113 : f32 to vector<8x128xf32>
    %116 = arith.mulf %115, %112 : vector<8x128xf32>
    %117 = arith.select %114, %112, %116 : vector<8x128xi1>, vector<8x128xf32>
    %c0_114 = arith.constant 0 : index
    %c0_115 = arith.constant 0 : index
    %c0_116 = arith.constant 0 : index
    %118 = vector.load %arg13[%c0_114, %c0_115, %c0_116] : memref<4x4x8xf32, #tpu.memory_space<vmem>>, vector<1x4x8xf32>
    %119 = vector.shape_cast %118 : vector<1x4x8xf32> to vector<4x8xf32>
    %cst_117 = arith.constant dense<0.000000e+00> : vector<4x128xf32>
    %120 = tpu.matmul %119, %117, %cst_117 {dimension_numbers = #tpu.dot_dimension_numbers<[1], [0], [0], [1], [0, 0, 1, 1], [], []>} : vector<4x8xf32>, vector<8x128xf32>, vector<4x128xf32> -> vector<4x128xf32>
    %c0_118 = arith.constant 0 : index
    %c0_119 = arith.constant 0 : index
    %c0_120 = arith.constant 0 : index
    %121 = vector.load %arg14[%c0_118, %c0_119, %c0_120] : memref<4x128x64xf32, #tpu.memory_space<vmem>>, vector<1x128x64xf32>
    %122 = vector.shape_cast %121 : vector<1x128x64xf32> to vector<128x64xf32>
    %cst_121 = arith.constant dense<0.000000e+00> : vector<4x64xf32>
    %123 = tpu.matmul %120, %122, %cst_121 {dimension_numbers = #tpu.dot_dimension_numbers<[1], [0], [0], [1], [0, 0, 1, 1], [], []>} : vector<4x128xf32>, vector<128x64xf32>, vector<4x64xf32> -> vector<4x64xf32>
    %c1_122 = arith.constant 1 : index
    %c0_123 = arith.constant 0 : index
    %c0_124 = arith.constant 0 : index
    %124 = vector.load %arg13[%c1_122, %c0_123, %c0_124] : memref<4x4x8xf32, #tpu.memory_space<vmem>>, vector<1x4x8xf32>
    %125 = vector.shape_cast %124 : vector<1x4x8xf32> to vector<4x8xf32>
    %cst_125 = arith.constant dense<0.000000e+00> : vector<4x128xf32>
    %126 = tpu.matmul %125, %117, %cst_125 {dimension_numbers = #tpu.dot_dimension_numbers<[1], [0], [0], [1], [0, 0, 1, 1], [], []>} : vector<4x8xf32>, vector<8x128xf32>, vector<4x128xf32> -> vector<4x128xf32>
    %c1_126 = arith.constant 1 : index
    %c0_127 = arith.constant 0 : index
    %c0_128 = arith.constant 0 : index
    %127 = vector.load %arg14[%c1_126, %c0_127, %c0_128] : memref<4x128x64xf32, #tpu.memory_space<vmem>>, vector<1x128x64xf32>
    %128 = vector.shape_cast %127 : vector<1x128x64xf32> to vector<128x64xf32>
    %cst_129 = arith.constant dense<0.000000e+00> : vector<4x64xf32>
    %129 = tpu.matmul %126, %128, %cst_129 {dimension_numbers = #tpu.dot_dimension_numbers<[1], [0], [0], [1], [0, 0, 1, 1], [], []>} : vector<4x128xf32>, vector<128x64xf32>, vector<4x64xf32> -> vector<4x64xf32>
    %130 = arith.addf %123, %129 : vector<4x64xf32>
    %c2_130 = arith.constant 2 : index
    %c0_131 = arith.constant 0 : index
    %c0_132 = arith.constant 0 : index
    %131 = vector.load %arg13[%c2_130, %c0_131, %c0_132] : memref<4x4x8xf32, #tpu.memory_space<vmem>>, vector<1x4x8xf32>
    %132 = vector.shape_cast %131 : vector<1x4x8xf32> to vector<4x8xf32>
    %cst_133 = arith.constant dense<0.000000e+00> : vector<4x128xf32>
    %133 = tpu.matmul %132, %117, %cst_133 {dimension_numbers = #tpu.dot_dimension_numbers<[1], [0], [0], [1], [0, 0, 1, 1], [], []>} : vector<4x8xf32>, vector<8x128xf32>, vector<4x128xf32> -> vector<4x128xf32>
    %c2_134 = arith.constant 2 : index
    %c0_135 = arith.constant 0 : index
    %c0_136 = arith.constant 0 : index
    %134 = vector.load %arg14[%c2_134, %c0_135, %c0_136] : memref<4x128x64xf32, #tpu.memory_space<vmem>>, vector<1x128x64xf32>
    %135 = vector.shape_cast %134 : vector<1x128x64xf32> to vector<128x64xf32>
    %cst_137 = arith.constant dense<0.000000e+00> : vector<4x64xf32>
    %136 = tpu.matmul %133, %135, %cst_137 {dimension_numbers = #tpu.dot_dimension_numbers<[1], [0], [0], [1], [0, 0, 1, 1], [], []>} : vector<4x128xf32>, vector<128x64xf32>, vector<4x64xf32> -> vector<4x64xf32>
    %137 = arith.addf %130, %136 : vector<4x64xf32>
    %c3_138 = arith.constant 3 : index
    %c0_139 = arith.constant 0 : index
    %c0_140 = arith.constant 0 : index
    %138 = vector.load %arg13[%c3_138, %c0_139, %c0_140] : memref<4x4x8xf32, #tpu.memory_space<vmem>>, vector<1x4x8xf32>
    %139 = vector.shape_cast %138 : vector<1x4x8xf32> to vector<4x8xf32>
    %cst_141 = arith.constant dense<0.000000e+00> : vector<4x128xf32>
    %140 = tpu.matmul %139, %117, %cst_141 {dimension_numbers = #tpu.dot_dimension_numbers<[1], [0], [0], [1], [0, 0, 1, 1], [], []>} : vector<4x8xf32>, vector<8x128xf32>, vector<4x128xf32> -> vector<4x128xf32>
    %c3_142 = arith.constant 3 : index
    %c0_143 = arith.constant 0 : index
    %c0_144 = arith.constant 0 : index
    %141 = vector.load %arg14[%c3_142, %c0_143, %c0_144] : memref<4x128x64xf32, #tpu.memory_space<vmem>>, vector<1x128x64xf32>
    %142 = vector.shape_cast %141 : vector<1x128x64xf32> to vector<128x64xf32>
    %cst_145 = arith.constant dense<0.000000e+00> : vector<4x64xf32>
    %143 = tpu.matmul %140, %142, %cst_145 {dimension_numbers = #tpu.dot_dimension_numbers<[1], [0], [0], [1], [0, 0, 1, 1], [], []>} : vector<4x128xf32>, vector<128x64xf32>, vector<4x64xf32> -> vector<4x64xf32>
    %144 = arith.addf %137, %143 : vector<4x64xf32>
    %c0_146 = arith.constant 0 : index
    %c0_147 = arith.constant 0 : index
    %145 = vector.load %arg15[%c0_146, %c0_147] : memref<1x64xf32, #tpu.memory_space<vmem>>, vector<1x64xf32>
    %146 = vector.broadcast %145 : vector<1x64xf32> to vector<4x64xf32>
    %147 = arith.addf %144, %146 : vector<4x64xf32>
    %cst_148 = arith.constant 0.000000e+00 : f32
    %148 = vector.broadcast %cst_148 : f32 to vector<4x64xf32>
    %149 = arith.cmpf ogt, %147, %148 : vector<4x64xf32>
    %cst_149 = arith.constant 2.000000e-01 : f32
    %150 = vector.broadcast %cst_149 : f32 to vector<4x64xf32>
    %151 = arith.mulf %150, %147 : vector<4x64xf32>
    %152 = arith.select %149, %147, %151 : vector<4x64xi1>, vector<4x64xf32>
    %c0_150 = arith.constant 0 : index
    %c0_151 = arith.constant 0 : index
    %c0_152 = arith.constant 0 : index
    %153 = vector.load %arg16[%c0_150, %c0_151, %c0_152] : memref<4x1x4xf32, #tpu.memory_space<vmem>>, vector<1x1x4xf32>
    %154 = vector.shape_cast %153 : vector<1x1x4xf32> to vector<1x4xf32>
    %cst_153 = arith.constant dense<0.000000e+00> : vector<1x64xf32>
    %155 = tpu.matmul %154, %152, %cst_153 {dimension_numbers = #tpu.dot_dimension_numbers<[1], [0], [0], [1], [0, 0, 1, 1], [], []>} : vector<1x4xf32>, vector<4x64xf32>, vector<1x64xf32> -> vector<1x64xf32>
    %c0_154 = arith.constant 0 : index
    %c0_155 = arith.constant 0 : index
    %c0_156 = arith.constant 0 : index
    %156 = vector.load %arg17[%c0_154, %c0_155, %c0_156] : memref<4x64x32xf32, #tpu.memory_space<vmem>>, vector<1x64x32xf32>
    %157 = vector.shape_cast %156 : vector<1x64x32xf32> to vector<64x32xf32>
    %cst_157 = arith.constant dense<0.000000e+00> : vector<1x32xf32>
    %158 = tpu.matmul %155, %157, %cst_157 {dimension_numbers = #tpu.dot_dimension_numbers<[1], [0], [0], [1], [0, 0, 1, 1], [], []>} : vector<1x64xf32>, vector<64x32xf32>, vector<1x32xf32> -> vector<1x32xf32>
    %c1_158 = arith.constant 1 : index
    %c0_159 = arith.constant 0 : index
    %c0_160 = arith.constant 0 : index
    %159 = vector.load %arg16[%c1_158, %c0_159, %c0_160] : memref<4x1x4xf32, #tpu.memory_space<vmem>>, vector<1x1x4xf32>
    %160 = vector.shape_cast %159 : vector<1x1x4xf32> to vector<1x4xf32>
    %cst_161 = arith.constant dense<0.000000e+00> : vector<1x64xf32>
    %161 = tpu.matmul %160, %152, %cst_161 {dimension_numbers = #tpu.dot_dimension_numbers<[1], [0], [0], [1], [0, 0, 1, 1], [], []>} : vector<1x4xf32>, vector<4x64xf32>, vector<1x64xf32> -> vector<1x64xf32>
    %c1_162 = arith.constant 1 : index
    %c0_163 = arith.constant 0 : index
    %c0_164 = arith.constant 0 : index
    %162 = vector.load %arg17[%c1_162, %c0_163, %c0_164] : memref<4x64x32xf32, #tpu.memory_space<vmem>>, vector<1x64x32xf32>
    %163 = vector.shape_cast %162 : vector<1x64x32xf32> to vector<64x32xf32>
    %cst_165 = arith.constant dense<0.000000e+00> : vector<1x32xf32>
    %164 = tpu.matmul %161, %163, %cst_165 {dimension_numbers = #tpu.dot_dimension_numbers<[1], [0], [0], [1], [0, 0, 1, 1], [], []>} : vector<1x64xf32>, vector<64x32xf32>, vector<1x32xf32> -> vector<1x32xf32>
    %165 = arith.addf %158, %164 : vector<1x32xf32>
    %c2_166 = arith.constant 2 : index
    %c0_167 = arith.constant 0 : index
    %c0_168 = arith.constant 0 : index
    %166 = vector.load %arg16[%c2_166, %c0_167, %c0_168] : memref<4x1x4xf32, #tpu.memory_space<vmem>>, vector<1x1x4xf32>
    %167 = vector.shape_cast %166 : vector<1x1x4xf32> to vector<1x4xf32>
    %cst_169 = arith.constant dense<0.000000e+00> : vector<1x64xf32>
    %168 = tpu.matmul %167, %152, %cst_169 {dimension_numbers = #tpu.dot_dimension_numbers<[1], [0], [0], [1], [0, 0, 1, 1], [], []>} : vector<1x4xf32>, vector<4x64xf32>, vector<1x64xf32> -> vector<1x64xf32>
    %c2_170 = arith.constant 2 : index
    %c0_171 = arith.constant 0 : index
    %c0_172 = arith.constant 0 : index
    %169 = vector.load %arg17[%c2_170, %c0_171, %c0_172] : memref<4x64x32xf32, #tpu.memory_space<vmem>>, vector<1x64x32xf32>
    %170 = vector.shape_cast %169 : vector<1x64x32xf32> to vector<64x32xf32>
    %cst_173 = arith.constant dense<0.000000e+00> : vector<1x32xf32>
    %171 = tpu.matmul %168, %170, %cst_173 {dimension_numbers = #tpu.dot_dimension_numbers<[1], [0], [0], [1], [0, 0, 1, 1], [], []>} : vector<1x64xf32>, vector<64x32xf32>, vector<1x32xf32> -> vector<1x32xf32>
    %172 = arith.addf %165, %171 : vector<1x32xf32>
    %c3_174 = arith.constant 3 : index
    %c0_175 = arith.constant 0 : index
    %c0_176 = arith.constant 0 : index
    %173 = vector.load %arg16[%c3_174, %c0_175, %c0_176] : memref<4x1x4xf32, #tpu.memory_space<vmem>>, vector<1x1x4xf32>
    %174 = vector.shape_cast %173 : vector<1x1x4xf32> to vector<1x4xf32>
    %cst_177 = arith.constant dense<0.000000e+00> : vector<1x64xf32>
    %175 = tpu.matmul %174, %152, %cst_177 {dimension_numbers = #tpu.dot_dimension_numbers<[1], [0], [0], [1], [0, 0, 1, 1], [], []>} : vector<1x4xf32>, vector<4x64xf32>, vector<1x64xf32> -> vector<1x64xf32>
    %c3_178 = arith.constant 3 : index
    %c0_179 = arith.constant 0 : index
    %c0_180 = arith.constant 0 : index
    %176 = vector.load %arg17[%c3_178, %c0_179, %c0_180] : memref<4x64x32xf32, #tpu.memory_space<vmem>>, vector<1x64x32xf32>
    %177 = vector.shape_cast %176 : vector<1x64x32xf32> to vector<64x32xf32>
    %cst_181 = arith.constant dense<0.000000e+00> : vector<1x32xf32>
    %178 = tpu.matmul %175, %177, %cst_181 {dimension_numbers = #tpu.dot_dimension_numbers<[1], [0], [0], [1], [0, 0, 1, 1], [], []>} : vector<1x64xf32>, vector<64x32xf32>, vector<1x32xf32> -> vector<1x32xf32>
    %179 = arith.addf %172, %178 : vector<1x32xf32>
    %c0_182 = arith.constant 0 : index
    %c0_183 = arith.constant 0 : index
    %180 = vector.load %arg18[%c0_182, %c0_183] : memref<1x32xf32, #tpu.memory_space<vmem>>, vector<1x32xf32>
    %181 = arith.addf %179, %180 : vector<1x32xf32>
    %c0_184 = arith.constant 0 : index
    %c0_185 = arith.constant 0 : index
    %c0_186 = arith.constant 0 : index
    %182 = vector.load %arg19[%c0_184, %c0_185, %c0_186] : memref<1x1x32xf32, #tpu.memory_space<vmem>>, vector<1x1x32xf32>
    %183 = vector.shape_cast %182 : vector<1x1x32xf32> to vector<1x32xf32>
    %184 = vector.shape_cast %181 : vector<1x32xf32> to vector<1x1x32xf32>
    tpu.vector_store %arg19[%c0_184, %c0_185, %c0_186], %184 {strides = array<i32>} : memref<1x1x32xf32, #tpu.memory_space<vmem>>, vector<1x1x32xf32>,
    return
  }
  func.func @transform_0(%arg0: i32) -> (i32, i32, i32) {
    %c0_i32 = arith.constant 0 : i32
    %c0_i32_0 = arith.constant 0 : i32
    %c0_i32_1 = arith.constant 0 : i32
    return %arg0, %c0_i32, %c0_i32_0 : i32, i32, i32
  }
  func.func @transform_1(%arg0: i32) -> (i32, i32, i32) {
    %c0_i32 = arith.constant 0 : i32
    %c0_i32_0 = arith.constant 0 : i32
    %c0_i32_1 = arith.constant 0 : i32
    %c0_i32_2 = arith.constant 0 : i32
    return %c0_i32, %c0_i32_0, %c0_i32_1 : i32, i32, i32
  }
  func.func @transform_2(%arg0: i32) -> (i32, i32) {
    %c0_i32 = arith.constant 0 : i32
    %c0_i32_0 = arith.constant 0 : i32
    %c0_i32_1 = arith.constant 0 : i32
    return %c0_i32, %c0_i32_0 : i32, i32
  }
  func.func @transform_3(%arg0: i32) -> (i32, i32, i32) {
    %c0_i32 = arith.constant 0 : i32
    %c0_i32_0 = arith.constant 0 : i32
    %c0_i32_1 = arith.constant 0 : i32
    %c0_i32_2 = arith.constant 0 : i32
    return %c0_i32, %c0_i32_0, %c0_i32_1 : i32, i32, i32
  }
  func.func @transform_4(%arg0: i32) -> (i32, i32, i32) {
    %c0_i32 = arith.constant 0 : i32
    %c0_i32_0 = arith.constant 0 : i32
    %c0_i32_1 = arith.constant 0 : i32
    %c0_i32_2 = arith.constant 0 : i32
    return %c0_i32, %c0_i32_0, %c0_i32_1 : i32, i32, i32
  }
  func.func @transform_5(%arg0: i32) -> (i32, i32) {
    %c0_i32 = arith.constant 0 : i32
    %c0_i32_0 = arith.constant 0 : i32
    %c0_i32_1 = arith.constant 0 : i32
    return %c0_i32, %c0_i32_0 : i32, i32
  }
  func.func @transform_6(%arg0: i32) -> (i32, i32, i32) {
    %c0_i32 = arith.constant 0 : i32
    %c0_i32_0 = arith.constant 0 : i32
    %c0_i32_1 = arith.constant 0 : i32
    %c0_i32_2 = arith.constant 0 : i32
    return %c0_i32, %c0_i32_0, %c0_i32_1 : i32, i32, i32
  }
  func.func @transform_7(%arg0: i32) -> (i32, i32, i32) {
    %c0_i32 = arith.constant 0 : i32
    %c0_i32_0 = arith.constant 0 : i32
    %c0_i32_1 = arith.constant 0 : i32
    %c0_i32_2 = arith.constant 0 : i32
    return %c0_i32, %c0_i32_0, %c0_i32_1 : i32, i32, i32
  }
  func.func @transform_8(%arg0: i32) -> (i32, i32) {
    %c0_i32 = arith.constant 0 : i32
    %c0_i32_0 = arith.constant 0 : i32
    %c0_i32_1 = arith.constant 0 : i32
    return %c0_i32, %c0_i32_0 : i32, i32
  }
  func.func @transform_9(%arg0: i32) -> (i32, i32, i32) {
    %c0_i32 = arith.constant 0 : i32
    %c0_i32_0 = arith.constant 0 : i32
    %c0_i32_1 = arith.constant 0 : i32
    %c0_i32_2 = arith.constant 0 : i32
    return %c0_i32, %c0_i32_0, %c0_i32_1 : i32, i32, i32
  }
  func.func @transform_10(%arg0: i32) -> (i32, i32, i32) {
    %c0_i32 = arith.constant 0 : i32
    %c0_i32_0 = arith.constant 0 : i32
    %c0_i32_1 = arith.constant 0 : i32
    %c0_i32_2 = arith.constant 0 : i32
    return %c0_i32, %c0_i32_0, %c0_i32_1 : i32, i32, i32
  }
  func.func @transform_11(%arg0: i32) -> (i32, i32) {
    %c0_i32 = arith.constant 0 : i32
    %c0_i32_0 = arith.constant 0 : i32
    %c0_i32_1 = arith.constant 0 : i32
    return %c0_i32, %c0_i32_0 : i32, i32
  }
  func.func @transform_12(%arg0: i32) -> (i32, i32, i32) {
    %c0_i32 = arith.constant 0 : i32
    %c0_i32_0 = arith.constant 0 : i32
    %c0_i32_1 = arith.constant 0 : i32
    %c0_i32_2 = arith.constant 0 : i32
    return %c0_i32, %c0_i32_0, %c0_i32_1 : i32, i32, i32
  }
  func.func @transform_13(%arg0: i32) -> (i32, i32, i32) {
    %c0_i32 = arith.constant 0 : i32
    %c0_i32_0 = arith.constant 0 : i32
    %c0_i32_1 = arith.constant 0 : i32
    %c0_i32_2 = arith.constant 0 : i32
    return %c0_i32, %c0_i32_0, %c0_i32_1 : i32, i32, i32
  }
  func.func @transform_14(%arg0: i32) -> (i32, i32) {
    %c0_i32 = arith.constant 0 : i32
    %c0_i32_0 = arith.constant 0 : i32
    %c0_i32_1 = arith.constant 0 : i32
    return %c0_i32, %c0_i32_0 : i32, i32
  }
  func.func @transform_15(%arg0: i32) -> (i32, i32, i32) {
    %c0_i32 = arith.constant 0 : i32
    %c0_i32_0 = arith.constant 0 : i32
    %c0_i32_1 = arith.constant 0 : i32
    %c0_i32_2 = arith.constant 0 : i32
    return %c0_i32, %c0_i32_0, %c0_i32_1 : i32, i32, i32
  }
  func.func @transform_16(%arg0: i32) -> (i32, i32, i32) {
    %c0_i32 = arith.constant 0 : i32
    %c0_i32_0 = arith.constant 0 : i32
    %c0_i32_1 = arith.constant 0 : i32
    %c0_i32_2 = arith.constant 0 : i32
    return %c0_i32, %c0_i32_0, %c0_i32_1 : i32, i32, i32
  }
  func.func @transform_17(%arg0: i32) -> (i32, i32) {
    %c0_i32 = arith.constant 0 : i32
    %c0_i32_0 = arith.constant 0 : i32
    %c0_i32_1 = arith.constant 0 : i32
    return %c0_i32, %c0_i32_0 : i32, i32
  }
  func.func @transform_18(%arg0: i32) -> (i32, i32, i32) {
    %c0_i32 = arith.constant 0 : i32
    %c0_i32_0 = arith.constant 0 : i32
    %c0_i32_1 = arith.constant 0 : i32
    return %arg0, %c0_i32, %c0_i32_0 : i32, i32, i32
  }
}

</mosaic_0001>

<bundles_post_ra>
// kernel: _lambda_.1
= control target key start
LH: loop header
LB: loop body
LE: loop exit
PB: predicated region body
PF: predicated region fallthrough
CT: control target
= control target key end

     0   :  { %s8806_s0 = inlined_call_operand.vmem [shape: f32[2,64,192], index: 0, kind: input, shape index: {}]   ;;  %s8807_s1 = inlined_call_operand.vmem [shape: f32[1,192,256], index: 1, kind: input, shape index: {}]   ;;  %s8808_s2 = inlined_call_operand.hbm [shape: f32[1,256], index: 2, kind: input, shape index: {}]   ;;  %s8809_s3 = inlined_call_operand.hbm [shape: f32[4,32,64], index: 3, kind: input, shape index: {}]   ;;  %s8810_s4 = inlined_call_operand.hbm [shape: f32[4,256,256], index: 4, kind: input, shape index: {}]   ;;  %s8811_s5 = inlined_call_operand.hbm [shape: f32[1,256], index: 5, kind: input, shape index: {}]   ;;  %s8812_s6 = inlined_call_operand.hbm [shape: f32[4,16,32], index: 6, kind: input, shape index: {}]   ;;  %s8813_s7 = inlined_call_operand.vmem [shape: f32[4,256,128], index: 7, kind: input, shape index: {}]   ;;  %s8814_s8 = inlined_call_operand.hbm [shape: f32[1,128], index: 8, kind: input, shape index: {}]   ;;  %s8815_s9 = inlined_call_operand.vmem [shape: f32[4,8,16], index: 9, kind: input, shape index: {}]   ;;  %s8816_s10 = inlined_call_operand.hbm [shape: f32[4,128,128], index: 10, kind: input, shape index: {}]   ;;  %s8817_s11 = inlined_call_operand.hbm [shape: f32[1,128], index: 11, kind: input, shape index: {}]   ;;  %s8818_s12 = inlined_call_operand.vmem [shape: f32[4,4,8], index: 12, kind: input, shape index: {}]   ;;  %s8819_s13 = inlined_call_operand.hbm [shape: f32[4,128,64], index: 13, kind: input, shape index: {}]   ;;  %s8820_s14 = inlined_call_operand.hbm [shape: f32[1,64], index: 14, kind: input, shape index: {}]   ;;  %s8821_s15 = inlined_call_operand.vmem [shape: f32[4,1,4], index: 15, kind: input, shape index: {}]   ;;  %s8822_s16 = inlined_call_operand.hbm [shape: f32[4,64,32], index: 16, kind: input, shape index: {}]   ;;  %s8823_s17 = inlined_call_operand.vmem [shape: f32[1,32], index: 17, kind: input, shape index: {}]   ;;  %s8824_s18 = inlined_call_operand.hbm [shape: f32[2,1,32], index: 18, kind: output, shape index: {}]  }
   0x1   :  { %8845 = sst [smem:[#allocation36_spill]] %s8806_s0 }
   0x2   :  { %8846 = sst [smem:[#allocation37_spill]] %s8807_s1 }
   0x3   :  { %8847 = sst [smem:[#allocation38_spill]] %s8808_s2 }
   0x4   :  { %8848 = sst [smem:[#allocation39_spill]] %s8809_s3 }
   0x5   :  { %8849 = sst [smem:[#allocation40_spill]] %s8811_s5 }
   0x6   :  { %8850 = sst [smem:[#allocation41_spill]] %s8814_s8 }
   0x7   :  { %8851 = sst [smem:[#allocation42_spill]] %s8821_s15 }
   0x8   :  { %8852 = sst [smem:[#allocation43_spill]] %s8823_s17 }
   0x9   :  { %8853 = sst [smem:[#allocation44_spill]] %s8824_s18 }
   0xa   :  { %23 = vsyncpa [#allocation3], 0 }
   0xb   :  { %24 = vsyncpa [#allocation6], 0 }
   0xc   :  { %25 = vsyncpa [#allocation9], 0 }
   0xd   :  { %26 = vsyncpa [#allocation12], 0 }
   0xe   :  { %27 = vsyncpa [#allocation15], 0 }
   0xf   :  { %28 = vsyncpa [#allocation18], 0 }
  0x10   :  { %29 = vsyncpa [#allocation4], 0 }
  0x11   :  { %31 = vsyncpa [#allocation4 + $0x1], 0  ;;  %s7448_s27 = smov 0   ;;  %s7450_s28 = smov 0  }
  0x12   :  { %s7452_s29 = smov 0   ;;  %s7454_s30 = smov 0  }
  0x13 LB: > { %8854 = sst [smem:[#allocation28_spill]] %s7320_s27  ;;  %s7469_s0 = sadd.s32 4294967295, %s7332_s30   ;;  %s7332_s30 = sphi %s7454_s30, %s8898_s30   ;;  %s7328_s29 = sphi %s7452_s29, %s8901_s29   ;;  %s7324_s28 = sphi %s7450_s28, %s8900_s28   ;;  %s7320_s27 = sphi %s7448_s27, %s8899_s27  }
  0x14   : > { %8855 = sst [smem:[#allocation29_spill]] %s7324_s28  ;;  %s5009_s19 = sadd.s32 4294967294, %s7332_s30  }
  0x15   : > { %8856 = sst [smem:[#allocation30_spill]] %s7328_s29  ;;  %s7473_s1 = sadd.s32 1, %s7332_s30  }
  0x16   : > { %8857 = sst [smem:[#allocation31_spill]] %s7332_s30  ;;  %s427_s20 = sadd.s32 1, %s7328_s29 }
  0x17   : > { %8858 = sst [smem:[#allocation32_spill]] %s7473_s1  ;;  %s424_s21 = ssub.s32 %s7332_s30, %s7473_s1 }
  0x18   : > { %p437_p0 = scmp.ne.s32.totalorder %s7328_s29, %s7324_s28  ;;  %p425_p1 = scmp.eq.s32.totalorder %s424_s21, 0 }
  0x19   : > { %p438_p2 = scmp.eq.s32.totalorder %s7469_s0, 1  ;;  %p443_p3 = scmp.ne.s32.totalorder %s7324_s28, %s7320_s27 }
  0x1a   : > { %p444_p4 = scmp.eq.s32.totalorder %s5009_s19, 1  ;;  %p5010_p7 = scmp.ge.s32.totalorder %s7332_s30, 1 }
  0x1b   : > { %s7484_s22 = scalar_select %p425_p1, %s7328_s29, %s427_s20  }
  0x1c   : > { %p7486_p5 = por %p438_p2, %p437_p0  ;;  %p7490_p6 = por %p444_p4, %p443_p3 }
  0x1d   : > { %8859 = sst [smem:[#allocation33_spill]] %s7484_s22  ;;  %p451_p8 = scmp.lt.s32.totalorder %s7332_s30, 3 }
  0x1e   : > { %s8860_s2 = scalar_select %p7486_p5, 1, 0 }
  0x1f   : > { %s8862_s23 = scalar_select %p7490_p6, 1, 0 }
  0x20   : > { %8861 = sst [smem:[#allocation34_spill]] %s8860_s2  ;;  %p8834_p9 = scmp.eq.s32.totalorder %s7469_s0, 0 }
  0x21   : > { %8863 = sst [smem:[#allocation35_spill]] %s8862_s23  ;;  %p7497_p10 = pnand %p5010_p7, %p451_p8 }
  0x22   : > { %s7334_s25 = smov [#allocation5]   ;;  %s7335_s20 = smov [#allocation8]  }
  0x23   : > { %s8864_s24 = scalar_select %p7497_p10, 1, 0 }
  0x24   : > { %s477_s26 = sshll.u32 %s7334_s25, 4  ;;  %p6827_p11 = pneg %p7497_p10  ;;  %s7503_s26 = int_to_ptr.vmem [resolvable:$true] %s477_s26 }
  0x25   : > { %s504_s21 = sshll.u32 %s7335_s20, 4  ;;  %s7336_s22 = smov [#allocation11]   ;;  %s7511_s21 = int_to_ptr.vmem [resolvable:$true] %s504_s21 }
  0x26   : > { %p7507_p12 = pnand %p8834_p9, %p6827_p11  ;;  %s7513_s29 = sshll.u32 %s7336_s22, 4  ;;  %s532_s29 = int_to_ptr.vmem [resolvable:$true] %s7513_s29 }
  0x27   : > { %s8866_s3 = sld [smem:[#allocation39_spill]] }
  0x28   : > { %p7523_p0 = pneg %p7507_p12 }
  0x2d   : > { %s6938_s25 = scalar_lea.hbm %s8866_s3, 2048 }
  0x2e   : > { %p6939_p13 = scmp.ne.s32.totalorder %s8866_s3, %s6938_s25  ;;  %p6945_p3 = scmp.lt.u32.totalorder %s6938_s25, %s8866_s3 }
  0x30   : > { %p6941_p1 = pnand %p7523_p0, %p6939_p13 }
  0x32   : > { %p6942_p2 = pneg %p6941_p1 }
  0x34   : > { %p6947_p4 = pnand %p6945_p3, %p6942_p2 }
  0x36   : > { %6950 = shalt.err (!%p6947_p4)
}
  0x37   : > { %s6951_s27 = scalar_lea.vmem %s7503_s26, 2048  ;;  %p6959_p9 = scmp.lt.s32.totalorder %s7503_s26, %s7503_s26 }
  0x38   : > { %p6952_p7 = scmp.ne.s32.totalorder %s7503_s26, %s6951_s27  ;;  %p6960_p6 = scmp.lt.s32.totalorder %s6951_s27, %s6951_s27 }
  0x3a   : > { %p6954_p8 = pnand %p6952_p7, %p7523_p0  ;;  %p6961_p13 = por %p6960_p6, %p6959_p9 }
  0x3c   : > { %p6955_p11 = pneg %p6954_p8 }
  0x3e   : > { %p6962_p1 = pnand %p6961_p13, %p6955_p11 }
  0x40   : > { %6965 = shalt.err (!%p6962_p1)
}
  0x41   : > { %s8841_s30 = smov 128   ;;  %s8843_s1 = smov 8  }
  0x42   : > { %6833 = dma.hbm_to_vmem [thread:$0]  (!%p7507_p12), %s8866_s3, 2048, %s7503_s26, [#allocation6], %s8841_s30, %s8841_s30, %s8843_s1  }
  0x43   : > { %s8868_s5 = sld [smem:[#allocation40_spill]] }
  0x49   : > { %s6966_s27 = scalar_lea.hbm %s8868_s5, 32 }
  0x4a   : > { %p6967_p6 = scmp.ne.s32.totalorder %s8868_s5, %s6966_s27  ;;  %p6973_p3 = scmp.lt.u32.totalorder %s6966_s27, %s8868_s5 }
  0x4c   : > { %p6969_p9 = pnand %p6967_p6, %p7523_p0 }
  0x4e   : > { %p6970_p2 = pneg %p6969_p9 }
  0x50   : > { %p6975_p4 = pnand %p6973_p3, %p6970_p2 }
  0x52   : > { %6978 = shalt.err (!%p6975_p4)
}
  0x53   : > { %s6979_s26 = scalar_lea.vmem %s7511_s21, 32  ;;  %p6987_p13 = scmp.lt.s32.totalorder %s7511_s21, %s7511_s21 }
  0x54   : > { %p6980_p7 = scmp.ne.s32.totalorder %s7511_s21, %s6979_s26  ;;  %p6988_p1 = scmp.lt.s32.totalorder %s6979_s26, %s6979_s26 }
  0x56   : > { %p6982_p8 = pnand %p6980_p7, %p7523_p0  ;;  %p6989_p6 = por %p6988_p1, %p6987_p13 }
  0x58   : > { %p6983_p11 = pneg %p6982_p8 }
  0x5a   : > { %p6990_p9 = pnand %p6989_p6, %p6983_p11 }
  0x5c   : > { %6993 = shalt.err (!%p6990_p9)
}
  0x5d   : > { %6839 = dma.hbm_to_vmem [thread:$0]  (!%p7507_p12), %s8868_s5, 32, %s7511_s21, [#allocation9]  }
  0x5e   : > { %s8869_s8 = sld [smem:[#allocation41_spill]] }
  0x64   : > { %s6994_s23 = scalar_lea.hbm %s8869_s8, 16 }
  0x65   : > { %p6995_p2 = scmp.ne.s32.totalorder %s8869_s8, %s6994_s23  ;;  %p7001_p7 = scmp.lt.u32.totalorder %s6994_s23, %s8869_s8 }
  0x67   : > { %p6997_p3 = pnand %p6995_p2, %p7523_p0 }
  0x69   : > { %p6998_p4 = pneg %p6997_p3 }
  0x6b   : > { %p7003_p8 = pnand %p7001_p7, %p6998_p4 }
  0x6d   : > { %7006 = shalt.err (!%p7003_p8)
}
  0x6e   : > { %s7007_s26 = scalar_lea.vmem %s532_s29, 16  ;;  %s7014_s21 = scalar_lea.vmem %s532_s29, 32 }
  0x6f   : > { %p7008_p11 = scmp.ne.s32.totalorder %s532_s29, %s7007_s26  ;;  %p7015_p6 = scmp.lt.s32.totalorder %s532_s29, %s532_s29 }
  0x70   : > { %p7016_p9 = scmp.lt.s32.totalorder %s7014_s21, %s7007_s26 }
  0x71   : > { %p7010_p13 = pnand %p7008_p11, %p7523_p0 }
  0x72   : > { %p7017_p5 = por %p7016_p9, %p7015_p6 }
  0x73   : > { %p7011_p1 = pneg %p7010_p13 }
  0x75   : > { %p7018_p10 = pnand %p7017_p5, %p7011_p1 }
  0x77   : > { %7021 = shalt.err (!%p7018_p10)
}
  0x78   : > { %6845 = dma.hbm_to_vmem [thread:$0]  (!%p7507_p12), %s8869_s8, 16, %s532_s29, [#allocation12]  }
  0x79   : > { %s7339_s28 = smov [#allocation14]   ;;  %s7340_s23 = smov [#allocation17]  }
  0x7a   : > { %s558_s2 = sshll.u32 %s7339_s28, 4  ;;  %s585_s25 = sshll.u32 %s7340_s23, 4  ;;  %s559_s2 = int_to_ptr.vmem [resolvable:$true] %s558_s2  ;;  %s586_s25 = int_to_ptr.vmem [resolvable:$true] %s585_s25 }
  0x7b   : > { %s7022_s27 = scalar_lea.hbm %s8817_s11, 16 }
  0x7c   : > { %p7023_p5 = scmp.ne.s32.totalorder %s8817_s11, %s7022_s27  ;;  %p7029_p3 = scmp.lt.u32.totalorder %s7022_s27, %s8817_s11 }
  0x7e   : > { %p7025_p10 = pnand %p7023_p5, %p7523_p0 }
  0x80   : > { %p7026_p2 = pneg %p7025_p10 }
  0x82   : > { %p7031_p4 = pnand %p7029_p3, %p7026_p2 }
  0x84   : > { %7034 = shalt.err (!%p7031_p4)
}
  0x85   : > { %s7035_s29 = scalar_lea.vmem %s559_s2, 16  ;;  %s7042_s17 = scalar_lea.vmem %s559_s2, 32 }
  0x86   : > { %p7036_p7 = scmp.ne.s32.totalorder %s559_s2, %s7035_s29  ;;  %p7043_p13 = scmp.lt.s32.totalorder %s559_s2, %s559_s2 }
  0x87   : > { %p7044_p1 = scmp.lt.s32.totalorder %s7042_s17, %s7035_s29 }
  0x88   : > { %p7038_p8 = pnand %p7036_p7, %p7523_p0 }
  0x89   : > { %p7045_p6 = por %p7044_p1, %p7043_p13 }
  0x8a   : > { %p7039_p11 = pneg %p7038_p8 }
  0x8c   : > { %p7046_p9 = pnand %p7045_p6, %p7039_p11 }
  0x8e   : > { %7049 = shalt.err (!%p7046_p9)
}
  0x8f   : > { %6851 = dma.hbm_to_vmem [thread:$0]  (!%p7507_p12), %s8817_s11, 16, %s559_s2, [#allocation15]  }
  0x90   : > { %s7050_s22 = scalar_lea.hbm %s8820_s14, 16 }
  0x91   : > { %p7051_p5 = scmp.ne.s32.totalorder %s8820_s14, %s7050_s22  ;;  %p7057_p3 = scmp.lt.u32.totalorder %s7050_s22, %s8820_s14 }
  0x93   : > { %p7053_p10 = pnand %p7051_p5, %p7523_p0 }
  0x95   : > { %p7054_p2 = pneg %p7053_p10 }
  0x97   : > { %p7059_p4 = pnand %p7057_p3, %p7054_p2 }
  0x99   : > { %7062 = shalt.err (!%p7059_p4)
}
  0x9a   : > { %s7063_s29 = scalar_lea.vmem %s586_s25, 16  ;;  %s7070_s2 = scalar_lea.vmem %s586_s25, 32 }
  0x9b   : > { %p7064_p7 = scmp.ne.s32.totalorder %s586_s25, %s7063_s29  ;;  %p7071_p13 = scmp.lt.s32.totalorder %s586_s25, %s586_s25 }
  0x9c   : > { %p7072_p1 = scmp.lt.s32.totalorder %s7070_s2, %s7063_s29 }
  0x9d   : > { %p7066_p8 = pnand %p7064_p7, %p7523_p0 }
  0x9e   : > { %p7073_p6 = por %p7072_p1, %p7071_p13 }
  0x9f   : > { %p7067_p11 = pneg %p7066_p8 }
  0xa1   : > { %p7074_p9 = pnand %p7073_p6, %p7067_p11 }
  0xa3   : > { %7077 = shalt.err (!%p7074_p9)
}
  0xa4   : > { %6857 = dma.hbm_to_vmem [thread:$0]  (!%p7507_p12), %s8820_s14, 16, %s586_s25, [#allocation18]  }
  0xa5   : > { %s7341_s23 = smov [#allocation2]   ;;  %s7342_s20 = smov [#allocation7]  }
  0xa6   : > { %s467_s30 = sshll.u32 %s7341_s23, 4  ;;  %s490_s22 = sshll.u32 %s7342_s20, 4  ;;  %s468_s30 = int_to_ptr.vmem [resolvable:$true] %s467_s30  ;;  %s491_s22 = int_to_ptr.vmem [resolvable:$true] %s490_s22 }
  0xa7   : > { %s8870_s21 = sld [smem:[#allocation38_spill]] }
  0xad   : > { %s7078_s15 = scalar_lea.hbm %s8870_s21, 32 }
  0xae   : > { %p7079_p5 = scmp.ne.s32.totalorder %s8870_s21, %s7078_s15  ;;  %p7085_p3 = scmp.lt.u32.totalorder %s7078_s15, %s8870_s21 }
  0xb0   : > { %p7081_p10 = pnand %p7079_p5, %p7523_p0 }
  0xb2   : > { %p7082_p2 = pneg %p7081_p10 }
  0xb4   : > { %p7087_p4 = pnand %p7085_p3, %p7082_p2 }
  0xb6   : > { %7090 = shalt.err (!%p7087_p4)
}
  0xb7   : > { %s7091_s25 = scalar_lea.vmem %s468_s30, 32  ;;  %p7099_p13 = scmp.lt.s32.totalorder %s468_s30, %s468_s30 }
  0xb8   : > { %p7092_p7 = scmp.ne.s32.totalorder %s468_s30, %s7091_s25  ;;  %p7100_p1 = scmp.lt.s32.totalorder %s7091_s25, %s7091_s25 }
  0xba   : > { %p7094_p8 = pnand %p7092_p7, %p7523_p0  ;;  %p7101_p6 = por %p7100_p1, %p7099_p13 }
  0xbc   : > { %p7095_p11 = pneg %p7094_p8 }
  0xbe   : > { %p7102_p9 = pnand %p7101_p6, %p7095_p11 }
  0xc0   : > { %7105 = shalt.err (!%p7102_p9)
}
  0xc1   : > { %6830 = dma.hbm_to_vmem [thread:$0]  (!%p7507_p12), %s8870_s21, 32, %s468_s30, [#allocation3]  }
  0xc2   : > { %s7106_s27 = scalar_lea.hbm %s8810_s4, 32768 }
  0xc3   : > { %p7107_p5 = scmp.ne.s32.totalorder %s8810_s4, %s7106_s27  ;;  %p7113_p3 = scmp.lt.u32.totalorder %s7106_s27, %s8810_s4 }
  0xc5   : > { %p7109_p10 = pnand %p7107_p5, %p7523_p0 }
  0xc7   : > { %p7110_p2 = pneg %p7109_p10 }
  0xc9   : > { %p7115_p4 = pnand %p7113_p3, %p7110_p2 }
  0xcb   : > { %7118 = shalt.err (!%p7115_p4)
}
  0xcc   : > { %s7119_s17 = scalar_lea.vmem %s491_s22, 32768  ;;  %p7127_p13 = scmp.lt.s32.totalorder %s491_s22, %s491_s22 }
  0xcd   : > { %p7120_p7 = scmp.ne.s32.totalorder %s491_s22, %s7119_s17  ;;  %p7128_p1 = scmp.lt.s32.totalorder %s7119_s17, %s7119_s17 }
  0xcf   : > { %p7122_p8 = pnand %p7120_p7, %p7523_p0  ;;  %p7129_p6 = por %p7128_p1, %p7127_p13 }
  0xd1   : > { %p7123_p11 = pneg %p7122_p8 }
  0xd3   : > { %p7130_p9 = pnand %p7129_p6, %p7123_p11 }
  0xd5   : > { %7133 = shalt.err (!%p7130_p9)
}
  0xd6   : > { %s7343_s30 = smov 256   ;;  %s7344_s25 = smov 16  }
  0xd7   : > { %6836 = dma.hbm_to_vmem [thread:$0]  (!%p7507_p12), %s8810_s4, 32768, %s491_s22, [#allocation6], %s7343_s30, %s7343_s30, %s7344_s25  }
  0xd8   : > { %s7345_s1 = smov [#allocation10]   ;;  %s7346_s27 = smov [#allocation13]  }
  0xd9   : > { %s514_s20 = sshll.u32 %s7345_s1, 4  ;;  %s544_s26 = sshll.u32 %s7346_s27, 4  ;;  %s515_s20 = int_to_ptr.vmem [resolvable:$true] %s514_s20  ;;  %s545_s26 = int_to_ptr.vmem [resolvable:$true] %s544_s26 }
  0xda   : > { %s7134_s2 = scalar_lea.hbm %s8812_s6, 1024 }
  0xdb   : > { %p7135_p5 = scmp.ne.s32.totalorder %s8812_s6, %s7134_s2  ;;  %p7141_p3 = scmp.lt.u32.totalorder %s7134_s2, %s8812_s6 }
  0xdd   : > { %p7137_p10 = pnand %p7135_p5, %p7523_p0 }
  0xdf   : > { %p7138_p2 = pneg %p7137_p10 }
  0xe1   : > { %p7143_p4 = pnand %p7141_p3, %p7138_p2 }
  0xe3   : > { %7146 = shalt.err (!%p7143_p4)
}
  0xe4   : > { %s7147_s22 = scalar_lea.vmem %s515_s20, 1024  ;;  %p7155_p13 = scmp.lt.s32.totalorder %s515_s20, %s515_s20 }
  0xe5   : > { %p7148_p7 = scmp.ne.s32.totalorder %s515_s20, %s7147_s22  ;;  %p7156_p1 = scmp.lt.s32.totalorder %s7147_s22, %s7147_s22 }
  0xe7   : > { %p7150_p8 = pnand %p7148_p7, %p7523_p0  ;;  %p7157_p6 = por %p7156_p1, %p7155_p13 }
  0xe9   : > { %p7151_p11 = pneg %p7150_p8 }
  0xeb   : > { %p7158_p9 = pnand %p7157_p6, %p7151_p11 }
  0xed   : > { %7161 = shalt.err (!%p7158_p9)
}
  0xee   : > { %s8871_s3 = smov 8   ;;  %s8872_s30 = smov 128  }
  0xef   : > { %6842 = dma.hbm_to_vmem [thread:$0]  (!%p7507_p12), %s8812_s6, 1024, %s515_s20, [#allocation9], %s8872_s30, %s8872_s30, %s8871_s3  }
  0xf0   : > { %s7162_s23 = scalar_lea.hbm %s8816_s10, 8192 }
  0xf1   : > { %p7163_p5 = scmp.ne.s32.totalorder %s8816_s10, %s7162_s23  ;;  %p7169_p3 = scmp.lt.u32.totalorder %s7162_s23, %s8816_s10 }
  0xf3   : > { %p7165_p10 = pnand %p7163_p5, %p7523_p0 }
  0xf5   : > { %p7166_p2 = pneg %p7165_p10 }
  0xf7   : > { %p7171_p4 = pnand %p7169_p3, %p7166_p2 }
  0xf9   : > { %7174 = shalt.err (!%p7171_p4)
}
  0xfa   : > { %s7175_s2 = scalar_lea.vmem %s545_s26, 8192  ;;  %p7183_p13 = scmp.lt.s32.totalorder %s545_s26, %s545_s26 }
  0xfb   : > { %p7176_p7 = scmp.ne.s32.totalorder %s545_s26, %s7175_s2  ;;  %p7184_p1 = scmp.lt.s32.totalorder %s7175_s2, %s7175_s2 }
  0xfd   : > { %p7178_p8 = pnand %p7176_p7, %p7523_p0  ;;  %p7185_p6 = por %p7184_p1, %p7183_p13 }
  0xff   : > { %p7179_p11 = pneg %p7178_p8 }
 0x101   : > { %p7186_p9 = pnand %p7185_p6, %p7179_p11 }
 0x103   : > { %7189 = shalt.err (!%p7186_p9)
}
 0x104   : > { %6848 = dma.hbm_to_vmem [thread:$0]  (!%p7507_p12), %s8816_s10, 8192, %s545_s26, [#allocation12], %s8872_s30, %s8872_s30, %s8871_s3  }
 0x105   : > { %s7347_s22 = smov [#allocation16]   ;;  %s7348_s8 = smov [#allocation19]  }
 0x106   : > { %s571_s5 = sshll.u32 %s7347_s22, 4  ;;  %s598_s25 = sshll.u32 %s7348_s8, 4  ;;  %s572_s5 = int_to_ptr.vmem [resolvable:$true] %s571_s5  ;;  %s599_s25 = int_to_ptr.vmem [resolvable:$true] %s598_s25 }
 0x107   : > { %s7190_s1 = scalar_lea.hbm %s8819_s13, 8192 }
 0x108   : > { %p7191_p5 = scmp.ne.s32.totalorder %s8819_s13, %s7190_s1  ;;  %p7197_p3 = scmp.lt.u32.totalorder %s7190_s1, %s8819_s13 }
 0x10a   : > { %p7193_p10 = pnand %p7191_p5, %p7523_p0 }
 0x10c   : > { %p7194_p2 = pneg %p7193_p10 }
 0x10e   : > { %p7199_p4 = pnand %p7197_p3, %p7194_p2 }
 0x110   : > { %7202 = shalt.err (!%p7199_p4)
}
 0x111   : > { %s7203_s26 = scalar_lea.vmem %s572_s5, 8192  ;;  %p7211_p13 = scmp.lt.s32.totalorder %s572_s5, %s572_s5 }
 0x112   : > { %p7204_p7 = scmp.ne.s32.totalorder %s572_s5, %s7203_s26  ;;  %p7212_p1 = scmp.lt.s32.totalorder %s7203_s26, %s7203_s26 }
 0x114   : > { %p7206_p8 = pnand %p7204_p7, %p7523_p0  ;;  %p7213_p6 = por %p7212_p1, %p7211_p13 }
 0x116   : > { %p7207_p11 = pneg %p7206_p8 }
 0x118   : > { %p7214_p9 = pnand %p7213_p6, %p7207_p11 }
 0x11a   : > { %7217 = shalt.err (!%p7214_p9)
}
 0x11b   : > { %6854 = dma.hbm_to_vmem [thread:$0]  (!%p7507_p12), %s8819_s13, 8192, %s572_s5, [#allocation15], %s8872_s30, %s8872_s30, %s8871_s3  }
 0x11c   : > { %s7218_s28 = scalar_lea.hbm %s8822_s16, 4096 }
 0x11d   : > { %p7219_p5 = scmp.ne.s32.totalorder %s8822_s16, %s7218_s28  ;;  %p7225_p3 = scmp.lt.u32.totalorder %s7218_s28, %s8822_s16 }
 0x11f   : > { %p7221_p10 = pnand %p7219_p5, %p7523_p0 }
 0x121   : > { %p7222_p2 = pneg %p7221_p10 }
 0x123   : > { %p7227_p4 = pnand %p7225_p3, %p7222_p2 }
 0x125   : > { %7230 = shalt.err (!%p7227_p4)
}
 0x126   : > { %s7231_s29 = scalar_lea.vmem %s599_s25, 4096  ;;  %p7239_p13 = scmp.lt.s32.totalorder %s599_s25, %s599_s25 }
 0x127   : > { %p7232_p7 = scmp.ne.s32.totalorder %s599_s25, %s7231_s29  ;;  %p7240_p1 = scmp.lt.s32.totalorder %s7231_s29, %s7231_s29 }
 0x129   : > { %p7234_p8 = pnand %p7232_p7, %p7523_p0  ;;  %p7241_p6 = por %p7240_p1, %p7239_p13 }
 0x12b   : > { %p7235_p11 = pneg %p7234_p8 }
 0x12d   : > { %p7242_p9 = pnand %p7241_p6, %p7235_p11 }
 0x12f   : > { %7245 = shalt.err (!%p7242_p9)
}
 0x130   : > { %6860 = dma.hbm_to_vmem [thread:$0]  (!%p7507_p12), %s8822_s16, 4096, %s599_s25, [#allocation18], %s8872_s30, %s8872_s30, %s8871_s3  }
 0x131   : > { %p8873_p5 = scmp.ne.s32.totalorder %s8864_s24, 0 }
 0x132   : > { %p8874_p0 = scmp.eq.s32.totalorder (!%p8873_p5), %s7469_s0, 0 }
 0x133   : > { %625 = sbr.rel (%p8873_p5) target bundleno = 4200 (0x1068), region = 92 }
 0x13a   : > { %7291 = dma.done.wait (%p8874_p0), [#allocation3], 32   ;;  %p8875_p10 = pmov %p8874_p0 }
 0x13b   : > { %p8876_p2 = pmov %p8874_p0 }
 0x13c   : > { %7293 = vsyncadd (%p8875_p10), [#allocation3], 4294967264 }
 0x13d   : > { %7295 = dma.done.wait (%p8876_p2), [#allocation6], 34816   ;;  %p8877_p3 = pmov %p8874_p0 }
 0x13e   : > { %p8878_p4 = pmov %p8874_p0 }
 0x13f   : > { %7297 = vsyncadd (%p8877_p3), [#allocation6], 4294932480 }
 0x140   : > { %7299 = dma.done.wait (%p8878_p4), [#allocation9], 1056   ;;  %p8879_p12 = pmov %p8874_p0 }
 0x141   : > { %p8880_p7 = pmov %p8874_p0 }
 0x142   : > { %7301 = vsyncadd (%p8879_p12), [#allocation9], 4294966240 }
 0x143   : > { %7303 = dma.done.wait (%p8880_p7), [#allocation12], 8208   ;;  %p8881_p8 = pmov %p8874_p0 }
 0x144   : > { %p8882_p11 = pmov %p8874_p0 }
 0x145   : > { %7305 = vsyncadd (%p8881_p8), [#allocation12], 4294959088 }
 0x146   : > { %7307 = dma.done.wait (%p8882_p11), [#allocation15], 8208   ;;  %p8883_p13 = pmov %p8874_p0 }
 0x147   : > { %p8884_p1 = pmov %p8874_p0 }
 0x148   : > { %7309 = vsyncadd (%p8883_p13), [#allocation15], 4294959088 }
 0x149   : > { %7311 = dma.done.wait (%p8884_p1), [#allocation18], 4112   ;;  %p8885_p6 = pmov %p8874_p0 }
 0x14a   : > { %s8886_s19 = sld [smem:[#allocation37_spill]]  ;;  %p718_p9 = scmp.lt.s32.totalorder %s7469_s0, 1  ;;  %vm799_vm0 = vcmask 523264  }
 0x14b   : > { %7313 = vsyncadd (%p8885_p6), [#allocation18], 4294963184  ;;  %s8887_s22 = sld [smem:[#allocation36_spill]]  ;;  %s8888_s18 = sld [smem:[#allocation42_spill]] }
 0x14c   : > { %s719_s28 = scalar_select %p718_p9, %s7469_s0, 1 }
 0x14d   : > { %s8889_s17 = sld [smem:[#allocation29_spill]]  ;;  %s8890_s23 = sld [smem:[#allocation34_spill]] }
 0x14e   : > { %s5200_s24 = sshll.u32 %s719_s28, 7  ;;  %s8891_s27 = sld [smem:[#allocation43_spill]] }
 0x14f   : > { %s5197_s15 = sshll.u32 %s7469_s0, 4  ;;  %s7352_s0 = smov [#allocation20]  }
 0x150   : > { %v740_v0 = vld [vmem:[%s8886_s19 + $0x8] sm:$0xff]  ;;  %v742_v1 = vld [vmem:[%s8886_s19 + $0x18] sm:$0xff]  ;;  %v739_v2 = vld [vmem:[%s8886_s19] sm:$0xff]  ;;  %s7250_s26 = sshll.u32 %s7352_s0, 4  ;;  %s7251_s26 = int_to_ptr.vmem [resolvable:$false] %s7250_s26 }
 0x151   : > { %v5977_v3 = vpack.c.bf16 %v742_v1, %v740_v0  ;;  %v741_v4 = vld [vmem:[%s8886_s19 + $0x10] sm:$0xff]  ;;  %v744_v5 = vld [vmem:[%s8886_s19 + $0x28] sm:$0xff]  ;;  %v746_v6 = vld [vmem:[%s8886_s19 + $0x38] sm:$0xff]  ;;  %s7836_s8 = scalar_lea.vmem %s8887_s22, %s5200_s24  ;;  %s8892_s24 = sld [smem:[#allocation44_spill]] }
 0x152   : > { %v5979_v7 = vpack.c.bf16 %v741_v4, %v739_v2  ;;  %v5981_v8 = vpack.c.bf16 %v746_v6, %v744_v5  ;;  %v743_v9 = vld [vmem:[%s8886_s19 + $0x20] sm:$0xff]  ;;  %v745_v10 = vld [vmem:[%s8886_s19 + $0x30] sm:$0xff]  ;;  %v748_v11 = vld [vmem:[%s8886_s19 + $0x48] sm:$0xff]  ;;  %s7252_s20 = scalar_lea.vmem %s7251_s26, 32 }
 0x153   : > { %5978 = vmatprep.subr.bf16.mxu0 %v5977_v3  ;;  %v750_v12 = vld [vmem:[%s8886_s19 + $0x58] sm:$0xff]  ;;  %v5983_v13 = vpack.c.bf16 %v745_v10, %v743_v9  ;;  %v747_v15 = vld [vmem:[%s8886_s19 + $0x40] sm:$0xff]  ;;  %v749_v16 = vld [vmem:[%s8886_s19 + $0x50] sm:$0xff]  ;;  %s716_s22 = sand.u32 1, %s8889_s17   ;;  %p8893_p0 = scmp.ne.s32.totalorder %s8890_s23, 0 }
 0x154   : > { %5980 = vmatpush1.bf16.msra.mxu0 %v5979_v7  ;;  %v5985_v14 = vpack.c.bf16 %v750_v12, %v748_v11  ;;  %v752_v17 = vld [vmem:[%s8886_s19 + $0x68] sm:$0xff]  ;;  %v754_v18 = vld [vmem:[%s8886_s19 + $0x78] sm:$0xff]  ;;  %v5987_v19 = vpack.c.bf16 %v749_v16, %v747_v15  ;;  %v751_v21 = vld [vmem:[%s8886_s19 + $0x60] sm:$0xff]  ;;  %s4835_s30 = scalar_lea.sflag [#allocation4], %s716_s22 }
 0x155   : > { %5982 = vmatprep.subr.bf16.mxu0 %v5981_v8  ;;  %v5989_v20 = vpack.c.bf16 %v754_v18, %v752_v17  ;;  %v753_v22 = vld [vmem:[%s8886_s19 + $0x70] sm:$0xff]  ;;  %v756_v23 = vld [vmem:[%s8886_s19 + $0x88] sm:$0xff]  ;;  %v758_v24 = vld [vmem:[%s8886_s19 + $0x98] sm:$0xff] }
 0x156   : > { %v5991_v25 = vpack.c.bf16 %v753_v22, %v751_v21  ;;  %v5993_v26 = vpack.c.bf16 %v758_v24, %v756_v23  ;;  %v755_v27 = vld [vmem:[%s8886_s19 + $0x80] sm:$0xff]  ;;  %v757_v28 = vld [vmem:[%s8886_s19 + $0x90] sm:$0xff]  ;;  %v760_v29 = vld [vmem:[%s8886_s19 + $0xa8] sm:$0xff]  ;;  %v7349_v24 = vmov 0.0  }
 0x157   : > { %v762_v30 = vld [vmem:[%s8886_s19 + $0xb8] sm:$0xff]  ;;  %v5995_v31 = vpack.c.bf16 %v757_v28, %v755_v27  ;;  %v724_v32 = vld [vmem:[%s7836_s8 + $0x8] sm:$0xff]  ;;  %v759_v34 = vld [vmem:[%s8886_s19 + $0xa0] sm:$0xff]  ;;  %1065 = vmatprep.mubr.f32.mxu1 %v7349_v24  ;;  %s8764_s3 = scalar_lea.hbm %s8892_s24, %s5197_s15 }
 0x158   : > { %5984 = vmatpush1.bf16.msra.mxu0 %v5983_v13  ;;  %v5997_v33 = vpack.c.bf16 %v762_v30, %v760_v29  ;;  %v761_v35 = vld [vmem:[%s8886_s19 + $0xb0] sm:$0xff]  ;;  %5037 = vmatprep.mubr.msk.f32.mxu0 %vm799_vm0, %v724_v32  ;;  %v764_v36 = vld [vmem:[%s8886_s19 + $0xc8] sm:$0xff]  ;;  %v766_v37 = vld [vmem:[%s8886_s19 + $0xd8] sm:$0xff] }
 0x159   : > { %5986 = vmatprep.subr.bf16.mxu0 %v5985_v14  ;;  %v5999_v38 = vpack.c.bf16 %v761_v35, %v759_v34  ;;  %v6001_v39 = vpack.c.bf16 %v766_v37, %v764_v36  ;;  %v763_v40 = vld [vmem:[%s8886_s19 + $0xc0] sm:$0xff]  ;;  %v765_v41 = vld [vmem:[%s8886_s19 + $0xd0] sm:$0xff]  ;;  %v768_v42 = vld [vmem:[%s8886_s19 + $0xe8] sm:$0xff] }
 0x15a   : > { %v770_v43 = vld [vmem:[%s8886_s19 + $0xf8] sm:$0xff]  ;;  %v6003_v44 = vpack.c.bf16 %v765_v41, %v763_v40  ;;  %v767_v46 = vld [vmem:[%s8886_s19 + $0xe0] sm:$0xff]  ;;  %v769_v47 = vld [vmem:[%s8886_s19 + $0xf0] sm:$0xff] }
 0x15b   : > { %v6005_v45 = vpack.c.bf16 %v770_v43, %v768_v42  ;;  %v772_v48 = vld [vmem:[%s8886_s19 + $0x108] sm:$0xff]  ;;  %v774_v49 = vld [vmem:[%s8886_s19 + $0x118] sm:$0xff]  ;;  %v6007_v50 = vpack.c.bf16 %v769_v47, %v767_v46  ;;  %v771_v52 = vld [vmem:[%s8886_s19 + $0x100] sm:$0xff] }
 0x15c   : > { %5988 = vmatpush1.bf16.msra.mxu0 %v5987_v19  ;;  %v6009_v51 = vpack.c.bf16 %v774_v49, %v772_v48  ;;  %v773_v53 = vld [vmem:[%s8886_s19 + $0x110] sm:$0xff]  ;;  %v776_v54 = vld [vmem:[%s8886_s19 + $0x128] sm:$0xff]  ;;  %v778_v55 = vld [vmem:[%s8886_s19 + $0x138] sm:$0xff] }
 0x15d   : > { %5990 = vmatprep.subr.bf16.mxu0 %v5989_v20  ;;  %v6011_v56 = vpack.c.bf16 %v773_v53, %v771_v52  ;;  %v6013_v57 = vpack.c.bf16 %v778_v55, %v776_v54  ;;  %v775_v58 = vld [vmem:[%s8886_s19 + $0x120] sm:$0xff]  ;;  %v777_v59 = vld [vmem:[%s8886_s19 + $0x130] sm:$0xff]  ;;  %v780_v60 = vld [vmem:[%s8886_s19 + $0x148] sm:$0xff] }
 0x15e   : > { %v782_v61 = vld [vmem:[%s8886_s19 + $0x158] sm:$0xff]  ;;  %v6015_v62 = vpack.c.bf16 %v777_v59, %v775_v58  ;;  %v779_v0 = vld [vmem:[%s8886_s19 + $0x140] sm:$0xff]  ;;  %v781_v1 = vld [vmem:[%s8886_s19 + $0x150] sm:$0xff] }
 0x15f   : > { %v6017_v63 = vpack.c.bf16 %v782_v61, %v780_v60  ;;  %v784_v2 = vld [vmem:[%s8886_s19 + $0x168] sm:$0xff]  ;;  %v786_v3 = vld [vmem:[%s8886_s19 + $0x178] sm:$0xff]  ;;  %v6019_v4 = vpack.c.bf16 %v781_v1, %v779_v0  ;;  %v783_v6 = vld [vmem:[%s8886_s19 + $0x160] sm:$0xff] }
 0x160   : > { %5992 = vmatpush1.bf16.msra.mxu0 %v5991_v25  ;;  %v6021_v5 = vpack.c.bf16 %v786_v3, %v784_v2  ;;  %v785_v7 = vld [vmem:[%s8886_s19 + $0x170] sm:$0xff]  ;;  %v723_v9 = vld [vmem:[%s7836_s8] sm:$0xff]  ;;  %v726_v10 = vld [vmem:[%s7836_s8 + $0x18] sm:$0xff]  ;;  %v789_v25 = vlaneseq }
 0x161   : > { %5994 = vmatprep.subr.bf16.mxu0 %v5993_v26  ;;  %v6023_v8 = vpack.c.bf16 %v785_v7, %v783_v6  ;;  %v725_v11 = vld [vmem:[%s7836_s8 + $0x10] sm:$0xff]  ;;  %v728_v12 = vld [vmem:[%s7836_s8 + $0x28] sm:$0xff]  ;;  %v727_v13 = vld [vmem:[%s7836_s8 + $0x20] sm:$0xff] }
 0x162   : > { %v730_v14 = vld [vmem:[%s7836_s8 + $0x38] sm:$0xff]  ;;  %v729_v15 = vld [vmem:[%s7836_s8 + $0x30] sm:$0xff]  ;;  %v732_v16 = vld [vmem:[%s7836_s8 + $0x48] sm:$0xff]  ;;  %v7948_v26 = vshrl.u32 %v789_v25, 7 }
 0x163   : > { %v731_v17 = vld [vmem:[%s7836_s8 + $0x40] sm:$0xff]  ;;  %v734_v18 = vld [vmem:[%s7836_s8 + $0x58] sm:$0xff]  ;;  %v733_v19 = vld [vmem:[%s7836_s8 + $0x50] sm:$0xff] }
 0x164   : > { %5996 = vmatpush1.bf16.msra.mxu0 %v5995_v31  ;;  %v736_v20 = vld [vmem:[%s7836_s8 + $0x68] sm:$0xff]  ;;  %v735_v21 = vld [vmem:[%s7836_s8 + $0x60] sm:$0xff]  ;;  %v738_v22 = vld [vmem:[%s7836_s8 + $0x78] sm:$0xff]  ;;  %v791_v27 = vsub.s32 0, %v7948_v26  ;;  %v795_v29 = vsub.s32 1, %v7948_v26 }
 0x165   : > { %5998 = vmatprep.subr.bf16.mxu0 %v5997_v33  ;;  %v737_v23 = vld [vmem:[%s7836_s8 + $0x70] sm:$0xff]  ;;  %v787_v28 = vld [vmem:[#allocation2] sm:$0x3]  ;;  %s717_s8 = scalar_lea.vmem [#allocation20], %s716_s22 }
 0x166   : > { %v7954_v30 = vrot.slane %v787_v28, %v791_v27  ;;  %v7958_v31 = vrot.slane %v787_v28, %v795_v29  ;;  %s4847_s29 = sshll.u32 %s717_s8, 4  ;;  %s8766_s29 = int_to_ptr.vmem [resolvable:$true] %s4847_s29 }
 0x167   : > { %s7246_s25 = scalar_lea.vmem %s8766_s29, 16  ;;  %p7253_p3 = scmp.lt.s32.totalorder %s8766_s29, %s7251_s26 }
 0x168   : > { %6000 = vmatpush1.bf16.msra.mxu0 %v5999_v38  ;;  %p7247_p5 = scmp.ne.s32.totalorder %s8766_s29, %s7246_s25  ;;  %p7254_p4 = scmp.lt.s32.totalorder %s7252_s20, %s7246_s25 }
 0x169   : > { %6002 = vmatprep.subr.bf16.mxu0 %v6001_v39 }
 0x16a   : > { %p7248_p10 = pnand %p7247_p5, %p8893_p0  ;;  %p7255_p12 = por %p7254_p4, %p7253_p3 }
 0x16c   : > { %6004 = vmatpush1.bf16.msra.mxu0 %v6003_v44  ;;  %p7249_p2 = pneg %p7248_p10 }
 0x16d   : > { %6006 = vmatprep.subr.bf16.mxu0 %v6005_v45 }
 0x16e   : > { %p7256_p7 = pnand %p7255_p12, %p7249_p2 }
 0x170   : > { %6008 = vmatpush1.bf16.msra.mxu0 %v6007_v50 }
 0x171   : > { %6010 = vmatprep.subr.bf16.mxu0 %v6009_v51 }
 0x174   : > { %6012 = vmatpush1.bf16.msra.mxu0 %v6011_v56 }
 0x175   : > { %6014 = vmatprep.subr.bf16.mxu0 %v6013_v57 }
 0x178   : > { %6016 = vmatpush1.bf16.msra.mxu0 %v6015_v62 }
 0x179   : > { %6018 = vmatprep.subr.bf16.mxu0 %v6017_v63 }
 0x17c   : > { %6020 = vmatpush1.bf16.msra.mxu0 %v6019_v4 }
 0x17d   : > { %6022 = vmatprep.subr.bf16.mxu0 %v6021_v5 }
 0x180   : > { %6024 = vmatpush1.bf16.msra.mxu0 %v6023_v8 }
 0x183   : > { %889 = vmatmul.mubr.f32.vlgmr.msra.gmra.mrb[0].mxu0 %v723_v9 }
 0x184   : > { %5038 = vmatprep.mubr.msk.f32.mxu0 %vm799_vm0, %v726_v10 }
 0x187   : > { %895 = vmatmul.mubr.f32.gmra.mrb[2].mxu0 %v725_v11 }
 0x188   : > { %5039 = vmatprep.mubr.msk.f32.mxu0 %vm799_vm0, %v728_v12 }
 0x18b   : > { %901 = vmatmul.mubr.f32.gmra.mrb[4].mxu0 %v727_v13 }
 0x18c   : > { %5040 = vmatprep.mubr.msk.f32.mxu0 %vm799_vm0, %v730_v14 }
 0x18f   : > { %907 = vmatmul.mubr.f32.gmra.mrb[6].mxu0 %v729_v15 }
 0x190   : > { %5041 = vmatprep.mubr.msk.f32.mxu0 %vm799_vm0, %v732_v16 }
 0x193   : > { %913 = vmatmul.mubr.f32.gmra.mrb[8].mxu0 %v731_v17 }
 0x194   : > { %5042 = vmatprep.mubr.msk.f32.mxu0 %vm799_vm0, %v734_v18 }
 0x197   : > { %919 = vmatmul.mubr.f32.gmra.mrb[10].mxu0 %v733_v19 }
 0x198   : > { %5043 = vmatprep.mubr.msk.f32.mxu0 %vm799_vm0, %v736_v20 }
 0x19b   : > { %925 = vmatmul.mubr.f32.gmra.mrb[12].mxu0 %v735_v21 }
 0x19c   : > { %5044 = vmatprep.mubr.msk.f32.mxu0 %vm799_vm0, %v738_v22 }
 0x19f   : > { %931 = vmatmul.mubr.f32.gmra.mrb[14].mxu0 %v737_v23 }
 0x1a0   : > { %1584 = vmatprep.mubr.f32.mxu0 %v7349_v24 }
 0x256   : > { %v890_v32 = vpop.f32.mrb[0].mxu0 }
 0x257   : > { %v891_v33 = vadd.f32 %v890_v32, %v7954_v30  ;;  %v892_v34 = vpop.f32.mrb[1].mxu0 }
 0x258   : > { %v893_v35 = vadd.f32 %v892_v34, %v7958_v31 }
 0x259   : > { %v953_v37 = vmul.f32 0.2, %v891_v33  ;;  %vm937_vm1 = vcmp.gt.f32.partialorder %v891_v33, 0.0 }
 0x25a   : > { %v896_v36 = vpop.f32.mrb[2].mxu0  ;;  %v954_v40 = vmul.f32 0.2, %v893_v35  ;;  %vm938_vm2 = vcmp.gt.f32.partialorder %v893_v35, 0.0 }
 0x25b   : > { %v897_v38 = vadd.f32 %v896_v36, %v7954_v30  ;;  %v898_v39 = vpop.f32.mrb[3].mxu0  ;;  %v969_v45 = vsel %vm937_vm1, %v891_v33, %v953_v37 }
 0x25c   : > { %v899_v41 = vadd.f32 %v898_v39, %v7958_v31  ;;  %v970_v49 = vsel %vm938_vm2, %v893_v35, %v954_v40 }
 0x25d   : > { %vm939_vm3 = vcmp.gt.f32.partialorder %v897_v38, 0.0  ;;  %v955_v42 = vmul.f32 0.2, %v897_v38 }
 0x25e   : > { %vm940_vm4 = vcmp.gt.f32.partialorder %v899_v41, 0.0  ;;  %v956_v43 = vmul.f32 0.2, %v899_v41  ;;  %v902_v44 = vpop.f32.mrb[4].mxu0 }
 0x25f   : > { %v971_v46 = vsel %vm939_vm3, %v897_v38, %v955_v42  ;;  %v903_v47 = vadd.f32 %v902_v44, %v7954_v30  ;;  %v904_v48 = vpop.f32.mrb[5].mxu0 }
 0x260   : > { %v7965_v50 = vpack.c.bf16 %v971_v46, %v969_v45  ;;  %v972_v51 = vsel %vm940_vm4, %v899_v41, %v956_v43  ;;  %v905_v52 = vadd.f32 %v904_v48, %v7958_v31  ;;  %v985_v45 = vld [vmem:[#allocation5] sm:$0xff]  ;;  %v987_v48 = vld [vmem:[#allocation5 + $0x10] sm:$0xff] }
 0x261   : > { %v7968_v53 = vpack.c.bf16 %v972_v51, %v970_v49  ;;  %v957_v55 = vmul.f32 0.2, %v903_v47  ;;  %vm941_vm5 = vcmp.gt.f32.partialorder %v903_v47, 0.0  ;;  %v1504_v46 = vld [vmem:[#allocation5 + $0x40] sm:$0xff]  ;;  %v1506_v49 = vld [vmem:[#allocation5 + $0x50] sm:$0xff]  ;;  %v1264_v51 = vld [vmem:[#allocation7 + $0x218] sm:$0xff] }
 0x262   : > { %v908_v54 = vpop.f32.mrb[6].mxu0  ;;  %v958_v58 = vmul.f32 0.2, %v905_v52  ;;  %vm942_vm6 = vcmp.gt.f32.partialorder %v905_v52, 0.0 }
 0x263   : > { %v909_v56 = vadd.f32 %v908_v54, %v7954_v30  ;;  %v910_v57 = vpop.f32.mrb[7].mxu0  ;;  %6026 = vmatprep.subr.bf16.mxu1 %v7968_v53  ;;  %6186 = vmatprep.subr.bf16.mxu0 %v7968_v53  ;;  %v973_v63 = vsel %vm941_vm5, %v903_v47, %v957_v55  ;;  %v1505_v47 = vld [vmem:[#allocation5 + $0x48] sm:$0xff]  ;;  %v1261_v55 = vld [vmem:[#allocation7 + $0x200] sm:$0xff] }
 0x264   : > { %v911_v59 = vadd.f32 %v910_v57, %v7958_v31  ;;  %6028 = vmatpush1.bf16.msra.mxu1 %v7965_v50  ;;  %6188 = vmatpush1.bf16.msra.mxu0 %v7965_v50  ;;  %v974_v3 = vsel %vm942_vm6, %v905_v52, %v958_v58  ;;  %v988_v52 = vld [vmem:[#allocation5 + $0x18] sm:$0xff]  ;;  %v1266_v57 = vld [vmem:[#allocation7 + $0x228] sm:$0xff] }
 0x265   : > { %vm943_vm7 = vcmp.gt.f32.partialorder %v909_v56, 0.0  ;;  %v959_v60 = vmul.f32 0.2, %v909_v56  ;;  %v1268_v58 = vld [vmem:[#allocation7 + $0x238] sm:$0xff] }
 0x266   : > { %vm944_vm8 = vcmp.gt.f32.partialorder %v911_v59, 0.0  ;;  %v960_v61 = vmul.f32 0.2, %v911_v59  ;;  %v914_v62 = vpop.f32.mrb[8].mxu0 }
 0x267   : > { %v975_v0 = vsel %vm943_vm7, %v909_v56, %v959_v60  ;;  %v915_v1 = vadd.f32 %v914_v62, %v7954_v30  ;;  %v916_v2 = vpop.f32.mrb[9].mxu0  ;;  %v1263_v56 = vld [vmem:[#allocation7 + $0x210] sm:$0xff]  ;;  %v6061_v62 = vpack.c.bf16 %v1268_v58, %v1266_v57  ;;  %v1302_v57 = vld [vmem:[#allocation7 + $0x348] sm:$0xff]  ;;  %v1304_v58 = vld [vmem:[#allocation7 + $0x358] sm:$0xff] }
 0x268   : > { %v7977_v4 = vpack.c.bf16 %v975_v0, %v973_v63  ;;  %v976_v5 = vsel %vm944_vm8, %v911_v59, %v960_v61  ;;  %v917_v6 = vadd.f32 %v916_v2, %v7958_v31  ;;  %v1155_v59 = vld [vmem:[#allocation5 + $0x20] sm:$0xff]  ;;  %v6059_v60 = vpack.c.bf16 %v1263_v56, %v1261_v55  ;;  %v1267_v0 = vld [vmem:[#allocation7 + $0x230] sm:$0xff]  ;;  %v1272_v2 = vld [vmem:[#allocation7 + $0x258] sm:$0xff] }
 0x269   : > { %v7980_v7 = vpack.c.bf16 %v976_v5, %v974_v3  ;;  %v961_v9 = vmul.f32 0.2, %v915_v1  ;;  %vm945_vm9 = vcmp.gt.f32.partialorder %v915_v1, 0.0  ;;  %v1772_v61 = vld [vmem:[#allocation5 + $0x60] sm:$0xff]  ;;  %v1156_v3 = vld [vmem:[#allocation5 + $0x28] sm:$0xff]  ;;  %v1299_v56 = vld [vmem:[#allocation7 + $0x330] sm:$0xff] }
 0x26a   : > { %v920_v8 = vpop.f32.mrb[10].mxu0  ;;  %v962_v12 = vmul.f32 0.2, %v917_v6  ;;  %vm946_vm10 = vcmp.gt.f32.partialorder %v917_v6, 0.0  ;;  %v1265_v63 = vld [vmem:[#allocation7 + $0x220] sm:$0xff]  ;;  %v1773_v5 = vld [vmem:[#allocation5 + $0x68] sm:$0xff] }
 0x26b   : > { %v921_v10 = vadd.f32 %v920_v8, %v7954_v30  ;;  %v922_v11 = vpop.f32.mrb[11].mxu0  ;;  %6030 = vmatprep.subr.bf16.mxu1 %v7980_v7  ;;  %6190 = vmatprep.subr.bf16.mxu0 %v7980_v7  ;;  %v977_v17 = vsel %vm945_vm9, %v915_v1, %v961_v9  ;;  %v1270_v1 = vld [vmem:[#allocation7 + $0x248] sm:$0xff]  ;;  %v1271_v8 = vld [vmem:[#allocation7 + $0x250] sm:$0xff]  ;;  %v1297_v55 = vld [vmem:[#allocation7 + $0x320] sm:$0xff] }
 0x26c   : > { %v923_v13 = vadd.f32 %v922_v11, %v7958_v31  ;;  %6032 = vmatpush1.bf16.msra.mxu1 %v7977_v4  ;;  %6192 = vmatpush1.bf16.msra.mxu0 %v7977_v4  ;;  %v978_v21 = vsel %vm946_vm10, %v917_v6, %v962_v12  ;;  %v6065_v6 = vpack.c.bf16 %v1272_v2, %v1270_v1  ;;  %v1274_v9 = vld [vmem:[#allocation7 + $0x268] sm:$0xff]  ;;  %v1157_v11 = vld [vmem:[#allocation5 + $0x30] sm:$0xff]  ;;  %vm2085_vm10 = vcmask 261120  }
 0x26d   : > { %vm947_vm11 = vcmp.gt.f32.partialorder %v921_v10, 0.0  ;;  %v963_v14 = vmul.f32 0.2, %v921_v10 }
 0x26e   : > { %vm948_vm12 = vcmp.gt.f32.partialorder %v923_v13, 0.0  ;;  %v964_v15 = vmul.f32 0.2, %v923_v13  ;;  %v926_v16 = vpop.f32.mrb[12].mxu0 }
 0x26f   : > { %v979_v18 = vsel %vm947_vm11, %v921_v10, %v963_v14  ;;  %v927_v19 = vadd.f32 %v926_v16, %v7954_v30  ;;  %v928_v20 = vpop.f32.mrb[13].mxu0  ;;  %v1276_v10 = vld [vmem:[#allocation7 + $0x278] sm:$0xff]  ;;  %v1273_v14 = vld [vmem:[#allocation7 + $0x260] sm:$0xff]  ;;  %v1278_v16 = vld [vmem:[#allocation7 + $0x288] sm:$0xff]  ;;  %vm7351_vm11 = vmmov 0  }
 0x270   : > { %v6035_v22 = vpack.c.bf16 %v979_v18, %v977_v17  ;;  %v980_v23 = vsel %vm948_vm12, %v923_v13, %v964_v15  ;;  %v929_v25 = vadd.f32 %v928_v20, %v7958_v31  ;;  %v6069_v13 = vpack.c.bf16 %v1276_v10, %v1274_v9  ;;  %v1275_v15 = vld [vmem:[#allocation7 + $0x270] sm:$0xff]  ;;  %v1280_v17 = vld [vmem:[#allocation7 + $0x298] sm:$0xff]  ;;  %v1309_v9 = vld [vmem:[#allocation7 + $0x380] sm:$0xff] }
 0x271   : > { %v6033_v28 = vpack.c.bf16 %v980_v23, %v978_v21  ;;  %v965_v33 = vmul.f32 0.2, %v927_v19  ;;  %vm949_vm13 = vcmp.gt.f32.partialorder %v927_v19, 0.0  ;;  %v1158_v18 = vld [vmem:[#allocation5 + $0x38] sm:$0xff]  ;;  %v6073_v20 = vpack.c.bf16 %v1280_v17, %v1278_v16  ;;  %v1277_v21 = vld [vmem:[#allocation7 + $0x280] sm:$0xff]  ;;  %v1282_v23 = vld [vmem:[#allocation7 + $0x2a8] sm:$0xff] }
 0x272   : > { %v932_v32 = vpop.f32.mrb[14].mxu0  ;;  %v966_v36 = vmul.f32 0.2, %v929_v25  ;;  %vm950_vm14 = vcmp.gt.f32.partialorder %v929_v25, 0.0  ;;  %v1311_v10 = vld [vmem:[#allocation7 + $0x390] sm:$0xff]  ;;  %v1313_v16 = vld [vmem:[#allocation7 + $0x3a0] sm:$0xff] }
 0x273   : > { %v933_v34 = vadd.f32 %v932_v32, %v7954_v30  ;;  %v934_v35 = vpop.f32.mrb[15].mxu0  ;;  %6034 = vmatprep.subr.bf16.mxu1 %v6033_v28  ;;  %6194 = vmatprep.subr.bf16.mxu0 %v6033_v28  ;;  %v981_v40 = vsel %vm949_vm13, %v927_v19, %v965_v33  ;;  %v6071_v19 = vpack.c.bf16 %v1275_v15, %v1273_v14  ;;  %v1281_v33 = vld [vmem:[#allocation7 + $0x2a0] sm:$0xff]  ;;  %v1316_v14 = vld [vmem:[#allocation7 + $0x3b8] sm:$0xff]  ;;  %v1315_v17 = vld [vmem:[#allocation7 + $0x3b0] sm:$0xff] }
 0x274   : > { %v935_v37 = vadd.f32 %v934_v35, %v7958_v31  ;;  %6036 = vmatpush1.bf16.msra.mxu1 %v6035_v22  ;;  %6196 = vmatpush1.bf16.msra.mxu0 %v6035_v22  ;;  %v982_v42 = vsel %vm950_vm14, %v929_v25, %v966_v36  ;;  %v986_v31 = vld [vmem:[#allocation5 + $0x8] sm:$0xff]  ;;  %v1284_v25 = vld [vmem:[#allocation7 + $0x2b8] sm:$0xff]  ;;  %vm2878_vm14 = vcmask 130048  }
 0x275   : > { %vm951_vm15 = vcmp.gt.f32.partialorder %v933_v34, 0.0  ;;  %v967_v38 = vmul.f32 0.2, %v933_v34  ;;  %v6077_v32 = vpack.c.bf16 %v1284_v25, %v1282_v23  ;;  %v1286_v35 = vld [vmem:[#allocation7 + $0x2c8] sm:$0xff]  ;;  %v1288_v36 = vld [vmem:[#allocation7 + $0x2d8] sm:$0xff]  ;;  %v1317_v23 = vld [vmem:[#allocation7 + $0x3c0] sm:$0xff] }
 0x276   : > { %vm952_vm1 = vcmp.gt.f32.partialorder %v935_v37, 0.0  ;;  %v968_v39 = vmul.f32 0.2, %v935_v37  ;;  %v1319_v25 = vld [vmem:[#allocation7 + $0x3d0] sm:$0xff] }
 0x277   : > { %v983_v41 = vsel %vm951_vm15, %v933_v34, %v967_v38  ;;  %v1283_v34 = vld [vmem:[#allocation7 + $0x2b0] sm:$0xff]  ;;  %v6081_v38 = vpack.c.bf16 %v1288_v36, %v1286_v35  ;;  %v1321_v35 = vld [vmem:[#allocation7 + $0x3e0] sm:$0xff] }
 0x278   : > { %v6039_v43 = vpack.c.bf16 %v983_v41, %v981_v40  ;;  %v984_v44 = vsel %vm952_vm1, %v935_v37, %v968_v39  ;;  %v6079_v37 = vpack.c.bf16 %v1283_v34, %v1281_v33  ;;  %v1285_v39 = vld [vmem:[#allocation7 + $0x2c0] sm:$0xff]  ;;  %v1287_v40 = vld [vmem:[#allocation7 + $0x2d0] sm:$0xff]  ;;  %v1290_v41 = vld [vmem:[#allocation7 + $0x2e8] sm:$0xff]  ;;  %vm3538_vm1 = vcmask 64512  }
 0x279   : > { %v6037_v30 = vpack.c.bf16 %v984_v44, %v982_v42  ;;  %v1292_v42 = vld [vmem:[#allocation7 + $0x2f8] sm:$0xff]  ;;  %v1323_v36 = vld [vmem:[#allocation7 + $0x3f0] sm:$0xff] }
 0x27a   : > { %v6085_v44 = vpack.c.bf16 %v1292_v42, %v1290_v41  ;;  %v1324_v33 = vld [vmem:[#allocation7 + $0x3f8] sm:$0xff] }
 0x27b   : > { %6038 = vmatprep.subr.bf16.mxu1 %v6037_v30  ;;  %6198 = vmatprep.subr.bf16.mxu0 %v6037_v30 }
 0x27c   : > { %6040 = vmatpush1.bf16.msra.mxu1 %v6039_v43  ;;  %6200 = vmatpush1.bf16.msra.mxu0 %v6039_v43 }
 0x27d   : > { %6042 = vmatprep.subr.bf16.mxu1 %v7968_v53  ;;  %6266 = vmatprep.subr.bf16.mxu0 %v7968_v53  ;;  %v1507_v53 = vld [vmem:[#allocation5 + $0x58] sm:$0xff] }
 0x27f   : > { %5045 = vmatmul.mubr.msk.f32.vlgmr.msra.gmra.mrb[0].mxu1 %vm799_vm0, %v985_v45  ;;  %5053 = vmatmul.mubr.msk.f32.vlgmr.msra.gmra.mrb[16].mxu0 %vm799_vm0, %v1504_v46  ;;  %v1291_v45 = vld [vmem:[#allocation7 + $0x2f0] sm:$0xff]  ;;  %v1294_v46 = vld [vmem:[#allocation7 + $0x308] sm:$0xff] }
 0x280   : > { %6044 = vmatpush1.bf16.msra.mxu1 %v7965_v50  ;;  %6268 = vmatpush1.bf16.msra.mxu0 %v7965_v50  ;;  %v1262_v50 = vld [vmem:[#allocation7 + $0x208] sm:$0xff] }
 0x281   : > { %6046 = vmatprep.subr.bf16.mxu1 %v7980_v7  ;;  %6270 = vmatprep.subr.bf16.mxu0 %v7980_v7  ;;  %v6057_v54 = vpack.c.bf16 %v1264_v51, %v1262_v50  ;;  %v1269_v7 = vld [vmem:[#allocation7 + $0x240] sm:$0xff]  ;;  %v1295_v50 = vld [vmem:[#allocation7 + $0x310] sm:$0xff]  ;;  %v1298_v51 = vld [vmem:[#allocation7 + $0x328] sm:$0xff] }
 0x282   : > { %1071 = vmatprep.mubr.f32.mxu1 %v7349_v24  ;;  %1590 = vmatprep.mubr.f32.mxu0 %v7349_v24  ;;  %v6067_v12 = vpack.c.bf16 %v1271_v8, %v1269_v7  ;;  %v1312_v7 = vld [vmem:[#allocation7 + $0x398] sm:$0xff] }
 0x283   : > { %5046 = vmatmul.mubr.msk.f32.gmra.mrb[2].mxu1 %vm799_vm0, %v986_v31  ;;  %5054 = vmatmul.mubr.msk.f32.gmra.mrb[18].mxu0 %vm799_vm0, %v1505_v47  ;;  %v1296_v31 = vld [vmem:[#allocation7 + $0x318] sm:$0xff] }
 0x284   : > { %6048 = vmatpush1.bf16.msra.mxu1 %v7977_v4  ;;  %6272 = vmatpush1.bf16.msra.mxu0 %v7977_v4  ;;  %v6063_v4 = vpack.c.bf16 %v1267_v0, %v1265_v63  ;;  %v1306_v63 = vld [vmem:[#allocation7 + $0x368] sm:$0xff]  ;;  %v1308_v0 = vld [vmem:[#allocation7 + $0x378] sm:$0xff] }
 0x285   : > { %6050 = vmatprep.subr.bf16.mxu1 %v6033_v28  ;;  %6274 = vmatprep.subr.bf16.mxu0 %v6033_v28  ;;  %v6101_v2 = vpack.c.bf16 %v1308_v0, %v1306_v63 }
 0x286   : > { %1077 = vmatprep.mubr.f32.mxu1 %v7349_v24  ;;  %1596 = vmatprep.mubr.f32.mxu0 %v7349_v24 }
 0x287   : > { %5047 = vmatmul.mubr.msk.f32.gmra.mrb[4].mxu1 %vm799_vm0, %v987_v48  ;;  %5055 = vmatmul.mubr.msk.f32.gmra.mrb[20].mxu0 %vm799_vm0, %v1506_v49  ;;  %v6089_v48 = vpack.c.bf16 %v1296_v31, %v1294_v46  ;;  %v1293_v49 = vld [vmem:[#allocation7 + $0x300] sm:$0xff] }
 0x288   : > { %6052 = vmatpush1.bf16.msra.mxu1 %v6035_v22  ;;  %6276 = vmatpush1.bf16.msra.mxu0 %v6035_v22  ;;  %v1279_v22 = vld [vmem:[#allocation7 + $0x290] sm:$0xff] }
 0x289   : > { %6054 = vmatprep.subr.bf16.mxu1 %v6037_v30  ;;  %6278 = vmatprep.subr.bf16.mxu0 %v6037_v30  ;;  %v6075_v28 = vpack.c.bf16 %v1279_v22, %v1277_v21  ;;  %v1289_v30 = vld [vmem:[#allocation7 + $0x2e0] sm:$0xff]  ;;  %v1320_v21 = vld [vmem:[#allocation7 + $0x3d8] sm:$0xff] }
 0x28a   : > { %1083 = vmatprep.mubr.f32.mxu1 %v7349_v24  ;;  %1602 = vmatprep.mubr.f32.mxu0 %v7349_v24  ;;  %v6087_v47 = vpack.c.bf16 %v1291_v45, %v1289_v30 }
 0x28b   : > { %5048 = vmatmul.mubr.msk.f32.gmra.mrb[6].mxu1 %vm799_vm0, %v988_v52  ;;  %5056 = vmatmul.mubr.msk.f32.gmra.mrb[22].mxu0 %vm799_vm0, %v1507_v53  ;;  %v1300_v52 = vld [vmem:[#allocation7 + $0x338] sm:$0xff]  ;;  %v6091_v53 = vpack.c.bf16 %v1295_v50, %v1293_v49  ;;  %v1095_v50 = vld [vmem:[#allocation7 + $0x28] sm:$0xff] }
 0x28c   : > { %6056 = vmatpush1.bf16.msra.mxu1 %v6039_v43  ;;  %6280 = vmatpush1.bf16.msra.mxu0 %v6039_v43  ;;  %v6083_v43 = vpack.c.bf16 %v1287_v40, %v1285_v39  ;;  %v1093_v39 = vld [vmem:[#allocation7 + $0x18] sm:$0xff] }
 0x28d   : > { %1235 = vmatprep.mubr.f32.mxu1 %v7349_v24  ;;  %6058 = vmatprep.subr.bf16.mxu1 %v6057_v54  ;;  %v6093_v54 = vpack.c.bf16 %v1300_v52, %v1298_v51  ;;  %v1097_v51 = vld [vmem:[#allocation7 + $0x38] sm:$0xff] }
 0x28e   : > { %1852 = vmatprep.mubr.f32.mxu0 %v7349_v24 }
 0x28f   : > { %5049 = vmatmul.mubr.msk.f32.vlgmr.msra.gmra.mrb[8].mxu1 %vm799_vm0, %v1155_v59  ;;  %5057 = vmatmul.mubr.msk.f32.vlgmr.msra.gmra.mrb[24].mxu0 %vm799_vm0, %v1772_v61  ;;  %v6095_v59 = vpack.c.bf16 %v1299_v56, %v1297_v55  ;;  %v1301_v61 = vld [vmem:[#allocation7 + $0x340] sm:$0xff]  ;;  %v6125_v56 = vpack.c.bf16 %v1097_v51, %v1095_v50  ;;  %v1125_v50 = vld [vmem:[#allocation7 + $0x118] sm:$0xff] }
 0x290   : > { %1241 = vmatprep.mubr.f32.mxu1 %v7349_v24  ;;  %6060 = vmatpush1.bf16.msra.mxu1 %v6059_v60  ;;  %v6097_v60 = vpack.c.bf16 %v1304_v58, %v1302_v57  ;;  %v1094_v57 = vld [vmem:[#allocation7 + $0x20] sm:$0xff]  ;;  %v1096_v58 = vld [vmem:[#allocation7 + $0x30] sm:$0xff] }
 0x291   : > { %6062 = vmatprep.subr.bf16.mxu1 %v6061_v62  ;;  %1858 = vmatprep.mubr.f32.mxu0 %v7349_v24  ;;  %v1303_v62 = vld [vmem:[#allocation7 + $0x350] sm:$0xff] }
 0x292   : > { %v6099_v1 = vpack.c.bf16 %v1303_v62, %v1301_v61  ;;  %v6127_v62 = vpack.c.bf16 %v1096_v58, %v1094_v57  ;;  %v1129_v57 = vld [vmem:[#allocation7 + $0x138] sm:$0xff] }
 0x293   : > { %5050 = vmatmul.mubr.msk.f32.gmra.mrb[10].mxu1 %vm799_vm0, %v1156_v3  ;;  %5058 = vmatmul.mubr.msk.f32.gmra.mrb[26].mxu0 %vm799_vm0, %v1773_v5  ;;  %v1305_v3 = vld [vmem:[#allocation7 + $0x360] sm:$0xff] }
 0x294   : > { %1247 = vmatprep.mubr.f32.mxu1 %v7349_v24  ;;  %6064 = vmatpush1.bf16.msra.mxu1 %v6063_v4  ;;  %v1307_v4 = vld [vmem:[#allocation7 + $0x370] sm:$0xff] }
 0x295   : > { %6066 = vmatprep.subr.bf16.mxu1 %v6065_v6  ;;  %1864 = vmatprep.mubr.f32.mxu0 %v7349_v24  ;;  %v6103_v5 = vpack.c.bf16 %v1307_v4, %v1305_v3  ;;  %v1310_v6 = vld [vmem:[#allocation7 + $0x388] sm:$0xff]  ;;  %v1105_v4 = vld [vmem:[#allocation7 + $0x78] sm:$0xff] }
 0x296   : > { %v6105_v8 = vpack.c.bf16 %v1312_v7, %v1310_v6  ;;  %v1103_v3 = vld [vmem:[#allocation7 + $0x68] sm:$0xff] }
 0x297   : > { %5051 = vmatmul.mubr.msk.f32.gmra.mrb[12].mxu1 %vm799_vm0, %v1157_v11  ;;  %v6107_v11 = vpack.c.bf16 %v1311_v10, %v1309_v9  ;;  %v1102_v9 = vld [vmem:[#allocation7 + $0x60] sm:$0xff]  ;;  %v1104_v10 = vld [vmem:[#allocation7 + $0x70] sm:$0xff] }
 0x298   : > { %1253 = vmatprep.mubr.f32.mxu1 %v7349_v24  ;;  %6068 = vmatpush1.bf16.msra.mxu1 %v6067_v12  ;;  %v1774_v12 = vld [vmem:[#allocation5 + $0x70] sm:$0xff] }
 0x299   : > { %6070 = vmatprep.subr.bf16.mxu1 %v6069_v13  ;;  %5059 = vmatmul.mubr.msk.f32.gmra.mrb[28].mxu0 %vm799_vm0, %v1774_v12  ;;  %v1314_v13 = vld [vmem:[#allocation7 + $0x3a8] sm:$0xff]  ;;  %v1109_v12 = vld [vmem:[#allocation7 + $0x98] sm:$0xff] }
 0x29a   : > { %1870 = vmatprep.mubr.f32.mxu0 %v7349_v24  ;;  %v6109_v15 = vpack.c.bf16 %v1316_v14, %v1314_v13  ;;  %v6135_v14 = vpack.c.bf16 %v1104_v10, %v1102_v9  ;;  %v1136_v9 = vld [vmem:[#allocation7 + $0x170] sm:$0xff]  ;;  %v1139_v10 = vld [vmem:[#allocation7 + $0x188] sm:$0xff] }
 0x29b   : > { %5052 = vmatmul.mubr.msk.f32.gmra.mrb[14].mxu1 %vm799_vm0, %v1158_v18  ;;  %v6111_v18 = vpack.c.bf16 %v1315_v17, %v1313_v16  ;;  %v1106_v17 = vld [vmem:[#allocation7 + $0x80] sm:$0xff] }
 0x29c   : > { %6072 = vmatpush1.bf16.msra.mxu1 %v6071_v19  ;;  %v1775_v19 = vld [vmem:[#allocation5 + $0x78] sm:$0xff] }
 0x29d   : > { %6074 = vmatprep.subr.bf16.mxu1 %v6073_v20  ;;  %5060 = vmatmul.mubr.msk.f32.gmra.mrb[30].mxu0 %vm799_vm0, %v1775_v19  ;;  %v1318_v20 = vld [vmem:[#allocation7 + $0x3c8] sm:$0xff] }
 0x29e   : > { %2156 = vmatprep.mubr.f32.mxu0 %v7349_v24  ;;  %v6113_v22 = vpack.c.bf16 %v1320_v21, %v1318_v20  ;;  %v1111_v19 = vld [vmem:[#allocation7 + $0xa8] sm:$0xff]  ;;  %v1113_v20 = vld [vmem:[#allocation7 + $0xb8] sm:$0xff] }
 0x2a0   : > { %6076 = vmatpush1.bf16.msra.mxu1 %v6075_v28  ;;  %v6115_v28 = vpack.c.bf16 %v1319_v25, %v1317_v23  ;;  %v1110_v23 = vld [vmem:[#allocation7 + $0xa0] sm:$0xff]  ;;  %v1112_v25 = vld [vmem:[#allocation7 + $0xb0] sm:$0xff] }
 0x2a1   : > { %6078 = vmatprep.subr.bf16.mxu1 %v6077_v32  ;;  %v1322_v32 = vld [vmem:[#allocation7 + $0x3e8] sm:$0xff] }
 0x2a2   : > { %v6117_v34 = vpack.c.bf16 %v1324_v33, %v1322_v32  ;;  %v1117_v32 = vld [vmem:[#allocation7 + $0xd8] sm:$0xff]  ;;  %v6143_v33 = vpack.c.bf16 %v1112_v25, %v1110_v23  ;;  %v1147_v25 = vld [vmem:[#allocation7 + $0x1c8] sm:$0xff] }
 0x2a4   : > { %6080 = vmatpush1.bf16.msra.mxu1 %v6079_v37  ;;  %v6119_v37 = vpack.c.bf16 %v1323_v36, %v1321_v35  ;;  %v1114_v35 = vld [vmem:[#allocation7 + $0xc0] sm:$0xff]  ;;  %v1116_v36 = vld [vmem:[#allocation7 + $0xd0] sm:$0xff] }
 0x2a5   : > { %6082 = vmatprep.subr.bf16.mxu1 %v6081_v38  ;;  %v1091_v38 = vld [vmem:[#allocation7 + $0x8] sm:$0xff] }
 0x2a6   : > { %v6121_v40 = vpack.c.bf16 %v1093_v39, %v1091_v38  ;;  %v1121_v38 = vld [vmem:[#allocation7 + $0xf8] sm:$0xff]  ;;  %v6147_v39 = vpack.c.bf16 %v1116_v36, %v1114_v35  ;;  %v1146_v35 = vld [vmem:[#allocation7 + $0x1c0] sm:$0xff]  ;;  %v1148_v36 = vld [vmem:[#allocation7 + $0x1d0] sm:$0xff] }
 0x2a8   : > { %6084 = vmatpush1.bf16.msra.mxu1 %v6083_v43 }
 0x2a9   : > { %6086 = vmatprep.subr.bf16.mxu1 %v6085_v44 }
 0x2ac   : > { %6088 = vmatpush1.bf16.msra.mxu1 %v6087_v47  ;;  %v1090_v47 = vld [vmem:[#allocation7] sm:$0xff] }
 0x2ad   : > { %6090 = vmatprep.subr.bf16.mxu1 %v6089_v48  ;;  %v1092_v48 = vld [vmem:[#allocation7 + $0x10] sm:$0xff] }
 0x2b0   : > { %6092 = vmatpush1.bf16.msra.mxu1 %v6091_v53  ;;  %v6123_v53 = vpack.c.bf16 %v1092_v48, %v1090_v47  ;;  %v1120_v47 = vld [vmem:[#allocation7 + $0xf0] sm:$0xff]  ;;  %v1123_v48 = vld [vmem:[#allocation7 + $0x108] sm:$0xff] }
 0x2b1   : > { %6094 = vmatprep.subr.bf16.mxu1 %v6093_v54 }
 0x2b4   : > { %6096 = vmatpush1.bf16.msra.mxu1 %v6095_v59  ;;  %v1099_v59 = vld [vmem:[#allocation7 + $0x48] sm:$0xff] }
 0x2b5   : > { %6098 = vmatprep.subr.bf16.mxu1 %v6097_v60  ;;  %v1101_v60 = vld [vmem:[#allocation7 + $0x58] sm:$0xff] }
 0x2b6   : > { %v6129_v0 = vpack.c.bf16 %v1101_v60, %v1099_v59  ;;  %v1126_v60 = vld [vmem:[#allocation7 + $0x120] sm:$0xff] }
 0x2b8   : > { %6100 = vmatpush1.bf16.msra.mxu1 %v6099_v1  ;;  %v1098_v1 = vld [vmem:[#allocation7 + $0x40] sm:$0xff] }
 0x2b9   : > { %6102 = vmatprep.subr.bf16.mxu1 %v6101_v2  ;;  %v1100_v2 = vld [vmem:[#allocation7 + $0x50] sm:$0xff] }
 0x2ba   : > { %v6131_v6 = vpack.c.bf16 %v1100_v2, %v1098_v1  ;;  %v1130_v2 = vld [vmem:[#allocation7 + $0x140] sm:$0xff] }
 0x2bc   : > { %6104 = vmatpush1.bf16.msra.mxu1 %v6103_v5 }
 0x2bd   : > { %6106 = vmatprep.subr.bf16.mxu1 %v6105_v8  ;;  %v6133_v8 = vpack.c.bf16 %v1105_v4, %v1103_v3  ;;  %v1132_v3 = vld [vmem:[#allocation7 + $0x150] sm:$0xff]  ;;  %v1135_v4 = vld [vmem:[#allocation7 + $0x168] sm:$0xff] }
 0x2c0   : > { %6108 = vmatpush1.bf16.msra.mxu1 %v6107_v11  ;;  %v1107_v11 = vld [vmem:[#allocation7 + $0x88] sm:$0xff] }
 0x2c1   : > { %6110 = vmatprep.subr.bf16.mxu1 %v6109_v15  ;;  %v6137_v16 = vpack.c.bf16 %v1109_v12, %v1107_v11  ;;  %v1141_v11 = vld [vmem:[#allocation7 + $0x198] sm:$0xff] }
 0x2c4   : > { %6112 = vmatpush1.bf16.msra.mxu1 %v6111_v18  ;;  %v1108_v18 = vld [vmem:[#allocation7 + $0x90] sm:$0xff] }
 0x2c5   : > { %6114 = vmatprep.subr.bf16.mxu1 %v6113_v22  ;;  %v6139_v21 = vpack.c.bf16 %v1108_v18, %v1106_v17  ;;  %v6141_v22 = vpack.c.bf16 %v1113_v20, %v1111_v19  ;;  %v1145_v17 = vld [vmem:[#allocation7 + $0x1b8] sm:$0xff] }
 0x2c8   : > { %6116 = vmatpush1.bf16.msra.mxu1 %v6115_v28  ;;  %v1115_v28 = vld [vmem:[#allocation7 + $0xc8] sm:$0xff] }
 0x2c9   : > { %6118 = vmatprep.subr.bf16.mxu1 %v6117_v34  ;;  %v6145_v34 = vpack.c.bf16 %v1117_v32, %v1115_v28  ;;  %v1149_v28 = vld [vmem:[#allocation7 + $0x1d8] sm:$0xff] }
 0x2cc   : > { %6120 = vmatpush1.bf16.msra.mxu1 %v6119_v37  ;;  %v1119_v37 = vld [vmem:[#allocation7 + $0xe8] sm:$0xff] }
 0x2cd   : > { %6122 = vmatprep.subr.bf16.mxu1 %v6121_v40  ;;  %v6149_v40 = vpack.c.bf16 %v1121_v38, %v1119_v37  ;;  %v1151_v38 = vld [vmem:[#allocation7 + $0x1e8] sm:$0xff] }
 0x352   : > { %v8031_v41 = vpop.f32.mrb[0].mxu1  ;;  %v8045_v49 = vpop.f32.mrb[16].mxu0 }
 0x353   : > { %v1069_v42 = vpop.f32.mrb[1].mxu1  ;;  %v8047_v54 = vpop.f32.mrb[17].mxu0 }
 0x356   : > { %v8033_v43 = vpop.f32.mrb[2].mxu1  ;;  %v8049_v19 = vpop.f32.mrb[18].mxu0 }
 0x357   : > { %v8035_v44 = vpop.f32.mrb[3].mxu1  ;;  %v8051_v23 = vpop.f32.mrb[19].mxu0 }
 0x35a   : > { %v8037_v30 = vpop.f32.mrb[4].mxu1 }
 0x35b   : > { %v8039_v45 = vpop.f32.mrb[5].mxu1 }
 0x35e   : > { %v8041_v46 = vpop.f32.mrb[6].mxu1 }
 0x35f   : > { %v8043_v31 = vpop.f32.mrb[7].mxu1 }
 0x362   : > { %v1237_v52 = vpop.f32.mrb[8].mxu1 }
 0x363   : > { %v1239_v55 = vpop.f32.mrb[9].mxu1 }
 0x364   : > { %1389 = vmatprep.mubr.f32.mxu1 %v1239_v55  ;;  %v1124_v55 = vld [vmem:[#allocation7 + $0x110] sm:$0xff] }
 0x365   : > { %1390 = vmatmul.mubr.f32.vlgmr.msra.gmra.mrb[16].mxu1 %v1237_v52  ;;  %v6153_v52 = vpack.c.bf16 %v1125_v50, %v1123_v48  ;;  %v1150_v48 = vld [vmem:[#allocation7 + $0x1e0] sm:$0xff]  ;;  %v1152_v50 = vld [vmem:[#allocation7 + $0x1f0] sm:$0xff] }
 0x366   : > { %6124 = vmatpush1.bf16.msra.mxu1 %v6123_v53  ;;  %v1243_v61 = vpop.f32.mrb[10].mxu1  ;;  %v1122_v53 = vld [vmem:[#allocation7 + $0x100] sm:$0xff] }
 0x367   : > { %v1245_v63 = vpop.f32.mrb[11].mxu1  ;;  %6126 = vmatprep.subr.bf16.mxu1 %v6125_v56  ;;  %v1127_v56 = vld [vmem:[#allocation7 + $0x128] sm:$0xff]  ;;  %v6155_v58 = vpack.c.bf16 %v1124_v55, %v1122_v53  ;;  %v1613_v53 = vld [vmem:[#allocation7 + $0x418] sm:$0xff]  ;;  %v6183_v55 = vpack.c.bf16 %v1152_v50, %v1150_v48  ;;  %v1636_v48 = vld [vmem:[#allocation7 + $0x4d0] sm:$0xff] }
 0x368   : > { %1395 = vmatprep.mubr.f32.mxu1 %v1245_v63  ;;  %v6157_v59 = vpack.c.bf16 %v1129_v57, %v1127_v56  ;;  %v1133_v63 = vld [vmem:[#allocation7 + $0x158] sm:$0xff]  ;;  %v1639_v50 = vld [vmem:[#allocation7 + $0x4e8] sm:$0xff] }
 0x369   : > { %1396 = vmatmul.mubr.f32.gmra.mrb[18].mxu1 %v1243_v61  ;;  %v1128_v61 = vld [vmem:[#allocation7 + $0x130] sm:$0xff] }
 0x36a   : > { %6128 = vmatpush1.bf16.msra.mxu1 %v6127_v62  ;;  %v1249_v5 = vpop.f32.mrb[12].mxu1  ;;  %v1131_v62 = vld [vmem:[#allocation7 + $0x148] sm:$0xff] }
 0x36b   : > { %v1251_v7 = vpop.f32.mrb[13].mxu1  ;;  %6130 = vmatprep.subr.bf16.mxu1 %v6129_v0  ;;  %v6159_v0 = vpack.c.bf16 %v1128_v61, %v1126_v60  ;;  %v6161_v1 = vpack.c.bf16 %v1133_v63, %v1131_v62  ;;  %v1615_v61 = vld [vmem:[#allocation7 + $0x428] sm:$0xff]  ;;  %v1617_v62 = vld [vmem:[#allocation7 + $0x438] sm:$0xff] }
 0x36c   : > { %1401 = vmatprep.mubr.f32.mxu1 %v1251_v7 }
 0x36d   : > { %1402 = vmatmul.mubr.f32.gmra.mrb[20].mxu1 %v1249_v5  ;;  %v1137_v5 = vld [vmem:[#allocation7 + $0x178] sm:$0xff] }
 0x36e   : > { %6132 = vmatpush1.bf16.msra.mxu1 %v6131_v6  ;;  %v1255_v13 = vpop.f32.mrb[14].mxu1  ;;  %v6163_v6 = vpack.c.bf16 %v1132_v3, %v1130_v2  ;;  %v6165_v7 = vpack.c.bf16 %v1137_v5, %v1135_v4  ;;  %v1614_v2 = vld [vmem:[#allocation7 + $0x420] sm:$0xff]  ;;  %v1616_v3 = vld [vmem:[#allocation7 + $0x430] sm:$0xff]  ;;  %v1619_v4 = vld [vmem:[#allocation7 + $0x448] sm:$0xff] }
 0x36f   : > { %v1257_v15 = vpop.f32.mrb[15].mxu1  ;;  %6134 = vmatprep.subr.bf16.mxu1 %v6133_v8  ;;  %v1134_v8 = vld [vmem:[#allocation7 + $0x160] sm:$0xff]  ;;  %v1621_v5 = vld [vmem:[#allocation7 + $0x458] sm:$0xff] }
 0x370   : > { %1407 = vmatprep.mubr.f32.mxu1 %v1257_v15  ;;  %v6167_v12 = vpack.c.bf16 %v1136_v9, %v1134_v8  ;;  %v1140_v15 = vld [vmem:[#allocation7 + $0x190] sm:$0xff]  ;;  %v6209_v8 = vpack.c.bf16 %v1621_v5, %v1619_v4  ;;  %v1618_v9 = vld [vmem:[#allocation7 + $0x440] sm:$0xff] }
 0x371   : > { %1408 = vmatmul.mubr.f32.gmra.mrb[22].mxu1 %v1255_v13  ;;  %v6169_v13 = vpack.c.bf16 %v1141_v11, %v1139_v10  ;;  %v1620_v10 = vld [vmem:[#allocation7 + $0x450] sm:$0xff]  ;;  %v1646_v5 = vld [vmem:[#allocation7 + $0x520] sm:$0xff] }
 0x372   : > { %6136 = vmatpush1.bf16.msra.mxu1 %v6135_v14  ;;  %1478 = vmatprep.mubr.f32.mxu1 %v1069_v42  ;;  %v1118_v42 = vld [vmem:[#allocation7 + $0xe0] sm:$0xff] }
 0x373   : > { %6138 = vmatprep.subr.bf16.mxu1 %v6137_v16  ;;  %v6151_v51 = vpack.c.bf16 %v1120_v47, %v1118_v42  ;;  %v1138_v14 = vld [vmem:[#allocation7 + $0x180] sm:$0xff]  ;;  %v1143_v16 = vld [vmem:[#allocation7 + $0x1a8] sm:$0xff] }
 0x374   : > { %v6171_v18 = vpack.c.bf16 %v1140_v15, %v1138_v14  ;;  %v6173_v20 = vpack.c.bf16 %v1145_v17, %v1143_v16  ;;  %v1622_v15 = vld [vmem:[#allocation7 + $0x460] sm:$0xff]  ;;  %v1624_v16 = vld [vmem:[#allocation7 + $0x470] sm:$0xff] }
 0x376   : > { %6140 = vmatpush1.bf16.msra.mxu1 %v6139_v21  ;;  %v1142_v21 = vld [vmem:[#allocation7 + $0x1a0] sm:$0xff] }
 0x377   : > { %6142 = vmatprep.subr.bf16.mxu1 %v6141_v22  ;;  %v1144_v22 = vld [vmem:[#allocation7 + $0x1b0] sm:$0xff] }
 0x378   : > { %v6175_v32 = vpack.c.bf16 %v1144_v22, %v1142_v21  ;;  %v1626_v22 = vld [vmem:[#allocation7 + $0x480] sm:$0xff] }
 0x37a   : > { %6144 = vmatpush1.bf16.msra.mxu1 %v6143_v33  ;;  %v8053_v33 = vpop.f32.mrb[20].mxu0 }
 0x37b   : > { %6146 = vmatprep.subr.bf16.mxu1 %v6145_v34  ;;  %v6177_v34 = vpack.c.bf16 %v1149_v28, %v1147_v25  ;;  %v8055_v37 = vpop.f32.mrb[21].mxu0  ;;  %v1628_v25 = vld [vmem:[#allocation7 + $0x490] sm:$0xff]  ;;  %v1631_v28 = vld [vmem:[#allocation7 + $0x4a8] sm:$0xff] }
 0x37c   : > { %v8057_v42 = vpop.f32.mrb[22].mxu0 }
 0x37e   : > { %6148 = vmatpush1.bf16.msra.mxu1 %v6147_v39  ;;  %v1153_v39 = vld [vmem:[#allocation7 + $0x1f8] sm:$0xff] }
 0x37f   : > { %6150 = vmatprep.subr.bf16.mxu1 %v6149_v40  ;;  %v6179_v40 = vpack.c.bf16 %v1148_v36, %v1146_v35  ;;  %v6181_v47 = vpack.c.bf16 %v1153_v39, %v1151_v38  ;;  %v1630_v35 = vld [vmem:[#allocation7 + $0x4a0] sm:$0xff]  ;;  %v1632_v36 = vld [vmem:[#allocation7 + $0x4b0] sm:$0xff]  ;;  %v1635_v38 = vld [vmem:[#allocation7 + $0x4c8] sm:$0xff] }
 0x380   : > { %v6223_v39 = vpack.c.bf16 %v1632_v36, %v1630_v35  ;;  %v1665_v35 = vld [vmem:[#allocation7 + $0x5b8] sm:$0xff] }
 0x382   : > { %6152 = vmatpush1.bf16.msra.mxu1 %v6151_v51  ;;  %v8059_v51 = vpop.f32.mrb[23].mxu0 }
 0x383   : > { %6154 = vmatprep.subr.bf16.mxu1 %v6153_v52  ;;  %v1611_v52 = vld [vmem:[#allocation7 + $0x408] sm:$0xff]  ;;  %v8061_v56 = vpop.f32.mrb[24].mxu0 }
 0x384   : > { %v6201_v57 = vpack.c.bf16 %v1613_v53, %v1611_v52  ;;  %v8063_v60 = vpop.f32.mrb[25].mxu0  ;;  %v1641_v52 = vld [vmem:[#allocation7 + $0x4f8] sm:$0xff] }
 0x385   : > { %v6229_v53 = vpack.c.bf16 %v1641_v52, %v1639_v50  ;;  %v1666_v52 = vld [vmem:[#allocation7 + $0x5c0] sm:$0xff] }
 0x386   : > { %6156 = vmatpush1.bf16.msra.mxu1 %v6155_v58  ;;  %v1610_v58 = vld [vmem:[#allocation7 + $0x400] sm:$0xff] }
 0x387   : > { %6158 = vmatprep.subr.bf16.mxu1 %v6157_v59  ;;  %v1612_v59 = vld [vmem:[#allocation7 + $0x410] sm:$0xff] }
 0x388   : > { %v6203_v63 = vpack.c.bf16 %v1612_v59, %v1610_v58  ;;  %v1645_v58 = vld [vmem:[#allocation7 + $0x518] sm:$0xff] }
 0x38a   : > { %6160 = vmatpush1.bf16.msra.mxu1 %v6159_v0  ;;  %v8065_v0 = vpop.f32.mrb[26].mxu0 }
 0x38b   : > { %6162 = vmatprep.subr.bf16.mxu1 %v6161_v1  ;;  %v6205_v1 = vpack.c.bf16 %v1617_v62, %v1615_v61  ;;  %v1642_v62 = vld [vmem:[#allocation7 + $0x500] sm:$0xff] }
 0x38e   : > { %6164 = vmatpush1.bf16.msra.mxu1 %v6163_v6  ;;  %v8068_v6 = vpop.f32.mrb[27].mxu0 }
 0x38f   : > { %6166 = vmatprep.subr.bf16.mxu1 %v6165_v7  ;;  %v6207_v7 = vpack.c.bf16 %v1616_v3, %v1614_v2  ;;  %v8071_v11 = vpop.f32.mrb[28].mxu0  ;;  %v1649_v2 = vld [vmem:[#allocation7 + $0x538] sm:$0xff] }
 0x390   : > { %v8074_v14 = vpop.f32.mrb[29].mxu0 }
 0x391   : > { %v8077_v17 = vpop.f32.mrb[30].mxu0 }
 0x392   : > { %6168 = vmatpush1.bf16.msra.mxu1 %v6167_v12  ;;  %v1623_v12 = vld [vmem:[#allocation7 + $0x468] sm:$0xff]  ;;  %v8080_v21 = vpop.f32.mrb[31].mxu0 }
 0x393   : > { %6170 = vmatprep.subr.bf16.mxu1 %v6169_v13  ;;  %v1625_v13 = vld [vmem:[#allocation7 + $0x478] sm:$0xff] }
 0x396   : > { %6172 = vmatpush1.bf16.msra.mxu1 %v6171_v18  ;;  %v1627_v18 = vld [vmem:[#allocation7 + $0x488] sm:$0xff] }
 0x397   : > { %6174 = vmatprep.subr.bf16.mxu1 %v6173_v20  ;;  %v1629_v20 = vld [vmem:[#allocation7 + $0x498] sm:$0xff] }
 0x39a   : > { %6176 = vmatpush1.bf16.msra.mxu1 %v6175_v32  ;;  %v1633_v32 = vld [vmem:[#allocation7 + $0x4b8] sm:$0xff] }
 0x39b   : > { %6178 = vmatprep.subr.bf16.mxu1 %v6177_v34  ;;  %v6219_v34 = vpack.c.bf16 %v1628_v25, %v1626_v22  ;;  %v1661_v22 = vld [vmem:[#allocation7 + $0x598] sm:$0xff] }
 0x39e   : > { %6180 = vmatpush1.bf16.msra.mxu1 %v6179_v40 }
 0x39f   : > { %6182 = vmatprep.subr.bf16.mxu1 %v6181_v47  ;;  %v1634_v47 = vld [vmem:[#allocation7 + $0x4c0] sm:$0xff] }
 0x3a2   : > { %6184 = vmatpush1.bf16.msra.mxu1 %v6183_v55  ;;  %v1638_v55 = vld [vmem:[#allocation7 + $0x4e0] sm:$0xff] }
 0x3a3   : > { %6202 = vmatprep.subr.bf16.mxu1 %v6201_v57  ;;  %v1643_v57 = vld [vmem:[#allocation7 + $0x508] sm:$0xff] }
 0x3a4   : > { %v6233_v61 = vpack.c.bf16 %v1645_v58, %v1643_v57  ;;  %v1670_v58 = vld [vmem:[#allocation7 + $0x5e0] sm:$0xff] }
 0x3a5   : > { %1479 = vmatmul.mubr.f32.vlgmr.msra.gmra.mrb[16].mxu1 %v8031_v41  ;;  %v6211_v41 = vpack.c.bf16 %v1620_v10, %v1618_v9  ;;  %v1653_v9 = vld [vmem:[#allocation7 + $0x558] sm:$0xff] }
 0x3a6   : > { %1484 = vmatprep.mubr.f32.mxu1 %v8035_v44  ;;  %6204 = vmatpush1.bf16.msra.mxu1 %v6203_v63  ;;  %v6213_v44 = vpack.c.bf16 %v1625_v13, %v1623_v12  ;;  %v1644_v63 = vld [vmem:[#allocation7 + $0x510] sm:$0xff]  ;;  %v1650_v13 = vld [vmem:[#allocation7 + $0x540] sm:$0xff] }
 0x3a7   : > { %6206 = vmatprep.subr.bf16.mxu1 %v6205_v1  ;;  %v1647_v1 = vld [vmem:[#allocation7 + $0x528] sm:$0xff]  ;;  %v6235_v3 = vpack.c.bf16 %v1644_v63, %v1642_v62  ;;  %v1881_v62 = vld [vmem:[#allocation7 + $0x618] sm:$0xff] }
 0x3a8   : > { %v6237_v4 = vpack.c.bf16 %v1649_v2, %v1647_v1  ;;  %v1878_v2 = vld [vmem:[#allocation7 + $0x600] sm:$0xff] }
 0x3a9   : > { %1485 = vmatmul.mubr.f32.gmra.mrb[18].mxu1 %v8033_v43  ;;  %v6215_v43 = vpack.c.bf16 %v1624_v16, %v1622_v15  ;;  %v1657_v15 = vld [vmem:[#allocation7 + $0x578] sm:$0xff] }
 0x3aa   : > { %1490 = vmatprep.mubr.f32.mxu1 %v8039_v45  ;;  %6208 = vmatpush1.bf16.msra.mxu1 %v6207_v7  ;;  %v6217_v45 = vpack.c.bf16 %v1629_v20, %v1627_v18  ;;  %v1648_v7 = vld [vmem:[#allocation7 + $0x530] sm:$0xff]  ;;  %v1654_v20 = vld [vmem:[#allocation7 + $0x560] sm:$0xff] }
 0x3ab   : > { %6210 = vmatprep.subr.bf16.mxu1 %v6209_v8  ;;  %v1651_v8 = vld [vmem:[#allocation7 + $0x548] sm:$0xff]  ;;  %v6239_v10 = vpack.c.bf16 %v1648_v7, %v1646_v5  ;;  %v1885_v5 = vld [vmem:[#allocation7 + $0x638] sm:$0xff] }
 0x3ac   : > { %v6241_v12 = vpack.c.bf16 %v1653_v9, %v1651_v8  ;;  %v1882_v9 = vld [vmem:[#allocation7 + $0x620] sm:$0xff] }
 0x3ad   : > { %1491 = vmatmul.mubr.f32.gmra.mrb[20].mxu1 %v8037_v30  ;;  %v6221_v30 = vpack.c.bf16 %v1633_v32, %v1631_v28  ;;  %v1658_v32 = vld [vmem:[#allocation7 + $0x580] sm:$0xff] }
 0x3ae   : > { %1496 = vmatprep.mubr.f32.mxu1 %v8043_v31  ;;  %6212 = vmatpush1.bf16.msra.mxu1 %v6211_v41  ;;  %v1637_v31 = vld [vmem:[#allocation7 + $0x4d8] sm:$0xff]  ;;  %v1652_v41 = vld [vmem:[#allocation7 + $0x550] sm:$0xff] }
 0x3af   : > { %6214 = vmatprep.subr.bf16.mxu1 %v6213_v44  ;;  %v6225_v40 = vpack.c.bf16 %v1637_v31, %v1635_v38  ;;  %v1655_v44 = vld [vmem:[#allocation7 + $0x568] sm:$0xff]  ;;  %v6243_v16 = vpack.c.bf16 %v1652_v41, %v1650_v13  ;;  %v1662_v31 = vld [vmem:[#allocation7 + $0x5a0] sm:$0xff]  ;;  %v1889_v13 = vld [vmem:[#allocation7 + $0x658] sm:$0xff] }
 0x3b0   : > { %v6245_v18 = vpack.c.bf16 %v1657_v15, %v1655_v44  ;;  %v1886_v15 = vld [vmem:[#allocation7 + $0x640] sm:$0xff] }
 0x3b1   : > { %1497 = vmatmul.mubr.f32.gmra.mrb[22].mxu1 %v8041_v46  ;;  %v6227_v46 = vpack.c.bf16 %v1636_v48, %v1634_v47  ;;  %v1669_v47 = vld [vmem:[#allocation7 + $0x5d8] sm:$0xff] }
 0x3b2   : > { %6216 = vmatpush1.bf16.msra.mxu1 %v6215_v43  ;;  %1738 = vmatprep.mubr.f32.mxu1 %v8047_v54  ;;  %v1640_v54 = vld [vmem:[#allocation7 + $0x4f0] sm:$0xff] }
 0x3b3   : > { %6218 = vmatprep.subr.bf16.mxu1 %v6217_v45  ;;  %v6231_v59 = vpack.c.bf16 %v1640_v54, %v1638_v55  ;;  %v1656_v43 = vld [vmem:[#allocation7 + $0x570] sm:$0xff]  ;;  %v1659_v45 = vld [vmem:[#allocation7 + $0x588] sm:$0xff]  ;;  %v1673_v55 = vld [vmem:[#allocation7 + $0x5f8] sm:$0xff] }
 0x3b4   : > { %v6247_v25 = vpack.c.bf16 %v1656_v43, %v1654_v20  ;;  %v6249_v28 = vpack.c.bf16 %v1661_v22, %v1659_v45  ;;  %v1893_v20 = vld [vmem:[#allocation7 + $0x678] sm:$0xff]  ;;  %v1890_v22 = vld [vmem:[#allocation7 + $0x660] sm:$0xff] }
 0x3b6   : > { %6220 = vmatpush1.bf16.msra.mxu1 %v6219_v34  ;;  %v1660_v34 = vld [vmem:[#allocation7 + $0x590] sm:$0xff] }
 0x3b7   : > { %6222 = vmatprep.subr.bf16.mxu1 %v6221_v30  ;;  %v1663_v30 = vld [vmem:[#allocation7 + $0x5a8] sm:$0xff]  ;;  %v6251_v36 = vpack.c.bf16 %v1660_v34, %v1658_v32  ;;  %v1894_v34 = vld [vmem:[#allocation7 + $0x680] sm:$0xff] }
 0x3b8   : > { %v6253_v38 = vpack.c.bf16 %v1665_v35, %v1663_v30  ;;  %v1899_v30 = vld [vmem:[#allocation7 + $0x6a8] sm:$0xff]  ;;  %v1901_v35 = vld [vmem:[#allocation7 + $0x6b8] sm:$0xff] }
 0x3ba   : > { %6224 = vmatpush1.bf16.msra.mxu1 %v6223_v39  ;;  %v1664_v39 = vld [vmem:[#allocation7 + $0x5b0] sm:$0xff] }
 0x3bb   : > { %6226 = vmatprep.subr.bf16.mxu1 %v6225_v40  ;;  %v1667_v40 = vld [vmem:[#allocation7 + $0x5c8] sm:$0xff]  ;;  %v6255_v48 = vpack.c.bf16 %v1664_v39, %v1662_v31  ;;  %v1905_v39 = vld [vmem:[#allocation7 + $0x6d8] sm:$0xff] }
 0x3bc   : > { %v6257_v50 = vpack.c.bf16 %v1669_v47, %v1667_v40  ;;  %v1903_v31 = vld [vmem:[#allocation7 + $0x6c8] sm:$0xff]  ;;  %v1902_v47 = vld [vmem:[#allocation7 + $0x6c0] sm:$0xff] }
 0x3bd   : > { %v6305_v40 = vpack.c.bf16 %v1905_v39, %v1903_v31  ;;  %v1936_v31 = vld [vmem:[#allocation7 + $0x7d0] sm:$0xff]  ;;  %v1939_v39 = vld [vmem:[#allocation7 + $0x7e8] sm:$0xff] }
 0x3be   : > { %6228 = vmatpush1.bf16.msra.mxu1 %v6227_v46  ;;  %v1668_v46 = vld [vmem:[#allocation7 + $0x5d0] sm:$0xff] }
 0x3bf   : > { %6230 = vmatprep.subr.bf16.mxu1 %v6229_v53  ;;  %v1671_v53 = vld [vmem:[#allocation7 + $0x5e8] sm:$0xff]  ;;  %v6259_v54 = vpack.c.bf16 %v1668_v46, %v1666_v52  ;;  %v1909_v52 = vld [vmem:[#allocation7 + $0x6f8] sm:$0xff] }
 0x3c0   : > { %v6261_v57 = vpack.c.bf16 %v1673_v55, %v1671_v53  ;;  %v1906_v53 = vld [vmem:[#allocation7 + $0x6e0] sm:$0xff]  ;;  %v1911_v55 = vld [vmem:[#allocation7 + $0x708] sm:$0xff] }
 0x3c2   : > { %6232 = vmatpush1.bf16.msra.mxu1 %v6231_v59  ;;  %v1672_v59 = vld [vmem:[#allocation7 + $0x5f0] sm:$0xff] }
 0x3c3   : > { %6234 = vmatprep.subr.bf16.mxu1 %v6233_v61  ;;  %v1879_v61 = vld [vmem:[#allocation7 + $0x608] sm:$0xff]  ;;  %v6263_v63 = vpack.c.bf16 %v1672_v59, %v1670_v58  ;;  %v1910_v59 = vld [vmem:[#allocation7 + $0x700] sm:$0xff] }
 0x3c4   : > { %v6281_v1 = vpack.c.bf16 %v1881_v62, %v1879_v61  ;;  %v1912_v61 = vld [vmem:[#allocation7 + $0x710] sm:$0xff]  ;;  %v1915_v62 = vld [vmem:[#allocation7 + $0x728] sm:$0xff] }
 0x3c6   : > { %6236 = vmatpush1.bf16.msra.mxu1 %v6235_v3  ;;  %v1880_v3 = vld [vmem:[#allocation7 + $0x610] sm:$0xff] }
 0x3c7   : > { %6238 = vmatprep.subr.bf16.mxu1 %v6237_v4  ;;  %v1883_v4 = vld [vmem:[#allocation7 + $0x628] sm:$0xff]  ;;  %v6283_v7 = vpack.c.bf16 %v1880_v3, %v1878_v2  ;;  %v1914_v3 = vld [vmem:[#allocation7 + $0x720] sm:$0xff] }
 0x3c8   : > { %v6285_v8 = vpack.c.bf16 %v1885_v5, %v1883_v4  ;;  %v1916_v4 = vld [vmem:[#allocation7 + $0x730] sm:$0xff]  ;;  %v1919_v5 = vld [vmem:[#allocation7 + $0x748] sm:$0xff] }
 0x3ca   : > { %6240 = vmatpush1.bf16.msra.mxu1 %v6239_v10  ;;  %v1884_v10 = vld [vmem:[#allocation7 + $0x630] sm:$0xff] }
 0x3cb   : > { %6242 = vmatprep.subr.bf16.mxu1 %v6241_v12  ;;  %v1887_v12 = vld [vmem:[#allocation7 + $0x648] sm:$0xff]  ;;  %v6287_v41 = vpack.c.bf16 %v1884_v10, %v1882_v9  ;;  %v1918_v10 = vld [vmem:[#allocation7 + $0x740] sm:$0xff] }
 0x3cc   : > { %v6289_v44 = vpack.c.bf16 %v1889_v13, %v1887_v12  ;;  %v1920_v12 = vld [vmem:[#allocation7 + $0x750] sm:$0xff]  ;;  %v1923_v13 = vld [vmem:[#allocation7 + $0x768] sm:$0xff] }
 0x3ce   : > { %6244 = vmatpush1.bf16.msra.mxu1 %v6243_v16  ;;  %v1888_v16 = vld [vmem:[#allocation7 + $0x650] sm:$0xff] }
 0x3cf   : > { %6246 = vmatprep.subr.bf16.mxu1 %v6245_v18  ;;  %v1891_v18 = vld [vmem:[#allocation7 + $0x668] sm:$0xff]  ;;  %v6291_v43 = vpack.c.bf16 %v1888_v16, %v1886_v15  ;;  %v1922_v16 = vld [vmem:[#allocation7 + $0x760] sm:$0xff] }
 0x3d0   : > { %v6293_v45 = vpack.c.bf16 %v1893_v20, %v1891_v18  ;;  %v1924_v18 = vld [vmem:[#allocation7 + $0x770] sm:$0xff]  ;;  %v1927_v20 = vld [vmem:[#allocation7 + $0x788] sm:$0xff] }
 0x3d2   : > { %6248 = vmatpush1.bf16.msra.mxu1 %v6247_v25  ;;  %v1895_v25 = vld [vmem:[#allocation7 + $0x688] sm:$0xff] }
 0x3d3   : > { %6250 = vmatprep.subr.bf16.mxu1 %v6249_v28  ;;  %v1897_v28 = vld [vmem:[#allocation7 + $0x698] sm:$0xff] }
 0x3d4   : > { %v6297_v32 = vpack.c.bf16 %v1897_v28, %v1895_v25  ;;  %v1928_v25 = vld [vmem:[#allocation7 + $0x790] sm:$0xff]  ;;  %v1931_v28 = vld [vmem:[#allocation7 + $0x7a8] sm:$0xff] }
 0x3d6   : > { %6252 = vmatpush1.bf16.msra.mxu1 %v6251_v36  ;;  %v6301_v36 = vpack.c.bf16 %v1901_v35, %v1899_v30  ;;  %v1932_v30 = vld [vmem:[#allocation7 + $0x7b0] sm:$0xff]  ;;  %v1935_v35 = vld [vmem:[#allocation7 + $0x7c8] sm:$0xff] }
 0x3d7   : > { %6254 = vmatprep.subr.bf16.mxu1 %v6253_v38  ;;  %v1898_v38 = vld [vmem:[#allocation7 + $0x6a0] sm:$0xff] }
 0x3da   : > { %6256 = vmatpush1.bf16.msra.mxu1 %v6255_v48  ;;  %v1904_v48 = vld [vmem:[#allocation7 + $0x6d0] sm:$0xff] }
 0x3db   : > { %6258 = vmatprep.subr.bf16.mxu1 %v6257_v50  ;;  %v1907_v50 = vld [vmem:[#allocation7 + $0x6e8] sm:$0xff] }
 0x3dc   : > { %v6309_v46 = vpack.c.bf16 %v1909_v52, %v1907_v50  ;;  %v1940_v50 = vld [vmem:[#allocation7 + $0x7f0] sm:$0xff] }
 0x3de   : > { %6260 = vmatpush1.bf16.msra.mxu1 %v6259_v54  ;;  %v1913_v54 = vld [vmem:[#allocation7 + $0x718] sm:$0xff] }
 0x3df   : > { %6262 = vmatprep.subr.bf16.mxu1 %v6261_v57  ;;  %v6313_v58 = vpack.c.bf16 %v1913_v54, %v1911_v55 }
 0x3e2   : > { %6264 = vmatpush1.bf16.msra.mxu1 %v6263_v63  ;;  %v1917_v63 = vld [vmem:[#allocation7 + $0x738] sm:$0xff] }
 0x3e3   : > { %6282 = vmatprep.subr.bf16.mxu1 %v6281_v1  ;;  %v6315_v1 = vpack.c.bf16 %v1912_v61, %v1910_v59  ;;  %v6317_v2 = vpack.c.bf16 %v1917_v63, %v1915_v62 }
 0x3e5   : > { %1739 = vmatmul.mubr.f32.vlgmr.msra.gmra.mrb[16].mxu1 %v8045_v49  ;;  %v1892_v49 = vld [vmem:[#allocation7 + $0x670] sm:$0xff] }
 0x3e6   : > { %6284 = vmatpush1.bf16.msra.mxu1 %v6283_v7  ;;  %1744 = vmatprep.mubr.f32.mxu1 %v8051_v23  ;;  %v6295_v23 = vpack.c.bf16 %v1892_v49, %v1890_v22  ;;  %v1921_v7 = vld [vmem:[#allocation7 + $0x758] sm:$0xff]  ;;  %v1926_v49 = vld [vmem:[#allocation7 + $0x780] sm:$0xff] }
 0x3e7   : > { %6286 = vmatprep.subr.bf16.mxu1 %v6285_v8  ;;  %v6319_v8 = vpack.c.bf16 %v1916_v4, %v1914_v3  ;;  %v6321_v9 = vpack.c.bf16 %v1921_v7, %v1919_v5 }
 0x3e9   : > { %1745 = vmatmul.mubr.f32.gmra.mrb[18].mxu1 %v8049_v19  ;;  %v1896_v19 = vld [vmem:[#allocation7 + $0x690] sm:$0xff] }
 0x3ea   : > { %6288 = vmatpush1.bf16.msra.mxu1 %v6287_v41  ;;  %1750 = vmatprep.mubr.f32.mxu1 %v8055_v37  ;;  %v6299_v37 = vpack.c.bf16 %v1896_v19, %v1894_v34  ;;  %v1925_v41 = vld [vmem:[#allocation7 + $0x778] sm:$0xff]  ;;  %v1930_v19 = vld [vmem:[#allocation7 + $0x7a0] sm:$0xff] }
 0x3eb   : > { %6290 = vmatprep.subr.bf16.mxu1 %v6289_v44  ;;  %v6323_v44 = vpack.c.bf16 %v1920_v12, %v1918_v10  ;;  %v6325_v15 = vpack.c.bf16 %v1925_v41, %v1923_v13 }
 0x3ed   : > { %1751 = vmatmul.mubr.f32.gmra.mrb[20].mxu1 %v8053_v33  ;;  %v1900_v33 = vld [vmem:[#allocation7 + $0x6b0] sm:$0xff] }
 0x3ee   : > { %6292 = vmatpush1.bf16.msra.mxu1 %v6291_v43  ;;  %1756 = vmatprep.mubr.f32.mxu1 %v8059_v51  ;;  %v6303_v51 = vpack.c.bf16 %v1900_v33, %v1898_v38  ;;  %v1929_v43 = vld [vmem:[#allocation7 + $0x798] sm:$0xff]  ;;  %v1934_v33 = vld [vmem:[#allocation7 + $0x7c0] sm:$0xff] }
 0x3ef   : > { %6294 = vmatprep.subr.bf16.mxu1 %v6293_v45  ;;  %v6327_v45 = vpack.c.bf16 %v1924_v18, %v1922_v16  ;;  %v6329_v22 = vpack.c.bf16 %v1929_v43, %v1927_v20  ;;  %v2083_v43 = vld [vmem:[#allocation10] sm:$0xff] }
 0x3f1   : > { %1757 = vmatmul.mubr.f32.gmra.mrb[22].mxu1 %v8057_v42  ;;  %v6307_v42 = vpack.c.bf16 %v1904_v48, %v1902_v47  ;;  %v1938_v48 = vld [vmem:[#allocation7 + $0x7e0] sm:$0xff] }
 0x3f2   : > { %6296 = vmatpush1.bf16.msra.mxu1 %v6295_v23  ;;  %2006 = vmatprep.mubr.f32.mxu1 %v8063_v60  ;;  %v1908_v60 = vld [vmem:[#allocation7 + $0x6f0] sm:$0xff]  ;;  %v1933_v23 = vld [vmem:[#allocation7 + $0x7b8] sm:$0xff]  ;;  %v6343_v52 = vpack.c.bf16 %v1940_v50, %v1938_v48 }
 0x3f3   : > { %6298 = vmatprep.subr.bf16.mxu1 %v6297_v32  ;;  %v6311_v57 = vpack.c.bf16 %v1908_v60, %v1906_v53  ;;  %v6331_v32 = vpack.c.bf16 %v1928_v25, %v1926_v49  ;;  %v6333_v34 = vpack.c.bf16 %v1933_v23, %v1931_v28  ;;  %v2084_v49 = vld [vmem:[#allocation10 + $0x8] sm:$0xff]  ;;  %v5065_v28 = vld [vmem:[%s8813_s7 + $0x100] sm:$0xff]  ;;  %v5088_v50 = vld [vmem:[%s8813_s7 + $0x1b8] sm:$0xff] }
 0x3f4   : > { %v5066_v23 = vld [vmem:[%s8813_s7 + $0x108] sm:$0xff]  ;;  %v5087_v48 = vld [vmem:[%s8813_s7 + $0x1b0] sm:$0xff] }
 0x3f6   : > { %6300 = vmatpush1.bf16.msra.mxu1 %v6299_v37  ;;  %v1937_v37 = vld [vmem:[#allocation7 + $0x7d8] sm:$0xff] }
 0x3f7   : > { %6302 = vmatprep.subr.bf16.mxu1 %v6301_v36  ;;  %v6335_v36 = vpack.c.bf16 %v1932_v30, %v1930_v19  ;;  %v6337_v38 = vpack.c.bf16 %v1937_v37, %v1935_v35  ;;  %v2202_v19 = vld [vmem:[#allocation10 + $0x10] sm:$0xff]  ;;  %v6363_v30 = vpack.c.bf16 %v5066_v23, %v5065_v28 }
 0x3f8   : > { %v5067_v37 = vld [vmem:[%s8813_s7 + $0x110] sm:$0xff] }
 0x3fa   : > { %6304 = vmatpush1.bf16.msra.mxu1 %v6303_v51  ;;  %v1941_v51 = vld [vmem:[#allocation7 + $0x7f8] sm:$0xff] }
 0x3fb   : > { %6306 = vmatprep.subr.bf16.mxu1 %v6305_v40  ;;  %v6339_v40 = vpack.c.bf16 %v1936_v31, %v1934_v33  ;;  %v6341_v47 = vpack.c.bf16 %v1941_v51, %v1939_v39  ;;  %v5086_v33 = vld [vmem:[%s8813_s7 + $0x1a8] sm:$0xff]  ;;  %v2203_v31 = vld [vmem:[#allocation10 + $0x18] sm:$0xff] }
 0x3fe   : > { %6308 = vmatpush1.bf16.msra.mxu1 %v6307_v42  ;;  %v2039_v42 = vld [vmem:[#allocation8] sm:$0x3] }
 0x3ff   : > { %6310 = vmatprep.subr.bf16.mxu1 %v6309_v46  ;;  %v2044_v46 = vrot.slane %v2039_v42, %v791_v27  ;;  %v2048_v53 = vrot.slane %v2039_v42, %v795_v29  ;;  %v6373_v42 = vpack.c.bf16 %v5088_v50, %v5087_v48  ;;  %v2175_v50 = vld [vmem:[%s8813_s7 + $0x30] sm:$0xff] }
 0x402   : > { %6312 = vmatpush1.bf16.msra.mxu1 %v6311_v57 }
 0x403   : > { %6314 = vmatprep.subr.bf16.mxu1 %v6313_v58 }
 0x406   : > { %6316 = vmatpush1.bf16.msra.mxu1 %v6315_v1 }
 0x407   : > { %6318 = vmatprep.subr.bf16.mxu1 %v6317_v2 }
 0x40a   : > { %6320 = vmatpush1.bf16.msra.mxu1 %v6319_v8 }
 0x40b   : > { %6322 = vmatprep.subr.bf16.mxu1 %v6321_v9 }
 0x40e   : > { %6324 = vmatpush1.bf16.msra.mxu1 %v6323_v44 }
 0x40f   : > { %6326 = vmatprep.subr.bf16.mxu1 %v6325_v15 }
 0x412   : > { %6328 = vmatpush1.bf16.msra.mxu1 %v6327_v45  ;;  %v5081_v45 = vld [vmem:[%s8813_s7 + $0x180] sm:$0xff] }
 0x413   : > { %6330 = vmatprep.subr.bf16.mxu1 %v6329_v22  ;;  %v5082_v22 = vld [vmem:[%s8813_s7 + $0x188] sm:$0xff] }
 0x414   : > { %v6361_v25 = vpack.c.bf16 %v5082_v22, %v5081_v45  ;;  %v2170_v45 = vld [vmem:[%s8813_s7 + $0x8] sm:$0xff]  ;;  %v2187_v22 = vld [vmem:[%s8813_s7 + $0x90] sm:$0xff] }
 0x416   : > { %6332 = vmatpush1.bf16.msra.mxu1 %v6331_v32  ;;  %v5083_v32 = vld [vmem:[%s8813_s7 + $0x190] sm:$0xff] }
 0x417   : > { %6334 = vmatprep.subr.bf16.mxu1 %v6333_v34  ;;  %v5084_v34 = vld [vmem:[%s8813_s7 + $0x198] sm:$0xff] }
 0x418   : > { %v6365_v35 = vpack.c.bf16 %v5084_v34, %v5083_v32  ;;  %v2171_v34 = vld [vmem:[%s8813_s7 + $0x10] sm:$0xff] }
 0x41a   : > { %6336 = vmatpush1.bf16.msra.mxu1 %v6335_v36  ;;  %v5068_v36 = vld [vmem:[%s8813_s7 + $0x118] sm:$0xff] }
 0x41b   : > { %6338 = vmatprep.subr.bf16.mxu1 %v6337_v38  ;;  %v5085_v38 = vld [vmem:[%s8813_s7 + $0x1a0] sm:$0xff]  ;;  %v6367_v39 = vpack.c.bf16 %v5068_v36, %v5067_v37 }
 0x41c   : > { %v6369_v51 = vpack.c.bf16 %v5086_v33, %v5085_v38 }
 0x41e   : > { %6340 = vmatpush1.bf16.msra.mxu1 %v6339_v40  ;;  %v5069_v40 = vld [vmem:[%s8813_s7 + $0x120] sm:$0xff] }
 0x41f   : > { %6342 = vmatprep.subr.bf16.mxu1 %v6341_v47  ;;  %v5070_v47 = vld [vmem:[%s8813_s7 + $0x128] sm:$0xff] }
 0x422   : > { %6344 = vmatpush1.bf16.msra.mxu1 %v6343_v52  ;;  %v6371_v52 = vpack.c.bf16 %v5070_v47, %v5069_v40  ;;  %v2192_v40 = vld [vmem:[%s8813_s7 + $0xb8] sm:$0xff] }
 0x425   : > { %2007 = vmatmul.mubr.f32.vlgmr.msra.gmra.mrb[16].mxu1 %v8061_v56 }
 0x426   : > { %2012 = vmatprep.mubr.f32.mxu1 %v8068_v6 }
 0x429   : > { %2013 = vmatmul.mubr.f32.gmra.mrb[18].mxu1 %v8065_v0 }
 0x42a   : > { %2018 = vmatprep.mubr.f32.mxu1 %v8074_v14 }
 0x42d   : > { %2019 = vmatmul.mubr.f32.gmra.mrb[20].mxu1 %v8071_v11 }
 0x42e   : > { %2024 = vmatprep.mubr.f32.mxu1 %v8080_v21 }
 0x431   : > { %2025 = vmatmul.mubr.f32.gmra.mrb[22].mxu1 %v8077_v17 }
 0x432   : > { %5634 = vmatprep.mubr.msk.f32.mxu1 %vm7351_vm11, %v7349_v24 }
 0x4f8   : > { %v2008_v56 = vpop.f32.mrb[16].mxu1 }
 0x4f9   : > { %v2051_v60 = vadd.f32 %v2044_v46, %v2008_v56  ;;  %v2010_v6 = vpop.f32.mrb[17].mxu1  ;;  %v5089_v56 = vld [vmem:[%s8813_s7 + $0x1c0] sm:$0xff] }
 0x4fa   : > { %v2052_v55 = vadd.f32 %v2048_v53, %v2010_v6 }
 0x4fb   : > { %v2067_v54 = vmul.f32 0.2, %v2051_v60  ;;  %vm2059_vm2 = vcmp.gt.f32.partialorder %v2051_v60, 0.0 }
 0x4fc   : > { %v2014_v0 = vpop.f32.mrb[18].mxu1  ;;  %v2068_v11 = vmul.f32 0.2, %v2052_v55  ;;  %vm2060_vm3 = vcmp.gt.f32.partialorder %v2052_v55, 0.0 }
 0x4fd   : > { %v2053_v14 = vadd.f32 %v2044_v46, %v2014_v0  ;;  %v2016_v57 = vpop.f32.mrb[19].mxu1  ;;  %v2075_v59 = vsel %vm2059_vm2, %v2051_v60, %v2067_v54  ;;  %v5090_v60 = vld [vmem:[%s8813_s7 + $0x1c8] sm:$0xff]  ;;  %v5073_v0 = vld [vmem:[%s8813_s7 + $0x140] sm:$0xff] }
 0x4fe   : > { %v2054_v21 = vadd.f32 %v2048_v53, %v2016_v57  ;;  %v2076_v62 = vsel %vm2060_vm3, %v2052_v55, %v2068_v11  ;;  %v6377_v55 = vpack.c.bf16 %v5090_v60, %v5089_v56  ;;  %v5074_v54 = vld [vmem:[%s8813_s7 + $0x148] sm:$0xff]  ;;  %v5092_v57 = vld [vmem:[%s8813_s7 + $0x1d8] sm:$0xff]  ;;  %v2177_v60 = vld [vmem:[%s8813_s7 + $0x40] sm:$0xff]  ;;  %vm4202_vm3 = vcmask 1043456  }
 0x4ff   : > { %vm2061_vm4 = vcmp.gt.f32.partialorder %v2053_v14, 0.0  ;;  %v2069_v17 = vmul.f32 0.2, %v2053_v14  ;;  %v6379_v11 = vpack.c.bf16 %v5074_v54, %v5073_v0  ;;  %v2196_v0 = vld [vmem:[%s8813_s7 + $0xd8] sm:$0xff] }
 0x500   : > { %vm2062_vm5 = vcmp.gt.f32.partialorder %v2054_v21, 0.0  ;;  %v2070_v58 = vmul.f32 0.2, %v2054_v21  ;;  %v2020_v27 = vpop.f32.mrb[20].mxu1 }
 0x501   : > { %v2077_v26 = vsel %vm2061_vm4, %v2053_v14, %v2069_v17  ;;  %v2055_v29 = vadd.f32 %v2044_v46, %v2020_v27  ;;  %v2022_v61 = vpop.f32.mrb[21].mxu1  ;;  %v5091_v14 = vld [vmem:[%s8813_s7 + $0x1d0] sm:$0xff]  ;;  %vm4198_vm4 = vcmask 31744  }
 0x502   : > { %v8104_v63 = vpack.c.bf16 %v2077_v26, %v2075_v59  ;;  %v2078_v1 = vsel %vm2062_vm5, %v2054_v21, %v2070_v58  ;;  %v2056_v2 = vadd.f32 %v2048_v53, %v2022_v61  ;;  %v6381_v21 = vpack.c.bf16 %v5092_v57, %v5091_v14  ;;  %v5075_v17 = vld [vmem:[%s8813_s7 + $0x150] sm:$0xff]  ;;  %v5076_v58 = vld [vmem:[%s8813_s7 + $0x158] sm:$0xff]  ;;  %v5093_v59 = vld [vmem:[%s8813_s7 + $0x1e0] sm:$0xff] }
 0x503   : > { %v8106_v3 = vpack.c.bf16 %v2078_v1, %v2076_v62  ;;  %v2071_v5 = vmul.f32 0.2, %v2055_v29  ;;  %vm2063_vm6 = vcmp.gt.f32.partialorder %v2055_v29, 0.0  ;;  %v6383_v27 = vpack.c.bf16 %v5076_v58, %v5075_v17  ;;  %v5094_v26 = vld [vmem:[%s8813_s7 + $0x1e8] sm:$0xff]  ;;  %v5077_v61 = vld [vmem:[%s8813_s7 + $0x160] sm:$0xff]  ;;  %v2179_v57 = vld [vmem:[%s8813_s7 + $0x50] sm:$0xff] }
 0x504   : > { %v2026_v4 = vpop.f32.mrb[22].mxu1  ;;  %v2072_v9 = vmul.f32 0.2, %v2056_v2  ;;  %vm2064_vm7 = vcmp.gt.f32.partialorder %v2056_v2, 0.0  ;;  %v5078_v62 = vld [vmem:[%s8813_s7 + $0x168] sm:$0xff]  ;;  %vm4832_vm5 = vcmask 253952  }
 0x505   : > { %v2057_v7 = vadd.f32 %v2044_v46, %v2026_v4  ;;  %v2028_v8 = vpop.f32.mrb[23].mxu1  ;;  %6346 = vmatprep.subr.bf16.mxu0 %v8106_v3  ;;  %v2079_v41 = vsel %vm2063_vm6, %v2055_v29, %v2071_v5  ;;  %v5071_v46 = vld [vmem:[%s8813_s7 + $0x130] sm:$0xff]  ;;  %v6385_v29 = vpack.c.bf16 %v5094_v26, %v5093_v59  ;;  %v6387_v1 = vpack.c.bf16 %v5078_v62, %v5077_v61  ;;  %v5096_v4 = vld [vmem:[%s8813_s7 + $0x1f8] sm:$0xff]  ;;  %v2198_v17 = vld [vmem:[%s8813_s7 + $0xe8] sm:$0xff] }
 0x506   : > { %v2058_v10 = vadd.f32 %v2048_v53, %v2028_v8  ;;  %6348 = vmatpush1.bf16.msra.mxu0 %v8104_v63  ;;  %v2080_v15 = vsel %vm2064_vm7, %v2056_v2, %v2072_v9  ;;  %v5072_v53 = vld [vmem:[%s8813_s7 + $0x138] sm:$0xff]  ;;  %v5095_v2 = vld [vmem:[%s8813_s7 + $0x1f0] sm:$0xff]  ;;  %v2181_v59 = vld [vmem:[%s8813_s7 + $0x60] sm:$0xff] }
 0x507   : > { %vm2065_vm8 = vcmp.gt.f32.partialorder %v2057_v7, 0.0  ;;  %v2073_v12 = vmul.f32 0.2, %v2057_v7  ;;  %v6375_v6 = vpack.c.bf16 %v5072_v53, %v5071_v46  ;;  %v6389_v5 = vpack.c.bf16 %v5096_v4, %v5095_v2  ;;  %v5080_v8 = vld [vmem:[%s8813_s7 + $0x178] sm:$0xff]  ;;  %v2194_v46 = vld [vmem:[%s8813_s7 + $0xc8] sm:$0xff]  ;;  %v2183_v2 = vld [vmem:[%s8813_s7 + $0x70] sm:$0xff] }
 0x508   : > { %vm2066_vm9 = vcmp.gt.f32.partialorder %v2058_v10, 0.0  ;;  %v2074_v13 = vmul.f32 0.2, %v2058_v10  ;;  %v2182_v26 = vld [vmem:[%s8813_s7 + $0x68] sm:$0xff]  ;;  %v2200_v61 = vld [vmem:[%s8813_s7 + $0xf8] sm:$0xff] }
 0x509   : > { %v2081_v44 = vsel %vm2065_vm8, %v2057_v7, %v2073_v12  ;;  %v5079_v7 = vld [vmem:[%s8813_s7 + $0x170] sm:$0xff]  ;;  %v2186_v12 = vld [vmem:[%s8813_s7 + $0x88] sm:$0xff]  ;;  %v6419_v62 = vpack.c.bf16 %v2182_v26, %v2181_v59  ;;  %v2184_v4 = vld [vmem:[%s8813_s7 + $0x78] sm:$0xff] }
 0x50a   : > { %v8110_v16 = vpack.c.bf16 %v2081_v44, %v2079_v41  ;;  %v2082_v18 = vsel %vm2066_vm9, %v2058_v10, %v2074_v13  ;;  %v6391_v9 = vpack.c.bf16 %v5080_v8, %v5079_v7  ;;  %v2185_v10 = vld [vmem:[%s8813_s7 + $0x80] sm:$0xff]  ;;  %v5116_v8 = vld [vmem:[%s8813_s7 + $0x288] sm:$0xff] }
 0x50b   : > { %v8112_v20 = vpack.c.bf16 %v2082_v18, %v2080_v15  ;;  %v6393_v13 = vpack.c.bf16 %v2186_v12, %v2185_v10  ;;  %v5115_v7 = vld [vmem:[%s8813_s7 + $0x280] sm:$0xff]  ;;  %v5100_v12 = vld [vmem:[%s8813_s7 + $0x208] sm:$0xff] }
 0x50c   : > { %v5099_v10 = vld [vmem:[%s8813_s7 + $0x200] sm:$0xff] }
 0x50d   : > { %6350 = vmatprep.subr.bf16.mxu0 %v8112_v20 }
 0x50e   : > { %6352 = vmatpush1.bf16.msra.mxu0 %v8110_v16 }
 0x50f   : > { %6354 = vmatprep.subr.bf16.mxu0 %v8106_v3 }
 0x511   : > { %5061 = vmatmul.mubr.msk.f32.vlgmr.msra.gmra.mrb[32].mxu0 %vm2085_vm10, %v2083_v43  ;;  %v2169_v43 = vld [vmem:[%s8813_s7] sm:$0xff] }
 0x512   : > { %6356 = vmatpush1.bf16.msra.mxu0 %v8104_v63  ;;  %2162 = vmatprep.mubr.f32.mxu0 %v7349_v24  ;;  %v6395_v28 = vpack.c.bf16 %v2170_v45, %v2169_v43  ;;  %v5101_v45 = vld [vmem:[%s8813_s7 + $0x210] sm:$0xff] }
 0x513   : > { %6358 = vmatprep.subr.bf16.mxu0 %v8112_v20 }
 0x515   : > { %5062 = vmatmul.mubr.msk.f32.gmra.mrb[34].mxu0 %vm2085_vm10, %v2084_v49  ;;  %v2188_v49 = vld [vmem:[%s8813_s7 + $0x98] sm:$0xff] }
 0x516   : > { %6360 = vmatpush1.bf16.msra.mxu0 %v8110_v16  ;;  %2274 = vmatprep.mubr.f32.mxu0 %v7349_v24  ;;  %v6397_v32 = vpack.c.bf16 %v2188_v49, %v2187_v22  ;;  %v5102_v22 = vld [vmem:[%s8813_s7 + $0x218] sm:$0xff]  ;;  %v5120_v49 = vld [vmem:[%s8813_s7 + $0x2a8] sm:$0xff] }
 0x517   : > { %6362 = vmatprep.subr.bf16.mxu0 %v6361_v25 }
 0x519   : > { %5063 = vmatmul.mubr.msk.f32.vlgmr.msra.gmra.mrb[36].mxu0 %vm2085_vm10, %v2202_v19  ;;  %v2172_v19 = vld [vmem:[%s8813_s7 + $0x18] sm:$0xff] }
 0x51a   : > { %2280 = vmatprep.mubr.f32.mxu0 %v7349_v24  ;;  %6364 = vmatpush3.bf16.msra.mxu0 %v6363_v30  ;;  %v2189_v30 = vld [vmem:[%s8813_s7 + $0xa0] sm:$0xff]  ;;  %v6399_v36 = vpack.c.bf16 %v2172_v19, %v2171_v34  ;;  %v5104_v34 = vld [vmem:[%s8813_s7 + $0x228] sm:$0xff]  ;;  %v5121_v19 = vld [vmem:[%s8813_s7 + $0x2b0] sm:$0xff] }
 0x51b   : > { %6366 = vmatprep.subr.bf16.mxu0 %v6365_v35  ;;  %v2190_v35 = vld [vmem:[%s8813_s7 + $0xa8] sm:$0xff] }
 0x51c   : > { %v6401_v33 = vpack.c.bf16 %v2190_v35, %v2189_v30  ;;  %v5122_v30 = vld [vmem:[%s8813_s7 + $0x2b8] sm:$0xff] }
 0x51d   : > { %5064 = vmatmul.mubr.msk.f32.gmra.mrb[38].mxu0 %vm2085_vm10, %v2203_v31  ;;  %v2173_v31 = vld [vmem:[%s8813_s7 + $0x20] sm:$0xff] }
 0x51e   : > { %6368 = vmatpush3.bf16.msra.mxu0 %v6367_v39  ;;  %v2174_v39 = vld [vmem:[%s8813_s7 + $0x28] sm:$0xff] }
 0x51f   : > { %6370 = vmatprep.subr.bf16.mxu0 %v6369_v51  ;;  %v2191_v51 = vld [vmem:[%s8813_s7 + $0xb0] sm:$0xff]  ;;  %v6403_v47 = vpack.c.bf16 %v2174_v39, %v2173_v31  ;;  %v5124_v31 = vld [vmem:[%s8813_s7 + $0x2c8] sm:$0xff] }
 0x520   : > { %v6405_v48 = vpack.c.bf16 %v2192_v40, %v2191_v51  ;;  %v5107_v40 = vld [vmem:[%s8813_s7 + $0x240] sm:$0xff] }
 0x522   : > { %6372 = vmatpush3.bf16.msra.mxu0 %v6371_v52  ;;  %v2176_v52 = vld [vmem:[%s8813_s7 + $0x38] sm:$0xff] }
 0x523   : > { %6374 = vmatprep.subr.bf16.mxu0 %v6373_v42  ;;  %v2193_v42 = vld [vmem:[%s8813_s7 + $0xc0] sm:$0xff]  ;;  %v6407_v53 = vpack.c.bf16 %v2176_v52, %v2175_v50  ;;  %v5126_v50 = vld [vmem:[%s8813_s7 + $0x2d8] sm:$0xff] }
 0x524   : > { %v6409_v56 = vpack.c.bf16 %v2194_v46, %v2193_v42  ;;  %v5109_v46 = vld [vmem:[%s8813_s7 + $0x250] sm:$0xff] }
 0x526   : > { %6376 = vmatpush3.bf16.msra.mxu0 %v6375_v6  ;;  %v2178_v6 = vld [vmem:[%s8813_s7 + $0x48] sm:$0xff] }
 0x527   : > { %6378 = vmatprep.subr.bf16.mxu0 %v6377_v55  ;;  %v2195_v55 = vld [vmem:[%s8813_s7 + $0xd0] sm:$0xff]  ;;  %v6411_v54 = vpack.c.bf16 %v2178_v6, %v2177_v60  ;;  %v5128_v60 = vld [vmem:[%s8813_s7 + $0x2e8] sm:$0xff] }
 0x528   : > { %v6413_v14 = vpack.c.bf16 %v2196_v0, %v2195_v55  ;;  %v5111_v0 = vld [vmem:[%s8813_s7 + $0x260] sm:$0xff] }
 0x52a   : > { %6380 = vmatpush3.bf16.msra.mxu0 %v6379_v11  ;;  %v2180_v11 = vld [vmem:[%s8813_s7 + $0x58] sm:$0xff] }
 0x52b   : > { %6382 = vmatprep.subr.bf16.mxu0 %v6381_v21  ;;  %v2197_v21 = vld [vmem:[%s8813_s7 + $0xe0] sm:$0xff]  ;;  %v6415_v58 = vpack.c.bf16 %v2180_v11, %v2179_v57  ;;  %v5130_v57 = vld [vmem:[%s8813_s7 + $0x2f8] sm:$0xff] }
 0x52e   : > { %6384 = vmatpush3.bf16.msra.mxu0 %v6383_v27  ;;  %v6417_v27 = vpack.c.bf16 %v2198_v17, %v2197_v21  ;;  %v5113_v17 = vld [vmem:[%s8813_s7 + $0x270] sm:$0xff] }
 0x52f   : > { %6386 = vmatprep.subr.bf16.mxu0 %v6385_v29  ;;  %v2199_v29 = vld [vmem:[%s8813_s7 + $0xf0] sm:$0xff] }
 0x532   : > { %6388 = vmatpush3.bf16.msra.mxu0 %v6387_v1  ;;  %v6421_v1 = vpack.c.bf16 %v2200_v61, %v2199_v29 }
 0x533   : > { %6390 = vmatprep.subr.bf16.mxu0 %v6389_v5  ;;  %v6423_v5 = vpack.c.bf16 %v2184_v4, %v2183_v2 }
 0x536   : > { %6392 = vmatpush3.bf16.msra.mxu0 %v6391_v9  ;;  %v6433_v9 = vpack.c.bf16 %v5116_v8, %v5115_v7 }
 0x537   : > { %6394 = vmatprep.subr.bf16.mxu0 %v6393_v13  ;;  %v5117_v13 = vld [vmem:[%s8813_s7 + $0x290] sm:$0xff] }
 0x5e4   : > { %v8229_v41 = vpop.f32.mrb[32].mxu0 }
 0x5e5   : > { %v2160_v44 = vpop.f32.mrb[33].mxu0 }
 0x5e8   : > { %v8231_v15 = vpop.f32.mrb[34].mxu0 }
 0x5e9   : > { %v8233_v18 = vpop.f32.mrb[35].mxu0 }
 0x5ec   : > { %v2276_v25 = vpop.f32.mrb[36].mxu0 }
 0x5ed   : > { %v2278_v23 = vpop.f32.mrb[37].mxu0 }
 0x5ee   : > { %2384 = vmatprep.mubr.f32.mxu0 %v2278_v23 }
 0x5ef   : > { %2385 = vmatmul.mubr.f32.vlgmr.msra.gmra.mrb[40].mxu0 %v2276_v25  ;;  %v2472_v25 = vld [vmem:[#allocation10 + $0x28] sm:$0xff] }
 0x5f0   : > { %6396 = vmatpush3.bf16.msra.mxu0 %v6395_v28  ;;  %v2282_v37 = vpop.f32.mrb[38].mxu0  ;;  %v6439_v28 = vpack.c.bf16 %v5102_v22, %v5101_v45  ;;  %v5133_v22 = vld [vmem:[%s8813_s7 + $0x300] sm:$0xff] }
 0x5f1   : > { %v2284_v38 = vpop.f32.mrb[39].mxu0  ;;  %6398 = vmatprep.subr.bf16.mxu0 %v6397_v32  ;;  %v5103_v32 = vld [vmem:[%s8813_s7 + $0x220] sm:$0xff] }
 0x5f2   : > { %2389 = vmatprep.mubr.f32.mxu0 %v2284_v38  ;;  %v6443_v35 = vpack.c.bf16 %v5104_v34, %v5103_v32  ;;  %v5106_v38 = vld [vmem:[%s8813_s7 + $0x238] sm:$0xff]  ;;  %v5153_v34 = vld [vmem:[%s8813_s7 + $0x3a0] sm:$0xff] }
 0x5f3   : > { %2390 = vmatmul.mubr.f32.gmra.mrb[42].mxu0 %v2282_v37  ;;  %v6445_v37 = vpack.c.bf16 %v5122_v30, %v5121_v19  ;;  %v5136_v32 = vld [vmem:[%s8813_s7 + $0x318] sm:$0xff] }
 0x5f4   : > { %6400 = vmatpush3.bf16.msra.mxu0 %v6399_v36  ;;  %2459 = vmatprep.mubr.f32.mxu0 %v2160_v44  ;;  %v2471_v44 = vld [vmem:[#allocation10 + $0x20] sm:$0xff]  ;;  %v5105_v36 = vld [vmem:[%s8813_s7 + $0x230] sm:$0xff]  ;;  %v2668_v19 = vld [vmem:[#allocation10 + $0x38] sm:$0xff] }
 0x5f5   : > { %6402 = vmatprep.subr.bf16.mxu0 %v6401_v33  ;;  %v5123_v33 = vld [vmem:[%s8813_s7 + $0x2c0] sm:$0xff]  ;;  %v6447_v39 = vpack.c.bf16 %v5106_v38, %v5105_v36  ;;  %v5138_v36 = vld [vmem:[%s8813_s7 + $0x328] sm:$0xff]  ;;  %v5155_v38 = vld [vmem:[%s8813_s7 + $0x3b0] sm:$0xff] }
 0x5f6   : > { %v6449_v51 = vpack.c.bf16 %v5124_v31, %v5123_v33  ;;  %v5156_v33 = vld [vmem:[%s8813_s7 + $0x3b8] sm:$0xff] }
 0x5f8   : > { %6404 = vmatpush3.bf16.msra.mxu0 %v6403_v47  ;;  %v5108_v47 = vld [vmem:[%s8813_s7 + $0x248] sm:$0xff] }
 0x5f9   : > { %6406 = vmatprep.subr.bf16.mxu0 %v6405_v48  ;;  %v5125_v48 = vld [vmem:[%s8813_s7 + $0x2d0] sm:$0xff]  ;;  %v6451_v52 = vpack.c.bf16 %v5108_v47, %v5107_v40  ;;  %v5140_v40 = vld [vmem:[%s8813_s7 + $0x338] sm:$0xff]  ;;  %v5157_v47 = vld [vmem:[%s8813_s7 + $0x3c0] sm:$0xff] }
 0x5fa   : > { %v6453_v42 = vpack.c.bf16 %v5126_v50, %v5125_v48  ;;  %v5158_v48 = vld [vmem:[%s8813_s7 + $0x3c8] sm:$0xff] }
 0x5fc   : > { %6408 = vmatpush3.bf16.msra.mxu0 %v6407_v53  ;;  %v5110_v53 = vld [vmem:[%s8813_s7 + $0x258] sm:$0xff] }
 0x5fd   : > { %6410 = vmatprep.subr.bf16.mxu0 %v6409_v56  ;;  %v5127_v56 = vld [vmem:[%s8813_s7 + $0x2e0] sm:$0xff]  ;;  %v6455_v6 = vpack.c.bf16 %v5110_v53, %v5109_v46  ;;  %v5142_v46 = vld [vmem:[%s8813_s7 + $0x348] sm:$0xff]  ;;  %v5159_v53 = vld [vmem:[%s8813_s7 + $0x3d0] sm:$0xff] }
 0x5fe   : > { %v6457_v55 = vpack.c.bf16 %v5128_v60, %v5127_v56  ;;  %v5160_v56 = vld [vmem:[%s8813_s7 + $0x3d8] sm:$0xff] }
 0x600   : > { %6412 = vmatpush3.bf16.msra.mxu0 %v6411_v54  ;;  %v5112_v54 = vld [vmem:[%s8813_s7 + $0x268] sm:$0xff] }
 0x601   : > { %6414 = vmatprep.subr.bf16.mxu0 %v6413_v14  ;;  %v5129_v14 = vld [vmem:[%s8813_s7 + $0x2f0] sm:$0xff]  ;;  %v6459_v11 = vpack.c.bf16 %v5112_v54, %v5111_v0  ;;  %v5144_v0 = vld [vmem:[%s8813_s7 + $0x358] sm:$0xff] }
 0x602   : > { %v6461_v21 = vpack.c.bf16 %v5130_v57, %v5129_v14  ;;  %v5161_v14 = vld [vmem:[%s8813_s7 + $0x3e0] sm:$0xff]  ;;  %v5162_v57 = vld [vmem:[%s8813_s7 + $0x3e8] sm:$0xff] }
 0x604   : > { %6416 = vmatpush3.bf16.msra.mxu0 %v6415_v58  ;;  %v5114_v58 = vld [vmem:[%s8813_s7 + $0x278] sm:$0xff] }
 0x605   : > { %6418 = vmatprep.subr.bf16.mxu0 %v6417_v27  ;;  %v6463_v27 = vpack.c.bf16 %v5114_v58, %v5113_v17  ;;  %v5146_v17 = vld [vmem:[%s8813_s7 + $0x368] sm:$0xff] }
 0x608   : > { %6420 = vmatpush3.bf16.msra.mxu0 %v6419_v62 }
 0x609   : > { %6422 = vmatprep.subr.bf16.mxu0 %v6421_v1 }
 0x60c   : > { %6424 = vmatpush3.bf16.msra.mxu0 %v6423_v5 }
 0x60d   : > { %6426 = vmatprep.subr.bf16.mxu0 %v8106_v3 }
 0x60f   : > { %2460 = vmatmul.mubr.f32.vlgmr.msra.gmra.mrb[44].mxu0 %v8229_v41  ;;  %v5118_v41 = vld [vmem:[%s8813_s7 + $0x298] sm:$0xff] }
 0x610   : > { %2464 = vmatprep.mubr.f32.mxu0 %v8233_v18  ;;  %6428 = vmatpush1.bf16.msra.mxu0 %v8104_v63  ;;  %v6435_v18 = vpack.c.bf16 %v5100_v12, %v5099_v10  ;;  %v6437_v43 = vpack.c.bf16 %v5118_v41, %v5117_v13 }
 0x611   : > { %6430 = vmatprep.subr.bf16.mxu0 %v8112_v20 }
 0x613   : > { %2465 = vmatmul.mubr.f32.gmra.mrb[46].mxu0 %v8231_v15  ;;  %v5119_v15 = vld [vmem:[%s8813_s7 + $0x2a0] sm:$0xff] }
 0x614   : > { %6432 = vmatpush1.bf16.msra.mxu0 %v8110_v16  ;;  %2543 = vmatprep.mubr.f32.mxu0 %v7349_v24  ;;  %v6441_v23 = vpack.c.bf16 %v5120_v49, %v5119_v15  ;;  %v5134_v15 = vld [vmem:[%s8813_s7 + $0x308] sm:$0xff]  ;;  %v5151_v49 = vld [vmem:[%s8813_s7 + $0x390] sm:$0xff] }
 0x615   : > { %6434 = vmatprep.subr.bf16.mxu0 %v6433_v9 }
 0x617   : > { %5097 = vmatmul.mubr.msk.f32.vlgmr.msra.gmra.mrb[48].mxu0 %vm2085_vm10, %v2471_v44  ;;  %v5150_v44 = vld [vmem:[%s8813_s7 + $0x388] sm:$0xff] }
 0x618   : > { %6436 = vmatpush3.bf16.msra.mxu0 %v6435_v18  ;;  %2549 = vmatprep.mubr.f32.mxu0 %v7349_v24 }
 0x619   : > { %6438 = vmatprep.subr.bf16.mxu0 %v6437_v43 }
 0x61b   : > { %5098 = vmatmul.mubr.msk.f32.gmra.mrb[50].mxu0 %vm2085_vm10, %v2472_v25  ;;  %v6475_v25 = vpack.c.bf16 %v5134_v15, %v5133_v22  ;;  %v2954_v22 = vld [vmem:[#allocation13 + $0x10] sm:$0xff]  ;;  %v2955_v15 = vld [vmem:[#allocation13 + $0x18] sm:$0xff] }
 0x61c   : > { %6440 = vmatpush3.bf16.msra.mxu0 %v6439_v28 }
 0x61d   : > { %6442 = vmatprep.subr.bf16.mxu0 %v6441_v23  ;;  %v5135_v23 = vld [vmem:[%s8813_s7 + $0x310] sm:$0xff] }
 0x61e   : > { %v6479_v30 = vpack.c.bf16 %v5136_v32, %v5135_v23  ;;  %v2959_v23 = vld [vmem:[#allocation13 + $0x38] sm:$0xff] }
 0x620   : > { %6444 = vmatpush3.bf16.msra.mxu0 %v6443_v35 }
 0x621   : > { %6446 = vmatprep.subr.bf16.mxu0 %v6445_v37  ;;  %v5137_v37 = vld [vmem:[%s8813_s7 + $0x320] sm:$0xff] }
 0x622   : > { %v6483_v31 = vpack.c.bf16 %v5138_v36, %v5137_v37  ;;  %v2964_v36 = vld [vmem:[#allocation13 + $0x60] sm:$0xff] }
 0x624   : > { %6448 = vmatpush3.bf16.msra.mxu0 %v6447_v39  ;;  %v6485_v39 = vpack.c.bf16 %v5156_v33, %v5155_v38  ;;  %v2965_v38 = vld [vmem:[#allocation13 + $0x68] sm:$0xff] }
 0x625   : > { %6450 = vmatprep.subr.bf16.mxu0 %v6449_v51  ;;  %v5139_v51 = vld [vmem:[%s8813_s7 + $0x330] sm:$0xff]  ;;  %v6554_v33 = vpack.c.bf16 %v2965_v38, %v2964_v36  ;;  %v3279_v38 = vld [vmem:[#allocation13 + $0x118] sm:$0xff] }
 0x626   : > { %v6487_v50 = vpack.c.bf16 %v5140_v40, %v5139_v51  ;;  %v3278_v36 = vld [vmem:[#allocation13 + $0x110] sm:$0xff] }
 0x628   : > { %6452 = vmatpush3.bf16.msra.mxu0 %v6451_v52  ;;  %v6489_v52 = vpack.c.bf16 %v5158_v48, %v5157_v47 }
 0x629   : > { %6454 = vmatprep.subr.bf16.mxu0 %v6453_v42  ;;  %v5141_v42 = vld [vmem:[%s8813_s7 + $0x340] sm:$0xff] }
 0x62a   : > { %v6491_v60 = vpack.c.bf16 %v5142_v46, %v5141_v42 }
 0x62c   : > { %6456 = vmatpush3.bf16.msra.mxu0 %v6455_v6  ;;  %v6493_v6 = vpack.c.bf16 %v5160_v56, %v5159_v53 }
 0x62d   : > { %6458 = vmatprep.subr.bf16.mxu0 %v6457_v55  ;;  %v5143_v55 = vld [vmem:[%s8813_s7 + $0x350] sm:$0xff] }
 0x62e   : > { %v6495_v54 = vpack.c.bf16 %v5144_v0, %v5143_v55 }
 0x630   : > { %6460 = vmatpush3.bf16.msra.mxu0 %v6459_v11  ;;  %v6497_v11 = vpack.c.bf16 %v5162_v57, %v5161_v14 }
 0x631   : > { %6462 = vmatprep.subr.bf16.mxu0 %v6461_v21  ;;  %v5145_v21 = vld [vmem:[%s8813_s7 + $0x360] sm:$0xff] }
 0x632   : > { %v6499_v58 = vpack.c.bf16 %v5146_v17, %v5145_v21  ;;  %v3044_v21 = vld [vmem:[#allocation13 + $0x80] sm:$0xff]  ;;  %v3045_v17 = vld [vmem:[#allocation13 + $0x88] sm:$0xff] }
 0x634   : > { %6464 = vmatpush3.bf16.msra.mxu0 %v6463_v27  ;;  %v5163_v27 = vld [vmem:[%s8813_s7 + $0x3f0] sm:$0xff] }
 0x635   : > { %6466 = vmatprep.subr.bf16.mxu0 %v8106_v3  ;;  %v5149_v3 = vld [vmem:[%s8813_s7 + $0x380] sm:$0xff] }
 0x636   : > { %v6473_v45 = vpack.c.bf16 %v5150_v44, %v5149_v3 }
 0x6c2   : > { %v5233_v59 = vpop.f32.mrb[40].mxu0 }
 0x6c3   : > { %v5234_v26 = vpop.f32.mrb[41].mxu0 }
 0x6c4   : > { %v5235_v29 = vadd.f32 %v5234_v26, %v5233_v59  ;;  %v5164_v59 = vld [vmem:[%s8813_s7 + $0x3f8] sm:$0xff] }
 0x6c5   : > { %v6501_v26 = vpack.c.bf16 %v5164_v59, %v5163_v27  ;;  %v6512_v27 = vpack.c.bf16 %v3045_v17, %v3044_v21  ;;  %v3046_v59 = vld [vmem:[#allocation13 + $0x90] sm:$0xff] }
 0x6c6   : > { %v5236_v61 = vpop.f32.mrb[42].mxu0  ;;  %v3286_v17 = vld [vmem:[#allocation13 + $0x150] sm:$0xff] }
 0x6c7   : > { %v5237_v62 = vpop.f32.mrb[43].mxu0 }
 0x6c8   : > { %v5238_v1 = vadd.f32 %v5237_v62, %v5236_v61  ;;  %v5148_v61 = vld [vmem:[%s8813_s7 + $0x378] sm:$0xff] }
 0x6e2   : > { %v5271_v2 = vpop.f32.mrb[44].mxu0 }
 0x6e3   : > { %v5272_v4 = vpop.f32.mrb[45].mxu0 }
 0x6e4   : > { %v5273_v5 = vadd.f32 %v5272_v4, %v5271_v2 }
 0x6e6   : > { %v8433_v7 = vadd.f32 %v5273_v5, %v5235_v29  ;;  %v5274_v8 = vpop.f32.mrb[46].mxu0  ;;  %v5147_v29 = vld [vmem:[%s8813_s7 + $0x370] sm:$0xff] }
 0x6e7   : > { %v5275_v9 = vpop.f32.mrb[47].mxu0  ;;  %v6503_v62 = vpack.c.bf16 %v5148_v61, %v5147_v29  ;;  %v3048_v61 = vld [vmem:[#allocation13 + $0xa0] sm:$0xff] }
 0x6e8   : > { %v5276_v10 = vadd.f32 %v5275_v9, %v5274_v8 }
 0x6ea   : > { %v8435_v12 = vadd.f32 %v5276_v10, %v5238_v1  ;;  %v2545_v13 = vpop.f32.mrb[48].mxu0 }
 0x6eb   : > { %v2547_v41 = vpop.f32.mrb[49].mxu0 }
 0x6ec   : > { %2653 = vmatprep.mubr.f32.mxu0 %v2547_v41 }
 0x6ed   : > { %2654 = vmatmul.mubr.f32.vlgmr.msra.gmra.mrb[52].mxu0 %v2545_v13 }
 0x6ee   : > { %6468 = vmatpush1.bf16.msra.mxu0 %v8104_v63  ;;  %v2551_v18 = vpop.f32.mrb[50].mxu0  ;;  %v5152_v63 = vld [vmem:[%s8813_s7 + $0x398] sm:$0xff] }
 0x6ef   : > { %6470 = vmatprep.subr.bf16.mxu0 %v8112_v20  ;;  %v2553_v43 = vpop.f32.mrb[51].mxu0  ;;  %v2667_v20 = vld [vmem:[#allocation10 + $0x30] sm:$0xff]  ;;  %v6477_v28 = vpack.c.bf16 %v5152_v63, %v5151_v49  ;;  %v6539_v49 = vpack.c.bf16 %v2955_v15, %v2954_v22  ;;  %v2956_v63 = vld [vmem:[#allocation13 + $0x20] sm:$0xff] }
 0x6f0   : > { %2658 = vmatprep.mubr.f32.mxu0 %v2553_v43  ;;  %v7350_v43 = vmov 0.0|0.0  }
 0x6f1   : > { %2659 = vmatmul.mubr.f32.gmra.mrb[54].mxu0 %v2551_v18  ;;  %6535 = vmatprep.subr.bf16.mxu1 %v7350_v43 }
 0x6f2   : > { %6472 = vmatpush1.bf16.msra.mxu0 %v8110_v16  ;;  %2739 = vmatprep.mubr.f32.mxu0 %v7349_v24  ;;  %v5154_v16 = vld [vmem:[%s8813_s7 + $0x3a8] sm:$0xff] }
 0x6f3   : > { %6474 = vmatprep.subr.bf16.mxu0 %v6473_v45  ;;  %v6481_v35 = vpack.c.bf16 %v5154_v16, %v5153_v34  ;;  %v2960_v34 = vld [vmem:[#allocation13 + $0x40] sm:$0xff]  ;;  %v2961_v16 = vld [vmem:[#allocation13 + $0x48] sm:$0xff] }
 0x6f5   : > { %5131 = vmatmul.mubr.msk.f32.vlgmr.msra.gmra.mrb[56].mxu0 %vm2085_vm10, %v2667_v20  ;;  %v2957_v20 = vld [vmem:[#allocation13 + $0x28] sm:$0xff] }
 0x6f6   : > { %2745 = vmatprep.mubr.f32.mxu0 %v7349_v24  ;;  %6476 = vmatpush3.bf16.msra.mxu0 %v6475_v25  ;;  %v6542_v25 = vpack.c.bf16 %v2957_v20, %v2956_v63  ;;  %v3440_v63 = vld [vmem:[#allocation13 + $0x188] sm:$0xff] }
 0x6f7   : > { %6478 = vmatprep.subr.bf16.mxu0 %v6477_v28  ;;  %v2958_v28 = vld [vmem:[#allocation13 + $0x30] sm:$0xff] }
 0x6f8   : > { %v6545_v32 = vpack.c.bf16 %v2959_v23, %v2958_v28  ;;  %v3276_v28 = vld [vmem:[#allocation13 + $0x100] sm:$0xff]  ;;  %v3277_v23 = vld [vmem:[#allocation13 + $0x108] sm:$0xff] }
 0x6f9   : > { %5132 = vmatmul.mubr.msk.f32.gmra.mrb[58].mxu0 %vm2085_vm10, %v2668_v19  ;;  %v6548_v19 = vpack.c.bf16 %v2961_v16, %v2960_v34  ;;  %v3441_v16 = vld [vmem:[#allocation13 + $0x190] sm:$0xff] }
 0x6fa   : > { %6480 = vmatpush3.bf16.msra.mxu0 %v6479_v30  ;;  %v2962_v30 = vld [vmem:[#allocation13 + $0x50] sm:$0xff] }
 0x6fb   : > { %6482 = vmatprep.subr.bf16.mxu0 %v6481_v35  ;;  %v2963_v35 = vld [vmem:[#allocation13 + $0x58] sm:$0xff] }
 0x6fc   : > { %v6551_v37 = vpack.c.bf16 %v2963_v35, %v2962_v30  ;;  %v5169_v35 = vld [vmem:[%s8815_s9 + $0x10] sm:$0xff] }
 0x6fe   : > { %6484 = vmatpush3.bf16.msra.mxu0 %v6483_v31  ;;  %v2966_v31 = vld [vmem:[#allocation13 + $0x70] sm:$0xff] }
 0x6ff   : > { %6486 = vmatprep.subr.bf16.mxu0 %v6485_v39  ;;  %v2967_v39 = vld [vmem:[#allocation13 + $0x78] sm:$0xff] }
 0x700   : > { %v6557_v51 = vpack.c.bf16 %v2967_v39, %v2966_v31  ;;  %v3443_v31 = vld [vmem:[#allocation13 + $0x1a0] sm:$0xff]  ;;  %v3444_v39 = vld [vmem:[#allocation13 + $0x1a8] sm:$0xff] }
 0x702   : > { %6488 = vmatpush3.bf16.msra.mxu0 %v6487_v50  ;;  %v5165_v50 = vld [vmem:[#allocation11] ss:$0 sm:$0xff] }
 0x703   : > { %6490 = vmatprep.subr.bf16.mxu0 %v6489_v52 }
 0x706   : > { %6492 = vmatpush3.bf16.msra.mxu0 %v6491_v60 }
 0x707   : > { %6494 = vmatprep.subr.bf16.mxu0 %v6493_v6 }
 0x70a   : > { %6496 = vmatpush3.bf16.msra.mxu0 %v6495_v54 }
 0x70b   : > { %6498 = vmatprep.subr.bf16.mxu0 %v6497_v11  ;;  %v2877_v11 = vld [vmem:[%s8815_s9] sm:$0xff] }
 0x70e   : > { %6500 = vmatpush3.bf16.msra.mxu0 %v6499_v58  ;;  %v5167_v58 = vld [vmem:[%s8815_s9 + $0x8] sm:$0xff] }
 0x70f   : > { %6502 = vmatprep.subr.bf16.mxu0 %v6501_v26  ;;  %v3047_v26 = vld [vmem:[#allocation13 + $0x98] sm:$0xff] }
 0x710   : > { %v6515_v29 = vpack.c.bf16 %v3047_v26, %v3046_v59  ;;  %v3288_v26 = vld [vmem:[#allocation13 + $0x160] sm:$0xff] }
 0x712   : > { %6504 = vmatpush3.bf16.msra.mxu0 %v6503_v62  ;;  %v3049_v62 = vld [vmem:[#allocation13 + $0xa8] sm:$0xff] }
 0x713   : > { %6505 = vmatprep.subr.bf16.mxu0 %v7350_v43 }
 0x7c0   : > { %v5309_v1 = vpop.f32.mrb[52].mxu0 }
 0x7c1   : > { %v5310_v2 = vpop.f32.mrb[53].mxu0 }
 0x7c2   : > { %v5311_v4 = vadd.f32 %v5310_v2, %v5309_v1  ;;  %v6518_v1 = vpack.c.bf16 %v3049_v62, %v3048_v61  ;;  %v3050_v2 = vld [vmem:[#allocation13 + $0xb0] sm:$0xff]  ;;  %v3451_v62 = vld [vmem:[#allocation13 + $0x1e0] sm:$0xff] }
 0x7c4   : > { %v8541_v5 = vadd.f32 %v5311_v4, %v8433_v7  ;;  %v5312_v8 = vpop.f32.mrb[54].mxu0  ;;  %v2952_v7 = vld [vmem:[#allocation13] sm:$0xff]  ;;  %v3051_v4 = vld [vmem:[#allocation13 + $0xb8] sm:$0xff] }
 0x7c5   : > { %v5313_v9 = vpop.f32.mrb[55].mxu0 }
 0x7c6   : > { %v5314_v10 = vadd.f32 %v5313_v9, %v5312_v8  ;;  %v3052_v8 = vld [vmem:[#allocation13 + $0xc0] sm:$0xff]  ;;  %v3053_v9 = vld [vmem:[#allocation13 + $0xc8] sm:$0xff] }
 0x7c8   : > { %v8544_v13 = vadd.f32 %v5314_v10, %v8435_v12  ;;  %v2741_v41 = vpop.f32.mrb[56].mxu0  ;;  %v2953_v12 = vld [vmem:[#allocation13 + $0x8] sm:$0xff]  ;;  %v6524_v10 = vpack.c.bf16 %v3053_v9, %v3052_v8  ;;  %v3453_v9 = vld [vmem:[#allocation13 + $0x1f0] sm:$0xff] }
 0x7c9   : > { %v2743_v3 = vpop.f32.mrb[57].mxu0  ;;  %v6536_v45 = vpack.c.bf16 %v2953_v12, %v2952_v7  ;;  %v3058_v12 = vld [vmem:[#allocation13 + $0xf0] sm:$0xff] }
 0x7ca   : > { %2849 = vmatprep.mubr.f32.mxu0 %v2743_v3 }
 0x7cb   : > { %2850 = vmatmul.mubr.f32.vlgmr.msra.gmra.mrb[60].mxu0 %v2741_v41  ;;  %6537 = vmatpush3.bf16.msra.mxu1 %v6536_v45  ;;  %v3055_v41 = vld [vmem:[#allocation13 + $0xd8] sm:$0xff] }
 0x7cc   : > { %v2747_v44 = vpop.f32.mrb[58].mxu0  ;;  %6538 = vmatprep.subr.bf16.mxu1 %v7350_v43  ;;  %v3059_v45 = vld [vmem:[#allocation13 + $0xf8] sm:$0xff] }
 0x7cd   : > { %v2749_v18 = vpop.f32.mrb[59].mxu0  ;;  %v6533_v22 = vpack.c.bf16 %v3059_v45, %v3058_v12 }
 0x7ce   : > { %2854 = vmatprep.mubr.f32.mxu0 %v2749_v18  ;;  %v3057_v18 = vld [vmem:[#allocation13 + $0xe8] sm:$0xff] }
 0x7cf   : > { %2855 = vmatmul.mubr.f32.gmra.mrb[62].mxu0 %v2747_v44  ;;  %6540 = vmatpush3.bf16.msra.mxu1 %v6539_v49  ;;  %v3056_v44 = vld [vmem:[#allocation13 + $0xe0] sm:$0xff] }
 0x7d0   : > { %5557 = vmatprep.mubr.msk.f32.mxu0 %vm7351_vm11, %v7349_v24  ;;  %6541 = vmatprep.subr.bf16.mxu1 %v7350_v43  ;;  %v6530_v7 = vpack.c.bf16 %v3057_v18, %v3056_v44  ;;  %v3439_v49 = vld [vmem:[#allocation13 + $0x180] sm:$0xff] }
 0x7d3   : > { %6543 = vmatpush3.bf16.msra.mxu1 %v6542_v25  ;;  %v5171_v25 = vld [vmem:[%s8815_s9 + $0x18] sm:$0xff] }
 0x7d4   : > { %6544 = vmatprep.subr.bf16.mxu1 %v7350_v43 }
 0x7d7   : > { %6546 = vmatpush3.bf16.msra.mxu1 %v6545_v32  ;;  %v6590_v32 = vpack.c.bf16 %v3440_v63, %v3439_v49  ;;  %v3612_v49 = vld [vmem:[#allocation16] sm:$0xff]  ;;  %v3613_v63 = vld [vmem:[#allocation16 + $0x8] sm:$0xff] }
 0x7d8   : > { %6547 = vmatprep.subr.bf16.mxu1 %v7350_v43 }
 0x7db   : > { %6549 = vmatpush3.bf16.msra.mxu1 %v6548_v19  ;;  %v3442_v19 = vld [vmem:[#allocation13 + $0x198] sm:$0xff] }
 0x7dc   : > { %6550 = vmatprep.subr.bf16.mxu1 %v7350_v43 }
 0x7df   : > { %6552 = vmatpush3.bf16.msra.mxu1 %v6551_v37  ;;  %v6563_v37 = vpack.c.bf16 %v3277_v23, %v3276_v28  ;;  %v3615_v28 = vld [vmem:[#allocation16 + $0x18] sm:$0xff] }
 0x7e0   : > { %6553 = vmatprep.subr.bf16.mxu1 %v7350_v43 }
 0x7e3   : > { %6555 = vmatpush3.bf16.msra.mxu1 %v6554_v33  ;;  %v6593_v33 = vpack.c.bf16 %v3442_v19, %v3441_v16  ;;  %v3618_v19 = vld [vmem:[#allocation16 + $0x30] sm:$0xff] }
 0x7e4   : > { %6556 = vmatprep.subr.bf16.mxu1 %v7350_v43 }
 0x7e7   : > { %6558 = vmatpush3.bf16.msra.mxu1 %v6557_v51  ;;  %v6566_v51 = vpack.c.bf16 %v3279_v38, %v3278_v36  ;;  %v3621_v36 = vld [vmem:[#allocation16 + $0x48] sm:$0xff] }
 0x7e8   : > { %6586 = vmatprep.subr.bf16.mxu1 %v7350_v43 }
 0x89e   : > { %v5347_v40 = vpop.f32.mrb[60].mxu0 }
 0x89f   : > { %v5348_v47 = vpop.f32.mrb[61].mxu0 }
 0x8a0   : > { %v5349_v48 = vadd.f32 %v5348_v47, %v5347_v40  ;;  %v3280_v40 = vld [vmem:[#allocation13 + $0x120] sm:$0xff]  ;;  %v3281_v47 = vld [vmem:[#allocation13 + $0x128] sm:$0xff] }
 0x8a2   : > { %v2860_v52 = vadd.f32 %v5349_v48, %v8541_v5  ;;  %v5350_v42 = vpop.f32.mrb[62].mxu0  ;;  %v6521_v5 = vpack.c.bf16 %v3051_v4, %v3050_v2  ;;  %v6596_v48 = vpack.c.bf16 %v3444_v39, %v3443_v31  ;;  %v3290_v4 = vld [vmem:[#allocation13 + $0x170] sm:$0xff]  ;;  %v3623_v31 = vld [vmem:[#allocation16 + $0x58] sm:$0xff] }
 0x8a3   : > { %v5351_v46 = vpop.f32.mrb[63].mxu0 }
 0x8a4   : > { %v2869_v53 = vadd.f32 %v5165_v50, %v2860_v52  ;;  %v5352_v56 = vadd.f32 %v5351_v46, %v5350_v42  ;;  %v3446_v52 = vld [vmem:[#allocation13 + $0x1b8] sm:$0xff]  ;;  %v6569_v42 = vpack.c.bf16 %v3281_v47, %v3280_v40  ;;  %v3282_v46 = vld [vmem:[#allocation13 + $0x130] sm:$0xff] }
 0x8a5   : > { %v3625_v40 = vld [vmem:[#allocation16 + $0x68] sm:$0xff] }
 0x8a6   : > { %v2861_v60 = vadd.f32 %v5352_v56, %v8544_v13  ;;  %v2873_v6 = vmul.f32 0.2, %v2869_v53  ;;  %vm2871_vm12 = vcmp.gt.f32.partialorder %v2869_v53, 0.0  ;;  %v3054_v13 = vld [vmem:[#allocation13 + $0xd0] sm:$0xff] }
 0x8a7   : > { %v6527_v3 = vpack.c.bf16 %v3055_v41, %v3054_v13 }
 0x8a8   : > { %v2870_v55 = vadd.f32 %v5165_v50, %v2861_v60  ;;  %v2875_v54 = vsel %vm2871_vm12, %v2869_v53, %v2873_v6  ;;  %v3445_v50 = vld [vmem:[#allocation13 + $0x1b0] sm:$0xff]  ;;  %v3283_v53 = vld [vmem:[#allocation13 + $0x138] sm:$0xff]  ;;  %v3447_v60 = vld [vmem:[#allocation13 + $0x1c0] sm:$0xff] }
 0x8a9   : > { %v6599_v56 = vpack.c.bf16 %v3446_v52, %v3445_v50  ;;  %v3448_v6 = vld [vmem:[#allocation13 + $0x1c8] sm:$0xff]  ;;  %v3627_v50 = vld [vmem:[#allocation16 + $0x78] sm:$0xff] }
 0x8aa   : > { %vm2872_vm13 = vcmp.gt.f32.partialorder %v2870_v55, 0.0  ;;  %v2874_v0 = vmul.f32 0.2, %v2870_v55 }
 0x8ac   : > { %v2876_v14 = vsel %vm2872_vm13, %v2870_v55, %v2874_v0  ;;  %v6572_v55 = vpack.c.bf16 %v3283_v53, %v3282_v46  ;;  %v3284_v0 = vld [vmem:[#allocation13 + $0x140] sm:$0xff] }
 0x8ad   : > { %v8562_v57 = vpack.c.bf16 %v2876_v14, %v2875_v54  ;;  %v3285_v54 = vld [vmem:[#allocation13 + $0x148] sm:$0xff]  ;;  %v6602_v14 = vpack.c.bf16 %v3448_v6, %v3447_v60  ;;  %v5173_v6 = vld [vmem:[#allocation14] ss:$0 sm:$0xff] }
 0x8ae   : > { %v6575_v21 = vpack.c.bf16 %v3285_v54, %v3284_v0 }
 0x8af   : > { %6507 = vmatpush3.bf16.msra.mxu0 %v8562_v57 }
 0x8b0   : > { %6508 = vmatprep.subr.bf16.mxu0 %v7350_v43 }
 0x8b2   : > { %5558 = vmatmul.mubr.msk.f32.vlgmr.msra.gmra.mrb[64].mxu0 %vm2878_vm14, %v2877_v11  ;;  %v3450_v11 = vld [vmem:[#allocation13 + $0x1d8] sm:$0xff] }
 0x8b3   : > { %6510 = vmatpush3.bf16.msra.mxu0 %v8562_v57  ;;  %5564 = vmatprep.mubr.msk.f32.mxu0 %vm7351_vm11, %v7349_v24 }
 0x8b4   : > { %6511 = vmatprep.subr.bf16.mxu0 %v7350_v43 }
 0x8b6   : > { %5565 = vmatmul.mubr.msk.f32.vlgmr.msra.gmra.mrb[66].mxu0 %vm2878_vm14, %v5167_v58  ;;  %v3287_v58 = vld [vmem:[#allocation13 + $0x158] sm:$0xff] }
 0x8b7   : > { %6513 = vmatpush3.bf16.msra.mxu0 %v6512_v27  ;;  %5599 = vmatprep.mubr.msk.f32.mxu0 %vm7351_vm11, %v7349_v24  ;;  %v6578_v59 = vpack.c.bf16 %v3287_v58, %v3286_v17  ;;  %v5175_v17 = vld [vmem:[%s8818_s12 + $0x4] sm:$0xf] }
 0x8b8   : > { %6514 = vmatprep.subr.bf16.mxu0 %v7350_v43 }
 0x8bb   : > { %6516 = vmatpush3.bf16.msra.mxu0 %v6515_v29  ;;  %v3289_v29 = vld [vmem:[#allocation13 + $0x168] sm:$0xff] }
 0x8bc   : > { %6517 = vmatprep.subr.bf16.mxu0 %v7350_v43  ;;  %v6581_v61 = vpack.c.bf16 %v3289_v29, %v3288_v26  ;;  %v3708_v29 = vld [vmem:[#allocation16 + $0xa0] sm:$0xff] }
 0x8bf   : > { %6519 = vmatpush3.bf16.msra.mxu0 %v6518_v1  ;;  %v3452_v1 = vld [vmem:[#allocation13 + $0x1e8] sm:$0xff] }
 0x8c0   : > { %6520 = vmatprep.subr.bf16.mxu0 %v7350_v43  ;;  %v6608_v2 = vpack.c.bf16 %v3452_v1, %v3451_v62  ;;  %v3710_v1 = vld [vmem:[#allocation16 + $0xb0] sm:$0xff] }
 0x8c3   : > { %6522 = vmatpush3.bf16.msra.mxu0 %v6521_v5  ;;  %v3291_v5 = vld [vmem:[#allocation13 + $0x178] sm:$0xff] }
 0x8c4   : > { %6523 = vmatprep.subr.bf16.mxu0 %v7350_v43  ;;  %v6584_v8 = vpack.c.bf16 %v3291_v5, %v3290_v4  ;;  %v3712_v5 = vld [vmem:[#allocation16 + $0xc0] sm:$0xff] }
 0x8c7   : > { %6525 = vmatpush3.bf16.msra.mxu0 %v6524_v10  ;;  %v3454_v10 = vld [vmem:[#allocation13 + $0x1f8] sm:$0xff] }
 0x8c8   : > { %6526 = vmatprep.subr.bf16.mxu0 %v7350_v43  ;;  %v6611_v13 = vpack.c.bf16 %v3454_v10, %v3453_v9  ;;  %v3714_v10 = vld [vmem:[#allocation16 + $0xd0] sm:$0xff] }
 0x8cb   : > { %6528 = vmatpush3.bf16.msra.mxu0 %v6527_v3 }
 0x8cc   : > { %6529 = vmatprep.subr.bf16.mxu0 %v7350_v43 }
 0x8cf   : > { %6531 = vmatpush3.bf16.msra.mxu0 %v6530_v7 }
 0x8d0   : > { %6532 = vmatprep.subr.bf16.mxu0 %v7350_v43 }
 0x8d3   : > { %6534 = vmatpush3.bf16.msra.mxu0 %v6533_v22 }
 0x8d4   : > { %6559 = vmatprep.subr.bf16.mxu0 %v7350_v43 }
 0x985   : > { %v2948_v15 = vpop.f32.mrb[64].mxu0 }
 0x986   : > { %5635 = vmatmul.mubr.f32.vlgmr.msra.gmra.mrb[24].mxu1 %v2948_v15  ;;  %v5559_v20 = vpop.f32.mrb[65].mxu0 }
 0x987   : > { %6588 = vmatpush3.bf16.msra.mxu1 %v8562_v57  ;;  %5683 = vmatprep.mubr.msk.f32.mxu1 %vm7351_vm11, %v7349_v24  ;;  %v6638_v20 = vpack.c.bf16 %v3613_v63, %v3612_v49  ;;  %v4100_v49 = vld [vmem:[#allocation16 + $0x188] sm:$0xff] }
 0x988   : > { %6589 = vmatprep.subr.bf16.mxu1 %v7350_v43 }
 0x989   : > { %v3039_v34 = vpop.f32.mrb[66].mxu0 }
 0x98a   : > { %5600 = vmatmul.mubr.f32.vlgmr.msra.gmra.mrb[68].mxu0 %v3039_v34  ;;  %v5566_v30 = vpop.f32.mrb[67].mxu0  ;;  %5684 = vmatmul.mubr.msk.f32.vlgmr.msra.gmra.mrb[26].mxu1 %vm2878_vm14, %v5171_v25  ;;  %v3614_v25 = vld [vmem:[#allocation16 + $0x10] sm:$0xff]  ;;  %v3617_v34 = vld [vmem:[#allocation16 + $0x28] sm:$0xff] }
 0x98b   : > { %6561 = vmatpush3.bf16.msra.mxu0 %v8562_v57  ;;  %5641 = vmatprep.mubr.msk.f32.mxu0 %vm7351_vm11, %v7349_v24  ;;  %v3449_v57 = vld [vmem:[#allocation13 + $0x1d0] sm:$0xff]  ;;  %v6641_v23 = vpack.c.bf16 %v3615_v28, %v3614_v25  ;;  %v3619_v30 = vld [vmem:[#allocation16 + $0x38] sm:$0xff]  ;;  %v3936_v25 = vld [vmem:[#allocation16 + $0x100] sm:$0xff] }
 0x98c   : > { %6562 = vmatprep.subr.bf16.mxu0 %v7350_v43  ;;  %6591 = vmatpush3.bf16.msra.mxu1 %v6590_v32  ;;  %v6605_v27 = vpack.c.bf16 %v3450_v11, %v3449_v57  ;;  %v3616_v32 = vld [vmem:[#allocation16 + $0x20] sm:$0xff]  ;;  %v3937_v28 = vld [vmem:[#allocation16 + $0x108] sm:$0xff] }
 0x98d   : > { %6592 = vmatprep.subr.bf16.mxu1 %v7350_v43  ;;  %5718 = vmatprep.mubr.msk.f32.mxu1 %vm7351_vm11, %v7349_v24  ;;  %v6644_v16 = vpack.c.bf16 %v3617_v34, %v3616_v32  ;;  %v3704_v11 = vld [vmem:[#allocation16 + $0x80] sm:$0xff]  ;;  %v4101_v34 = vld [vmem:[#allocation16 + $0x190] sm:$0xff] }
 0x98e   : > { %5642 = vmatmul.mubr.msk.f32.vlgmr.msra.gmra.mrb[70].mxu0 %vm2878_vm14, %v5169_v35  ;;  %v6647_v35 = vpack.c.bf16 %v3619_v30, %v3618_v19  ;;  %v5177_v30 = vld [vmem:[%s8818_s12 + $0x8] sm:$0xf] }
 0x98f   : > { %6564 = vmatpush3.bf16.msra.mxu0 %v6563_v37  ;;  %5676 = vmatprep.mubr.msk.f32.mxu0 %vm7351_vm11, %v7349_v24  ;;  %v3620_v37 = vld [vmem:[#allocation16 + $0x40] sm:$0xff] }
 0x990   : > { %6565 = vmatprep.subr.bf16.mxu0 %v7350_v43  ;;  %6594 = vmatpush3.bf16.msra.mxu1 %v6593_v33  ;;  %v6650_v38 = vpack.c.bf16 %v3621_v36, %v3620_v37  ;;  %v3622_v33 = vld [vmem:[#allocation16 + $0x50] sm:$0xff]  ;;  %v3939_v36 = vld [vmem:[#allocation16 + $0x118] sm:$0xff] }
 0x991   : > { %6595 = vmatprep.subr.bf16.mxu1 %v7350_v43  ;;  %v6653_v39 = vpack.c.bf16 %v3623_v31, %v3622_v33  ;;  %v3938_v37 = vld [vmem:[#allocation16 + $0x110] sm:$0xff]  ;;  %v4103_v33 = vld [vmem:[#allocation16 + $0x1a0] sm:$0xff]  ;;  %v4104_v31 = vld [vmem:[#allocation16 + $0x1a8] sm:$0xff] }
 0x993   : > { %6567 = vmatpush3.bf16.msra.mxu0 %v6566_v51  ;;  %v3624_v51 = vld [vmem:[#allocation16 + $0x60] sm:$0xff] }
 0x994   : > { %6568 = vmatprep.subr.bf16.mxu0 %v7350_v43  ;;  %6597 = vmatpush3.bf16.msra.mxu1 %v6596_v48  ;;  %v6656_v47 = vpack.c.bf16 %v3625_v40, %v3624_v51  ;;  %v3626_v48 = vld [vmem:[#allocation16 + $0x70] sm:$0xff]  ;;  %v3940_v51 = vld [vmem:[#allocation16 + $0x120] sm:$0xff]  ;;  %v3941_v40 = vld [vmem:[#allocation16 + $0x128] sm:$0xff] }
 0x995   : > { %6598 = vmatprep.subr.bf16.mxu1 %v7350_v43  ;;  %v6659_v52 = vpack.c.bf16 %v3627_v50, %v3626_v48  ;;  %v4105_v48 = vld [vmem:[#allocation16 + $0x1b0] sm:$0xff]  ;;  %v4106_v50 = vld [vmem:[#allocation16 + $0x1b8] sm:$0xff] }
 0x997   : > { %6570 = vmatpush3.bf16.msra.mxu0 %v6569_v42 }
 0x998   : > { %6571 = vmatprep.subr.bf16.mxu0 %v7350_v43  ;;  %6600 = vmatpush3.bf16.msra.mxu1 %v6599_v56 }
 0x999   : > { %6601 = vmatprep.subr.bf16.mxu1 %v7350_v43 }
 0x99b   : > { %6573 = vmatpush3.bf16.msra.mxu0 %v6572_v55 }
 0x99c   : > { %6574 = vmatprep.subr.bf16.mxu0 %v7350_v43  ;;  %6603 = vmatpush3.bf16.msra.mxu1 %v6602_v14  ;;  %v3537_v14 = vld [vmem:[%s8818_s12] sm:$0xf] }
 0x99d   : > { %6604 = vmatprep.subr.bf16.mxu1 %v7350_v43 }
 0x99f   : > { %6576 = vmatpush3.bf16.msra.mxu0 %v6575_v21  ;;  %v3705_v21 = vld [vmem:[#allocation16 + $0x88] sm:$0xff] }
 0x9a0   : > { %6577 = vmatprep.subr.bf16.mxu0 %v7350_v43  ;;  %6606 = vmatpush3.bf16.msra.mxu1 %v6605_v27  ;;  %v6614_v58 = vpack.c.bf16 %v3705_v21, %v3704_v11  ;;  %v3706_v27 = vld [vmem:[#allocation16 + $0x90] sm:$0xff] }
 0x9a1   : > { %6607 = vmatprep.subr.bf16.mxu1 %v7350_v43  ;;  %v3946_v21 = vld [vmem:[#allocation16 + $0x150] sm:$0xff] }
 0x9a3   : > { %6579 = vmatpush3.bf16.msra.mxu0 %v6578_v59  ;;  %v3707_v59 = vld [vmem:[#allocation16 + $0x98] sm:$0xff] }
 0x9a4   : > { %6580 = vmatprep.subr.bf16.mxu0 %v7350_v43  ;;  %6609 = vmatpush3.bf16.msra.mxu1 %v6608_v2  ;;  %v6617_v26 = vpack.c.bf16 %v3707_v59, %v3706_v27  ;;  %v3711_v2 = vld [vmem:[#allocation16 + $0xb8] sm:$0xff]  ;;  %v3948_v59 = vld [vmem:[#allocation16 + $0x160] sm:$0xff] }
 0x9a5   : > { %6610 = vmatprep.subr.bf16.mxu1 %v7350_v43  ;;  %v6623_v4 = vpack.c.bf16 %v3711_v2, %v3710_v1  ;;  %v3950_v2 = vld [vmem:[#allocation16 + $0x170] sm:$0xff] }
 0x9a7   : > { %6582 = vmatpush3.bf16.msra.mxu0 %v6581_v61  ;;  %v3709_v61 = vld [vmem:[#allocation16 + $0xa8] sm:$0xff] }
 0x9a8   : > { %6583 = vmatprep.subr.bf16.mxu0 %v7350_v43  ;;  %6612 = vmatpush3.bf16.msra.mxu1 %v6611_v13  ;;  %v6620_v62 = vpack.c.bf16 %v3709_v61, %v3708_v29  ;;  %v3715_v13 = vld [vmem:[#allocation16 + $0xd8] sm:$0xff]  ;;  %v4111_v61 = vld [vmem:[#allocation16 + $0x1e0] sm:$0xff] }
 0x9a9   : > { %6637 = vmatprep.subr.bf16.mxu1 %v7350_v43 }
 0x9ab   : > { %6585 = vmatpush3.bf16.msra.mxu0 %v6584_v8  ;;  %v3713_v8 = vld [vmem:[#allocation16 + $0xc8] sm:$0xff] }
 0x9ac   : > { %5721 = vmatprep.subr.mxu0 %v7349_v24  ;;  %v6626_v9 = vpack.c.bf16 %v3713_v8, %v3712_v5  ;;  %v4113_v8 = vld [vmem:[#allocation16 + $0x1f0] sm:$0xff] }
 0xa59   : > { %v3196_v41 = vpop.f32.mrb[24].mxu1 }
 0xa5a   : > { %v5636_v3 = vpop.f32.mrb[25].mxu1 }
 0xa5b   : > { %v3716_v3 = vld [vmem:[#allocation16 + $0xe0] sm:$0xff] }
 0xa5d   : > { %v3126_v44 = vpop.f32.mrb[68].mxu0  ;;  %v3434_v18 = vpop.f32.mrb[26].mxu1 }
 0xa5e   : > { %v3197_v7 = vadd.f32 %v3196_v41, %v3126_v44  ;;  %v5601_v12 = vpop.f32.mrb[69].mxu0  ;;  %5719 = vmatmul.mubr.f32.vlgmr.msra.gmra.mrb[28].mxu1 %v3434_v18  ;;  %v5685_v45 = vpop.f32.mrb[27].mxu1  ;;  %v6629_v41 = vpack.c.bf16 %v3715_v13, %v3714_v10  ;;  %v3717_v44 = vld [vmem:[#allocation16 + $0xe8] sm:$0xff] }
 0xa5f   : > { %5798 = vmatprep.mubr.msk.f32.mxu1 %vm7351_vm11, %v7349_v24  ;;  %6639 = vmatpush3.bf16.msra.mxu1 %v6638_v20  ;;  %v6632_v18 = vpack.c.bf16 %v3717_v44, %v3716_v3  ;;  %v3719_v12 = vld [vmem:[#allocation16 + $0xf8] sm:$0xff]  ;;  %v5179_v20 = vld [vmem:[%s8818_s12 + $0xc] sm:$0xf] }
 0xa60   : > { %6640 = vmatprep.subr.bf16.mxu1 %v7350_v43 }
 0xa61   : > { %v3271_v22 = vpop.f32.mrb[70].mxu0 }
 0xa62   : > { %5677 = vmatmul.mubr.f32.vlgmr.msra.gmra.mrb[72].mxu0 %v3271_v22  ;;  %v5643_v15 = vpop.f32.mrb[71].mxu0 }
 0xa63   : > { %5723 = vmatprep.mubr.msk.f32.mxu0 %vm7351_vm11, %v7349_v24  ;;  %6642 = vmatpush3.bf16.msra.mxu1 %v6641_v23  ;;  %v4099_v15 = vld [vmem:[#allocation16 + $0x180] sm:$0xff] }
 0xa64   : > { %6643 = vmatprep.subr.bf16.mxu1 %v7350_v43  ;;  %v6686_v23 = vpack.c.bf16 %v4100_v49, %v4099_v15  ;;  %v4360_v15 = vld [vmem:[#allocation19 + $0x40] sm:$0xff]  ;;  %v4361_v49 = vld [vmem:[#allocation19 + $0x48] sm:$0xff] }
 0xa67   : > { %6645 = vmatpush3.bf16.msra.mxu1 %v6644_v16  ;;  %v4102_v16 = vld [vmem:[#allocation16 + $0x198] sm:$0xff] }
 0xa68   : > { %6646 = vmatprep.subr.bf16.mxu1 %v7350_v43 }
 0xa6b   : > { %6648 = vmatpush3.bf16.msra.mxu1 %v6647_v35  ;;  %v6662_v35 = vpack.c.bf16 %v3937_v28, %v3936_v25  ;;  %v4363_v25 = vld [vmem:[#allocation19 + $0x58] sm:$0xff] }
 0xa6c   : > { %6649 = vmatprep.subr.bf16.mxu1 %v7350_v43 }
 0xa6f   : > { %6651 = vmatpush3.bf16.msra.mxu1 %v6650_v38  ;;  %v6689_v38 = vpack.c.bf16 %v4102_v16, %v4101_v34  ;;  %v4366_v16 = vld [vmem:[#allocation19 + $0x70] sm:$0xff] }
 0xa70   : > { %6652 = vmatprep.subr.bf16.mxu1 %v7350_v43 }
 0xa73   : > { %6654 = vmatpush3.bf16.msra.mxu1 %v6653_v39  ;;  %v6665_v39 = vpack.c.bf16 %v3939_v36, %v3938_v37 }
 0xa74   : > { %6655 = vmatprep.subr.bf16.mxu1 %v7350_v43 }
 0xa77   : > { %6657 = vmatpush3.bf16.msra.mxu1 %v6656_v47  ;;  %v6692_v47 = vpack.c.bf16 %v4104_v31, %v4103_v33  ;;  %v5181_v31 = vld [vmem:[#allocation17] ss:$0 sm:$0xff] }
 0xa78   : > { %6658 = vmatprep.subr.bf16.mxu1 %v7350_v43 }
 0xa7b   : > { %6660 = vmatpush3.bf16.msra.mxu1 %v6659_v52  ;;  %v6668_v52 = vpack.c.bf16 %v3941_v40, %v3940_v51 }
 0xa7c   : > { %5841 = vmatprep.subr.mxu1 %v7349_v24 }
 0xb31   : > { %v3521_v42 = vpop.f32.mrb[28].mxu1 }
 0xb32   : > { %v5720_v46 = vpop.f32.mrb[29].mxu1 }
 0xb33   : > { %v3943_v46 = vld [vmem:[#allocation16 + $0x138] sm:$0xff] }
 0xb35   : > { %v3358_v53 = vpop.f32.mrb[72].mxu0 }
 0xb36   : > { %v3362_v56 = vadd.f32 %v3358_v53, %v3197_v7  ;;  %v5678_v60 = vpop.f32.mrb[73].mxu0  ;;  %v3718_v7 = vld [vmem:[#allocation16 + $0xf0] sm:$0xff]  ;;  %v6695_v53 = vpack.c.bf16 %v4106_v50, %v4105_v48  ;;  %v4276_v50 = vld [vmem:[#allocation19] sm:$0xff] }
 0xb37   : > { %v6635_v45 = vpack.c.bf16 %v3719_v12, %v3718_v7  ;;  %v4108_v60 = vld [vmem:[#allocation16 + $0x1c8] sm:$0xff] }
 0xb38   : > { %v3525_v55 = vadd.f32 %v3521_v42, %v3362_v56  ;;  %v3942_v42 = vld [vmem:[#allocation16 + $0x130] sm:$0xff]  ;;  %v4107_v56 = vld [vmem:[#allocation16 + $0x1c0] sm:$0xff] }
 0xb3a   : > { %v3533_v0 = vadd.f32 %v5173_v6, %v3525_v55  ;;  %v6671_v6 = vpack.c.bf16 %v3943_v46, %v3942_v42  ;;  %v3944_v55 = vld [vmem:[#allocation16 + $0x140] sm:$0xff]  ;;  %v5184_v42 = vld [vmem:[%s8888_s18 + $0x1] sm:$0x1] }
 0xb3c   : > { %v3535_v54 = vmul.f32 0.2, %v3533_v0  ;;  %vm3534_vm15 = vcmp.gt.f32.partialorder %v3533_v0, 0.0 }
 0xb3e   : > { %v8639_v57 = vsel %vm3534_vm15, %v3533_v0, %v3535_v54  ;;  %v3945_v0 = vld [vmem:[#allocation16 + $0x148] sm:$0xff]  ;;  %v6698_v54 = vpack.c.bf16 %v4108_v60, %v4107_v56  ;;  %v4279_v56 = vld [vmem:[#allocation19 + $0x18] sm:$0xff] }
 0xb3f   : > { %5722 = vmatpush3.msra.mxu0 %v8639_v57  ;;  %v6674_v11 = vpack.c.bf16 %v3945_v0, %v3944_v55  ;;  %v4281_v55 = vld [vmem:[#allocation19 + $0x28] sm:$0xff] }
 0xb40   : > { %5724 = vmatmul.mubr.msk.f32.vlgmr.msra.gmra.mrb[74].mxu0 %vm3538_vm1, %v3537_v14  ;;  %5726 = vmatprep.subr.mxu0 %v7349_v24  ;;  %v4109_v14 = vld [vmem:[#allocation16 + $0x1d0] sm:$0xff] }
 0xb41   : > { %5727 = vmatpush3.msra.mxu0 %v8639_v57  ;;  %5728 = vmatprep.mubr.msk.f32.mxu0 %vm7351_vm11, %v7349_v24 }
 0xb42   : > { %6613 = vmatprep.subr.bf16.mxu0 %v7350_v43 }
 0xb44   : > { %5729 = vmatmul.mubr.msk.f32.vlgmr.msra.gmra.mrb[76].mxu0 %vm3538_vm1, %v5175_v17  ;;  %v3947_v17 = vld [vmem:[#allocation16 + $0x158] sm:$0xff] }
 0xb45   : > { %6615 = vmatpush3.bf16.msra.mxu0 %v6614_v58  ;;  %5763 = vmatprep.mubr.msk.f32.mxu0 %vm7351_vm11, %v7349_v24  ;;  %v6677_v27 = vpack.c.bf16 %v3947_v17, %v3946_v21  ;;  %v4591_v21 = vld [vmem:[#allocation19 + $0x88] sm:$0xff] }
 0xb46   : > { %6616 = vmatprep.subr.bf16.mxu0 %v7350_v43 }
 0xb49   : > { %6618 = vmatpush3.bf16.msra.mxu0 %v6617_v26  ;;  %v3949_v26 = vld [vmem:[#allocation16 + $0x168] sm:$0xff] }
 0xb4a   : > { %6619 = vmatprep.subr.bf16.mxu0 %v7350_v43  ;;  %v6680_v29 = vpack.c.bf16 %v3949_v26, %v3948_v59  ;;  %v4593_v59 = vld [vmem:[#allocation19 + $0x98] sm:$0xff] }
 0xb4d   : > { %6621 = vmatpush3.bf16.msra.mxu0 %v6620_v62  ;;  %v4112_v62 = vld [vmem:[#allocation16 + $0x1e8] sm:$0xff] }
 0xb4e   : > { %6622 = vmatprep.subr.bf16.mxu0 %v7350_v43  ;;  %v6704_v1 = vpack.c.bf16 %v4112_v62, %v4111_v61  ;;  %v4594_v62 = vld [vmem:[#allocation19 + $0xa0] sm:$0xff] }
 0xb51   : > { %6624 = vmatpush3.bf16.msra.mxu0 %v6623_v4  ;;  %v3951_v4 = vld [vmem:[#allocation16 + $0x178] sm:$0xff] }
 0xb52   : > { %6625 = vmatprep.subr.bf16.mxu0 %v7350_v43  ;;  %v6683_v5 = vpack.c.bf16 %v3951_v4, %v3950_v2  ;;  %v5189_v4 = vld [vmem:[%s8888_s18 + $0x2] sm:$0x1] }
 0xb55   : > { %6627 = vmatpush3.bf16.msra.mxu0 %v6626_v9  ;;  %v4114_v9 = vld [vmem:[#allocation16 + $0x1f8] sm:$0xff] }
 0xb56   : > { %6628 = vmatprep.subr.bf16.mxu0 %v7350_v43  ;;  %v6707_v10 = vpack.c.bf16 %v4114_v9, %v4113_v8  ;;  %v4749_v8 = vld [vmem:[#allocation19 + $0xc8] sm:$0xff] }
 0xb59   : > { %6630 = vmatpush3.bf16.msra.mxu0 %v6629_v41 }
 0xb5a   : > { %6631 = vmatprep.subr.bf16.mxu0 %v7350_v43 }
 0xb5d   : > { %6633 = vmatpush3.bf16.msra.mxu0 %v6632_v18 }
 0xb5e   : > { %6634 = vmatprep.subr.bf16.mxu0 %v7350_v43 }
 0xb61   : > { %6636 = vmatpush3.bf16.msra.mxu0 %v6635_v45 }
 0xb62   : > { %5801 = vmatprep.subr.mxu0 %v7349_v24 }
 0xc13   : > { %v3608_v22 = vpop.f32.mrb[74].mxu0 }
 0xc14   : > { %5799 = vmatmul.mubr.f32.vlgmr.msra.gmra.mrb[30].mxu1 %v3608_v22  ;;  %v5725_v63 = vpop.f32.mrb[75].mxu0 }
 0xc15   : > { %5842 = vmatpush3.msra.mxu1 %v8639_v57  ;;  %5843 = vmatprep.mubr.msk.f32.mxu1 %vm7351_vm11, %v7349_v24  ;;  %v6710_v63 = vpack.c.bf16 %v4361_v49, %v4360_v15  ;;  %v4754_v49 = vld [vmem:[#allocation19 + $0xf0] sm:$0xff] }
 0xc16   : > { %6685 = vmatprep.subr.bf16.mxu1 %v7350_v43 }
 0xc17   : > { %v3699_v32 = vpop.f32.mrb[76].mxu0 }
 0xc18   : > { %5764 = vmatmul.mubr.f32.vlgmr.msra.gmra.mrb[78].mxu0 %v3699_v32  ;;  %v5730_v19 = vpop.f32.mrb[77].mxu0  ;;  %5844 = vmatmul.mubr.msk.f32.vlgmr.msra.gmra.mrb[32].mxu1 %vm3538_vm1, %v5179_v20  ;;  %v4362_v20 = vld [vmem:[#allocation19 + $0x50] sm:$0xff]  ;;  %v4365_v32 = vld [vmem:[#allocation19 + $0x68] sm:$0xff] }
 0xc19   : > { %5802 = vmatpush3.msra.mxu0 %v8639_v57  ;;  %5803 = vmatprep.mubr.msk.f32.mxu0 %vm7351_vm11, %v7349_v24  ;;  %v4110_v57 = vld [vmem:[#allocation16 + $0x1d8] sm:$0xff]  ;;  %v6713_v28 = vpack.c.bf16 %v4363_v25, %v4362_v20 }
 0xc1a   : > { %6661 = vmatprep.subr.bf16.mxu0 %v7350_v43  ;;  %6687 = vmatpush3.bf16.msra.mxu1 %v6686_v23  ;;  %v6701_v58 = vpack.c.bf16 %v4110_v57, %v4109_v14  ;;  %v4364_v23 = vld [vmem:[#allocation19 + $0x60] sm:$0xff]  ;;  %v4367_v19 = vld [vmem:[#allocation19 + $0x78] sm:$0xff] }
 0xc1b   : > { %6688 = vmatprep.subr.bf16.mxu1 %v7350_v43  ;;  %5878 = vmatprep.mubr.msk.f32.mxu1 %vm7351_vm11, %v7349_v24  ;;  %v6716_v34 = vpack.c.bf16 %v4365_v32, %v4364_v23  ;;  %v4283_v14 = vld [vmem:[#allocation19 + $0x38] sm:$0xff] }
 0xc1c   : > { %5804 = vmatmul.mubr.msk.f32.vlgmr.msra.gmra.mrb[80].mxu0 %vm3538_vm1, %v5177_v30  ;;  %v6719_v30 = vpack.c.bf16 %v4367_v19, %v4366_v16 }
 0xc1d   : > { %6663 = vmatpush3.bf16.msra.mxu0 %v6662_v35  ;;  %5838 = vmatprep.mubr.msk.f32.mxu0 %vm7351_vm11, %v7349_v24 }
 0xc1e   : > { %6664 = vmatprep.subr.bf16.mxu0 %v7350_v43  ;;  %6690 = vmatpush3.bf16.msra.mxu1 %v6689_v38 }
 0xc1f   : > { %6691 = vmatprep.subr.bf16.mxu1 %v7350_v43 }
 0xc21   : > { %6666 = vmatpush3.bf16.msra.mxu0 %v6665_v39 }
 0xc22   : > { %6667 = vmatprep.subr.bf16.mxu0 %v7350_v43  ;;  %6693 = vmatpush3.bf16.msra.mxu1 %v6692_v47  ;;  %v4197_v47 = vld [vmem:[%s8888_s18] sm:$0x1] }
 0xc23   : > { %6694 = vmatprep.subr.bf16.mxu1 %v7350_v43 }
 0xc25   : > { %6669 = vmatpush3.bf16.msra.mxu0 %v6668_v52  ;;  %v4277_v52 = vld [vmem:[#allocation19 + $0x8] sm:$0xff] }
 0xc26   : > { %6670 = vmatprep.subr.bf16.mxu0 %v7350_v43  ;;  %6696 = vmatpush3.bf16.msra.mxu1 %v6695_v53  ;;  %v6722_v46 = vpack.c.bf16 %v4277_v52, %v4276_v50  ;;  %v4278_v53 = vld [vmem:[#allocation19 + $0x10] sm:$0xff] }
 0xc27   : > { %6697 = vmatprep.subr.bf16.mxu1 %v7350_v43  ;;  %v6725_v60 = vpack.c.bf16 %v4279_v56, %v4278_v53 }
 0xc29   : > { %6672 = vmatpush3.bf16.msra.mxu0 %v6671_v6  ;;  %v4280_v6 = vld [vmem:[#allocation19 + $0x20] sm:$0xff] }
 0xc2a   : > { %6673 = vmatprep.subr.bf16.mxu0 %v7350_v43  ;;  %6699 = vmatpush3.bf16.msra.mxu1 %v6698_v54  ;;  %v6728_v0 = vpack.c.bf16 %v4281_v55, %v4280_v6  ;;  %v4282_v54 = vld [vmem:[#allocation19 + $0x30] sm:$0xff] }
 0xc2b   : > { %6700 = vmatprep.subr.bf16.mxu1 %v7350_v43  ;;  %v6731_v57 = vpack.c.bf16 %v4283_v14, %v4282_v54 }
 0xc2d   : > { %6675 = vmatpush3.bf16.msra.mxu0 %v6674_v11  ;;  %v4590_v11 = vld [vmem:[#allocation19 + $0x80] sm:$0xff] }
 0xc2e   : > { %6676 = vmatprep.subr.bf16.mxu0 %v7350_v43  ;;  %6702 = vmatpush3.bf16.msra.mxu1 %v6701_v58  ;;  %v6734_v17 = vpack.c.bf16 %v4591_v21, %v4590_v11 }
 0xc2f   : > { %6703 = vmatprep.subr.bf16.mxu1 %v7350_v43 }
 0xc31   : > { %6678 = vmatpush3.bf16.msra.mxu0 %v6677_v27  ;;  %v4592_v27 = vld [vmem:[#allocation19 + $0x90] sm:$0xff] }
 0xc32   : > { %6679 = vmatprep.subr.bf16.mxu0 %v7350_v43  ;;  %6705 = vmatpush3.bf16.msra.mxu1 %v6704_v1  ;;  %v4595_v1 = vld [vmem:[#allocation19 + $0xa8] sm:$0xff] }
 0xc33   : > { %6706 = vmatprep.subr.bf16.mxu1 %v7350_v43  ;;  %v6740_v9 = vpack.c.bf16 %v4595_v1, %v4594_v62 }
 0xc35   : > { %6681 = vmatpush3.bf16.msra.mxu0 %v6680_v29  ;;  %v6737_v29 = vpack.c.bf16 %v4593_v59, %v4592_v27 }
 0xc36   : > { %6682 = vmatprep.subr.bf16.mxu0 %v7350_v43  ;;  %6708 = vmatpush3.bf16.msra.mxu1 %v6707_v10  ;;  %v5193_v10 = vld [vmem:[%s8888_s18 + $0x3] sm:$0x1] }
 0xc37   : > { %6709 = vmatprep.subr.bf16.mxu1 %v7350_v43 }
 0xc39   : > { %6684 = vmatpush3.bf16.msra.mxu0 %v6683_v5  ;;  %v4748_v5 = vld [vmem:[#allocation19 + $0xc0] sm:$0xff] }
 0xc3a   : > { %5881 = vmatprep.subr.mxu0 %v7349_v24 }
 0xce7   : > { %v3856_v13 = vpop.f32.mrb[30].mxu1 }
 0xce8   : > { %v5800_v41 = vpop.f32.mrb[31].mxu1 }
 0xce9   : > { %v4750_v41 = vld [vmem:[#allocation19 + $0xd0] sm:$0xff] }
 0xceb   : > { %v3786_v3 = vpop.f32.mrb[78].mxu0  ;;  %v4094_v44 = vpop.f32.mrb[32].mxu1 }
 0xcec   : > { %v3857_v18 = vadd.f32 %v3856_v13, %v3786_v3  ;;  %v5765_v7 = vpop.f32.mrb[79].mxu0  ;;  %5879 = vmatmul.mubr.f32.vlgmr.msra.gmra.mrb[34].mxu1 %v4094_v44  ;;  %v5845_v12 = vpop.f32.mrb[33].mxu1  ;;  %v6746_v13 = vpack.c.bf16 %v4749_v8, %v4748_v5  ;;  %v4751_v3 = vld [vmem:[#allocation19 + $0xd8] sm:$0xff] }
 0xced   : > { %5907 = vmatprep.mubr.msk.f32.mxu1 %vm7351_vm11, %v7349_v24  ;;  %6711 = vmatpush3.bf16.msra.mxu1 %v6710_v63  ;;  %v6749_v44 = vpack.c.bf16 %v4751_v3, %v4750_v41  ;;  %v4597_v7 = vld [vmem:[#allocation19 + $0xb8] sm:$0xff]  ;;  %v4752_v12 = vld [vmem:[#allocation19 + $0xe0] sm:$0xff] }
 0xcee   : > { %6712 = vmatprep.subr.bf16.mxu1 %v7350_v43  ;;  %v4755_v63 = vld [vmem:[#allocation19 + $0xf8] sm:$0xff] }
 0xcef   : > { %v3931_v45 = vpop.f32.mrb[80].mxu0  ;;  %v6755_v20 = vpack.c.bf16 %v4755_v63, %v4754_v49 }
 0xcf0   : > { %5839 = vmatmul.mubr.f32.vlgmr.msra.gmra.mrb[82].mxu0 %v3931_v45  ;;  %v5805_v22 = vpop.f32.mrb[81].mxu0 }
 0xcf1   : > { %5883 = vmatprep.mubr.msk.f32.mxu0 %vm7351_vm11, %v7349_v24  ;;  %6714 = vmatpush3.bf16.msra.mxu1 %v6713_v28  ;;  %v4753_v22 = vld [vmem:[#allocation19 + $0xe8] sm:$0xff] }
 0xcf2   : > { %6715 = vmatprep.subr.bf16.mxu1 %v7350_v43  ;;  %v6752_v15 = vpack.c.bf16 %v4753_v22, %v4752_v12 }
 0xcf5   : > { %6717 = vmatpush3.bf16.msra.mxu1 %v6716_v34 }
 0xcf6   : > { %6718 = vmatprep.subr.bf16.mxu1 %v7350_v43 }
 0xcf9   : > { %6720 = vmatpush3.bf16.msra.mxu1 %v6719_v30 }
 0xcfa   : > { %5929 = vmatprep.subr.mxu1 %v7349_v24 }
 0xdbf   : > { %v4181_v35 = vpop.f32.mrb[34].mxu1 }
 0xdc0   : > { %v5880_v37 = vpop.f32.mrb[35].mxu1 }
 0xdc3   : > { %v4018_v36 = vpop.f32.mrb[82].mxu0 }
 0xdc4   : > { %v4022_v38 = vadd.f32 %v4018_v36, %v3857_v18  ;;  %v5840_v33 = vpop.f32.mrb[83].mxu0  ;;  %v4596_v18 = vld [vmem:[#allocation19 + $0xb0] sm:$0xff] }
 0xdc5   : > { %v6743_v45 = vpack.c.bf16 %v4597_v7, %v4596_v18 }
 0xdc6   : > { %v4185_v39 = vadd.f32 %v4181_v35, %v4022_v38  ;;  %v4830_v38 = vld [vmem:[%s8891_s27] sm:$0x1] }
 0xdc8   : > { %v4193_v51 = vadd.f32 %v5181_v31, %v4185_v39 }
 0xdca   : > { %vm4194_vm2 = vcmp.gt.f32.partialorder %v4193_v51, 0.0  ;;  %v4195_v40 = vmul.f32 0.2, %v4193_v51 }
 0xdcc   : > { %v4196_v48 = vsel %vm4194_vm2, %v4193_v51, %v4195_v40 }
 0xdcd   : > { %5882 = vmatpush3.msk.msra.mxu0 %vm4202_vm3, %v4196_v48 }
 0xdce   : > { %5884 = vmatmul.mubr.msk.f32.vlgmr.msra.gmra.mrb[84].mxu0 %vm4198_vm4, %v4197_v47  ;;  %5886 = vmatprep.subr.mxu0 %v7349_v24 }
 0xdcf   : > { %5887 = vmatpush3.msk.msra.mxu0 %vm4202_vm3, %v4196_v48  ;;  %5888 = vmatprep.mubr.msk.f32.mxu0 %vm7351_vm11, %v7349_v24 }
 0xdd0   : > { %6721 = vmatprep.subr.bf16.mxu0 %v7350_v43 }
 0xdd2   : > { %5889 = vmatmul.mubr.msk.f32.vlgmr.msra.gmra.mrb[86].mxu0 %vm4198_vm4, %v5184_v42 }
 0xdd3   : > { %6723 = vmatpush3.bf16.msra.mxu0 %v6722_v46  ;;  %5926 = vmatprep.mubr.msk.f32.mxu0 %vm7351_vm11, %v7349_v24 }
 0xdd4   : > { %6724 = vmatprep.subr.bf16.mxu0 %v7350_v43 }
 0xdd7   : > { %6726 = vmatpush3.bf16.msra.mxu0 %v6725_v60 }
 0xdd8   : > { %6727 = vmatprep.subr.bf16.mxu0 %v7350_v43 }
 0xddb   : > { %6729 = vmatpush3.bf16.msra.mxu0 %v6728_v0 }
 0xddc   : > { %6730 = vmatprep.subr.bf16.mxu0 %v7350_v43 }
 0xddf   : > { %6732 = vmatpush3.bf16.msra.mxu0 %v6731_v57 }
 0xde0   : > { %6733 = vmatprep.subr.bf16.mxu0 %v7350_v43 }
 0xea1   : > { %v4272_v58 = vpop.f32.mrb[84].mxu0 }
 0xea2   : > { %v5885_v26 = vpop.f32.mrb[85].mxu0  ;;  %5927 = vmatmul.mubr.msk.f32.vlgmr.msra.gmra.mrb[88].mxu0 %vm799_vm0, %v4272_v58 }
 0xea3   : > { %6735 = vmatpush3.bf16.msra.mxu0 %v6734_v17  ;;  %5950 = vmatprep.mubr.msk.f32.mxu0 %vm7351_vm11, %v7349_v24 }
 0xea4   : > { %6736 = vmatprep.subr.bf16.mxu0 %v7350_v43 }
 0xea5   : > { %v4355_v61 = vpop.f32.mrb[86].mxu0 }
 0xea6   : > { %5908 = vmatmul.mubr.msk.f32.vlgmr.msra.gmra.mrb[36].mxu1 %vm799_vm0, %v4355_v61  ;;  %v5890_v2 = vpop.f32.mrb[87].mxu0 }
 0xea7   : > { %5930 = vmatpush3.msk.msra.mxu1 %vm4202_vm3, %v4196_v48  ;;  %5931 = vmatprep.mubr.msk.f32.mxu1 %vm7351_vm11, %v7349_v24 }
 0xea8   : > { %5953 = vmatprep.subr.mxu1 %v7349_v24  ;;  %6738 = vmatpush3.bf16.msra.mxu0 %v6737_v29 }
 0xea9   : > { %6739 = vmatprep.subr.bf16.mxu0 %v7350_v43 }
 0xeaa   : > { %5932 = vmatmul.mubr.msk.f32.vlgmr.msra.gmra.mrb[38].mxu1 %vm4198_vm4, %v5189_v4 }
 0xeab   : > { %5954 = vmatpush3.msk.msra.mxu1 %vm4202_vm3, %v4196_v48  ;;  %5955 = vmatprep.mubr.msk.f32.mxu1 %vm7351_vm11, %v7349_v24 }
 0xeac   : > { %6745 = vmatprep.subr.bf16.mxu1 %v7350_v43  ;;  %6741 = vmatpush3.bf16.msra.mxu0 %v6740_v9 }
 0xead   : > { %6742 = vmatprep.subr.bf16.mxu0 %v7350_v43 }
 0xeae   : > { %5956 = vmatmul.mubr.msk.f32.vlgmr.msra.gmra.mrb[40].mxu1 %vm4198_vm4, %v5193_v10 }
 0xeaf   : > { %6747 = vmatpush3.bf16.msra.mxu1 %v6746_v13  ;;  %5974 = vmatprep.mubr.msk.f32.mxu1 %vm7351_vm11, %v7349_v24 }
 0xeb0   : > { %6748 = vmatprep.subr.bf16.mxu1 %v7350_v43  ;;  %6744 = vmatpush3.bf16.msra.mxu0 %v6743_v45 }
 0xeb3   : > { %6750 = vmatpush3.bf16.msra.mxu1 %v6749_v44 }
 0xeb4   : > { %6751 = vmatprep.subr.bf16.mxu1 %v7350_v43 }
 0xeb7   : > { %6753 = vmatpush3.bf16.msra.mxu1 %v6752_v15 }
 0xeb8   : > { %6754 = vmatprep.subr.bf16.mxu1 %v7350_v43 }
 0xebb   : > { %6756 = vmatpush3.bf16.msra.mxu1 %v6755_v20 }
 0xf75   : > { %v4510_v24 = vpop.f32.mrb[88].mxu0 }
 0xf76   : > { %v5928_v25 = vpop.f32.mrb[89].mxu0 }
 0xf79   : > { %v4437_v28 = vpop.f32.mrb[36].mxu1 }
 0xf7a   : > { %v4511_v23 = vadd.f32 %v4510_v24, %v4437_v28  ;;  %v5909_v32 = vpop.f32.mrb[37].mxu1 }
 0xf7d   : > { %v4585_v34 = vpop.f32.mrb[38].mxu1 }
 0xf7e   : > { %5951 = vmatmul.mubr.msk.f32.vlgmr.msra.gmra.mrb[90].mxu0 %vm799_vm0, %v4585_v34  ;;  %v5933_v16 = vpop.f32.mrb[39].mxu1 }
 0xf81   : > { %v4743_v19 = vpop.f32.mrb[40].mxu1 }
 0xf82   : > { %5975 = vmatmul.mubr.msk.f32.vlgmr.msra.gmra.mrb[42].mxu1 %vm799_vm0, %v4743_v19  ;;  %v5957_v30 = vpop.f32.mrb[41].mxu1 }
0x1051   : > { %v4667_v35 = vpop.f32.mrb[90].mxu0 }
0x1052   : > { %v4671_v37 = vadd.f32 %v4667_v35, %v4511_v23  ;;  %v5952_v43 = vpop.f32.mrb[91].mxu0 }
0x1055   : > { %v4825_v36 = vpop.f32.mrb[42].mxu1 }
0x1056   : > { %v4829_v33 = vadd.f32 %v4825_v36, %v4671_v37  ;;  %v5976_v31 = vpop.f32.mrb[43].mxu1 }
0x1058   : > { %v4831_v39 = vadd.f32 %v4830_v38, %v4829_v33 }
0x105a   : > { %4833 = vst.msk [vmem:[%s717_s8] sm:$0x1] %vm4832_vm5, %v4831_v39 }
0x105b   : > { %7259 = shalt.err (!%p7256_p7)
}
0x105c   : > { %s7260_s17 = scalar_lea.hbm %s8764_s3, 16  ;;  %s7264_s28 = scalar_lea.hbm %s8892_s24, 32 }
0x105d   : > { %p7261_p8 = scmp.ne.s32.totalorder %s8764_s3, %s7260_s17  ;;  %p7265_p1 = scmp.lt.u32.totalorder %s8764_s3, %s8892_s24 }
0x105e   : > { %p7266_p6 = scmp.lt.u32.totalorder %s7264_s28, %s7260_s17  ;;  %p7268_p5 = scmp.lt.u32.totalorder %s7260_s17, %s8764_s3 }
0x105f   : > { %p7262_p11 = pnand %p7261_p8, %p8893_p0 }
0x1060   : > { %p7267_p9 = por %p7266_p6, %p7265_p1 }
0x1061   : > { %p7263_p13 = pneg %p7262_p11 }
0x1062   : > { %p7269_p10 = por %p7268_p5, %p7267_p9 }
0x1064   : > { %p7270_p2 = pnand %p7269_p10, %p7263_p13 }
0x1066   : > { %7273 = shalt.err (!%p7270_p2)
}
0x1067   : > { %6825 = dma.vmem_to_hbm [thread:$0]  (%p8893_p0), %s8766_s29, 16, %s8764_s3, %s4835_s30  }
0x1068 PF: > { %s8894_s8 = sld [smem:[#allocation31_spill]]  ;;  %s8895_s5 = sld [smem:[#allocation28_spill]] }
0x1069   : > { %s8896_s2 = sld [smem:[#allocation35_spill]] }
0x106e   : > { %p6887_p3 = scmp.ge.s32.totalorder %s8894_s8, 2  ;;  %s4859_s25 = sand.u32 1, %s8895_s5  }
0x106f   : > { %p8897_p4 = scmp.ne.s32.totalorder %s8896_s2, 0  ;;  %s4860_s0 = scalar_lea.sflag [#allocation4], %s4859_s25 }
0x1071   : > { %p6862_p12 = pnand %p6887_p3, %p8897_p4 }
0x1073   : > { %7315 = dma.done.wait (!%p6862_p12), %s4860_s0, 16  }
0x1074   : > { %7317 = vsyncadd (!%p6862_p12), %s4860_s0, 4294967280  ;;  %s8898_s30 = sld [smem:[#allocation32_spill]]  ;;  %s8899_s27 = sld [smem:[#allocation29_spill]] }
0x1075   : > { %s8900_s28 = sld [smem:[#allocation30_spill]]  ;;  %s8901_s29 = sld [smem:[#allocation33_spill]] }
0x107a   : > { %p34_p7 = scmp.ge.s32.totalorder %s8898_s30, 4  }
0x107c   :  { %36 = sbr.rel (!%p34_p7) target bundleno = 19 (0x13), region = 202 }
0x1083   :  { %4864 = vsyncpa [#allocation3], 1 }
0x1084   :  { %4866 = vsyncpa [#allocation3 + $0x1], 1 }
0x1085   :  { %4867 = vsyncpa [#allocation6], 1 }
0x1086   :  { %4868 = vsyncpa [#allocation9], 1 }
0x1087   :  { %4869 = vsyncpa [#allocation12], 1 }
0x1088   :  { %4870 = vsyncpa [#allocation15], 1 }
0x1089   :  { %4871 = vsyncpa [#allocation18], 1 }
0x108a   :  { %4872 = vsyncpa [#allocation4], 1 }
0x108b   :  { %4874 = vsyncpa [#allocation4 + $0x1], 1 }

</bundles_post_ra>
